<compile_context>
chip_gen: v7x
topology: tpu7x:2x2x1
jax: 0.10.0
libtpu: 0.0.40
codegen_flags: <defaults>
</compile_context>

<pallas_src>
import functools
import math

import jax
import jax.numpy as jnp
from jax.experimental import pallas as pl
from jax.experimental.pallas import tpu as pltpu


def _default_vmem_limit():
    cap = 128 * 1024 * 1024
    try:
        info = pltpu.get_tpu_info()
        cap = int(getattr(info, "vmem_capacity_bytes", cap))
    except Exception:
        pass
    # ~70% of physical VMEM: ~89 MiB on v5e/v6e, ~45 MiB on v7x (64 MiB physical).
    return int(min(int(cap * 0.7), 100 * 1024 * 1024))


_VMEM_LIMIT = _default_vmem_limit()


def _pick_tile(dim, candidates):
    """Largest candidate that evenly divides `dim`, else the full dim."""
    for c in candidates:
        if dim % c == 0:
            return c
    return dim


# -----------------------------------------------------------------------------
# Tiled linear: accumulate directly into the resident output block; fused
# bias / ReLU / residual epilogue under pl.when on the last K step.
# -----------------------------------------------------------------------------
def _make_linear_kernel(has_bias, relu, has_residual):
    def kernel(*refs):
        idx = 0
        x_ref = refs[idx]; idx += 1
        w_ref = refs[idx]; idx += 1
        b_ref = None
        r_ref = None
        if has_bias:
            b_ref = refs[idx]; idx += 1
        if has_residual:
            r_ref = refs[idx]; idx += 1
        o_ref = refs[idx]

        k = pl.program_id(2)
        part = jnp.dot(x_ref[...], w_ref[...], preferred_element_type=jnp.float32)

        @pl.when(k == 0)
        def _first():
            o_ref[...] = part

        @pl.when(k > 0)
        def _acc():
            o_ref[...] += part

        if has_bias or relu or has_residual:
            @pl.when(k == pl.num_programs(2) - 1)
            def _epilogue():
                y = o_ref[...]
                if has_bias:
                    y = y + b_ref[...]
                if relu:
                    y = jnp.maximum(y, 0.0)
                if has_residual:
                    y = y + r_ref[...]
                o_ref[...] = y

    return kernel


def pallas_linear(x, w, b=None, relu=False, residual=None):
    M, K = x.shape
    N = w.shape[1]
    tm = _pick_tile(M, (1024, 512, 256, 128))
    tn = _pick_tile(N, (1024, 512, 256, 128))
    tk = _pick_tile(K, (512, 256, 128))
    grid = (M // tm, N // tn, K // tk)

    has_bias = b is not None
    has_res = residual is not None

    in_specs = [
        pl.BlockSpec((tm, tk), lambda i, j, k: (i, k)),
        pl.BlockSpec((tk, tn), lambda i, j, k: (k, j)),
    ]
    args = [x, w]
    if has_bias:
        in_specs.append(pl.BlockSpec((1, tn), lambda i, j, k: (0, j)))
        args.append(b.reshape(1, N))
    if has_res:
        in_specs.append(pl.BlockSpec((tm, tn), lambda i, j, k: (i, j)))
        args.append(residual)

    ce = pl.CostEstimate(
        flops=int(2 * M * N * K),
        transcendentals=0,
        bytes_accessed=int(4 * (M * K + K * N + M * N + (M * N if has_res else 0))))

    return pl.pallas_call(
        _make_linear_kernel(has_bias, relu, has_res),
        out_shape=jax.ShapeDtypeStruct((M, N), jnp.float32),
        grid=grid,
        in_specs=in_specs,
        out_specs=pl.BlockSpec((tm, tn), lambda i, j, k: (i, j)),
        compiler_params=pltpu.CompilerParams(
            dimension_semantics=("parallel", "parallel", "arbitrary"),
            vmem_limit_bytes=_VMEM_LIMIT),
        cost_estimate=ce,
    )(*args)


# -----------------------------------------------------------------------------
# Row-tiled LayerNorm
# -----------------------------------------------------------------------------
def _layernorm_kernel(x_ref, g_ref, b_ref, o_ref, *, eps):
    x = x_ref[...].astype(jnp.float32)
    mu = jnp.mean(x, axis=-1, keepdims=True)
    var = jnp.mean(jnp.square(x - mu), axis=-1, keepdims=True)
    y = (x - mu) * jax.lax.rsqrt(var + eps)
    o_ref[...] = (y * g_ref[...] + b_ref[...]).astype(o_ref.dtype)


def pallas_layernorm(x2d, g, b, eps=1e-5):
    M, D = x2d.shape
    tm = _pick_tile(M, (1024, 512, 256, 128))
    ce = pl.CostEstimate(flops=int(8 * M * D), transcendentals=0,
                         bytes_accessed=int(4 * (2 * M * D + 2 * D)))
    return pl.pallas_call(
        functools.partial(_layernorm_kernel, eps=eps),
        out_shape=jax.ShapeDtypeStruct((M, D), jnp.float32),
        grid=(M // tm,),
        in_specs=[
            pl.BlockSpec((tm, D), lambda i: (i, 0)),
            pl.BlockSpec((1, D), lambda i: (0, 0)),
            pl.BlockSpec((1, D), lambda i: (0, 0)),
        ],
        out_specs=pl.BlockSpec((tm, D), lambda i: (i, 0)),
        compiler_params=pltpu.CompilerParams(
            dimension_semantics=("parallel",),
            vmem_limit_bytes=_VMEM_LIMIT),
        cost_estimate=ce,
    )(x2d, g.reshape(1, D), b.reshape(1, D))


# -----------------------------------------------------------------------------
# Flash-style differential attention core.
#   grid = (B, n_lower_tri_blocks): causal skip at the grid level via scalar-prefetched
#   (q_block, k_block) index tables (only lower-triangle KV blocks are visited).
#   Q/K read from the rotated QK buffer, V from the fused QKV buffer (lane-dense,
#   no transposed copies in HBM); heads are static in-kernel column slices.
#   Output is a single lane-dense (tq, D) store per q-block at the diagonal step.
# -----------------------------------------------------------------------------
def _diff_attn_kernel(qidx_ref, kidx_ref, scal_ref,
                      q_ref, k_ref, v_ref, subw_ref, o_ref,
                      acc1, acc2, m1, m2, l1, l2,
                      *, H, hd, tq, q_off, k_off, v_off):
    n = pl.program_id(1)
    qi = qidx_ref[n]
    ki = kidx_ref[n]
    two_hd = 2 * hd

    @pl.when(ki == 0)
    def _init():
        acc1[...] = jnp.zeros_like(acc1)
        acc2[...] = jnp.zeros_like(acc2)
        m1[...] = jnp.full_like(m1, -jnp.inf)
        m2[...] = jnp.full_like(m2, -jnp.inf)
        l1[...] = jnp.zeros_like(l1)
        l2[...] = jnp.zeros_like(l2)

    dn = (((1,), (1,)), ((), ()))  # contract head_dim of q against head_dim of k

    def process(masked):
        if masked:
            # Diagonal block (tq == tk and qi == ki): local indices are enough.
            row = jax.lax.broadcasted_iota(jnp.int32, (tq, tq), 0)
            col = jax.lax.broadcasted_iota(jnp.int32, (tq, tq), 1)
            mask = jnp.where(col > row, jnp.float32(-jnp.inf), jnp.float32(0.0))
        for h in range(H):
            cq = q_off + h * two_hd
            ck = k_off + h * two_hd
            cv = v_off + h * two_hd
            v = v_ref[0, :, cv:cv + two_hd]

            def update(q, k, m_ref, l_ref, a_ref):
                s = jax.lax.dot_general(q, k, dn, preferred_element_type=jnp.float32)
                # torch.nan_to_num is identity on finite matmul outputs -> omitted.
                if masked:
                    s = s + mask
                m_prev = m_ref[h]
                m_new = jnp.maximum(m_prev, jnp.max(s, axis=-1, keepdims=True))
                alpha = jnp.exp(m_prev - m_new)
                p = jnp.exp(s - m_new)
                l_ref[h] = alpha * l_ref[h] + jnp.sum(p, axis=-1, keepdims=True)
                a_ref[h] = alpha * a_ref[h] + jnp.dot(
                    p, v, preferred_element_type=jnp.float32)
                m_ref[h] = m_new

            update(q_ref[0, :, cq:cq + hd], k_ref[0, :, ck:ck + hd], m1, l1, acc1)
            update(q_ref[0, :, cq + hd:cq + two_hd],
                   k_ref[0, :, ck + hd:ck + two_hd], m2, l2, acc2)

    @pl.when(ki < qi)          # fully-visible block: unmasked fast path
    def _interior():
        process(masked=False)

    @pl.when(ki == qi)         # diagonal block: masked, and last block of this q row
    def _diag_and_finalize():
        process(masked=True)
        lam = scal_ref[0]
        om = scal_ref[1]
        subw = subw_ref[...]                                   # (1, 2*hd)
        outs = []
        for h in range(H):
            a1 = acc1[h] * pl.reciprocal(l1[h], approx=True)
            a2 = acc2[h] * pl.reciprocal(l2[h], approx=True)
            attn = a1 - lam * a2
            # subln: RMSNorm(2*head_dim, eps=1e-5) with elementwise weight.
            ms = jnp.mean(jnp.square(attn), axis=-1, keepdims=True)
            attn = attn * jax.lax.rsqrt(ms + 1e-5)
            outs.append(attn * subw * om)
        # Single lane-dense (tq, D) store per q-block.
        o_ref[0] = jnp.concatenate(outs, axis=-1).astype(o_ref.dtype)


def pallas_diff_attn(qk_rot, qkv3, subw, scal, *, H, hd):
    """qk_rot: (B, T, 2D) rotated Q|K; qkv3: (B, T, 3D) (V columns used) -> (B, T, D)."""
    B, T, twoD = qk_rot.shape
    D = twoD // 2
    two_hd = 2 * hd
    assert D == H * two_hd

    t = _pick_tile(T, (256, 128))       # tq == tk (required for NaN-safe online softmax)
    nq = T // t

    # Lower-triangle block enumeration (grid-level causal skip), grouped by q-block.
    q_list, k_list = [], []
    for qb in range(nq):
        for kb in range(qb + 1):
            q_list.append(qb)
            k_list.append(kb)
    n_pairs = len(q_list)
    qidx = jnp.asarray(q_list, jnp.int32)
    kidx = jnp.asarray(k_list, jnp.int32)

    if D % 128 == 0:
        # Lane-aligned column blocks: Q / K from qk_rot, V columns of qkv3.
        q_spec = pl.BlockSpec((1, t, D), lambda b, n, qv, kv: (b, qv[n], 0))
        k_spec = pl.BlockSpec((1, t, D), lambda b, n, qv, kv: (b, kv[n], 1))
        v_spec = pl.BlockSpec((1, t, D), lambda b, n, qv, kv: (b, kv[n], 2))
        q_off, k_off, v_off = 0, 0, 0
    else:
        # Small-D fallback: full-width blocks, static column offsets in-kernel.
        q_spec = pl.BlockSpec((1, t, 2 * D), lambda b, n, qv, kv: (b, qv[n], 0))
        k_spec = pl.BlockSpec((1, t, 2 * D), lambda b, n, qv, kv: (b, kv[n], 0))
        v_spec = pl.BlockSpec((1, t, 3 * D), lambda b, n, qv, kv: (b, kv[n], 0))
        q_off, k_off, v_off = 0, D, 2 * D

    kernel = functools.partial(_diff_attn_kernel, H=H, hd=hd, tq=t,
                               q_off=q_off, k_off=k_off, v_off=v_off)

    grid_spec = pltpu.PrefetchScalarGridSpec(
        num_scalar_prefetch=2,
        grid=(B, n_pairs),
        in_specs=[
            pl.BlockSpec(memory_space=pltpu.MemorySpace.SMEM),          # scal (lam, 1-li)
            q_spec, k_spec, v_spec,
            pl.BlockSpec((1, two_hd), lambda b, n, qv, kv: (0, 0)),     # subln weight
        ],
        out_specs=pl.BlockSpec((1, t, D), lambda b, n, qv, kv: (b, qv[n], 0)),
        scratch_shapes=[
            pltpu.VMEM((H, t, two_hd), jnp.float32),   # acc1
            pltpu.VMEM((H, t, two_hd), jnp.float32),   # acc2
            pltpu.VMEM((H, t, 1), jnp.float32),        # m1
            pltpu.VMEM((H, t, 1), jnp.float32),        # m2
            pltpu.VMEM((H, t, 1), jnp.float32),        # l1
            pltpu.VMEM((H, t, 1), jnp.float32),        # l2
        ],
    )

    blk = n_pairs * t * t
    ce = pl.CostEstimate(
        flops=int(2 * B * 2 * H * blk * (hd + two_hd)),     # QK + PV over both streams
        transcendentals=int(2 * B * 2 * H * blk),           # the exps
        bytes_accessed=int(4 * (B * n_pairs * t * 3 * D + B * T * D)))

    return pl.pallas_call(
        kernel,
        out_shape=jax.ShapeDtypeStruct((B, T, D), jnp.float32),
        grid_spec=grid_spec,
        compiler_params=pltpu.CompilerParams(
            dimension_semantics=("parallel", "arbitrary"),
            vmem_limit_bytes=_VMEM_LIMIT),
        cost_estimate=ce,
    )(qidx, kidx, scal, qk_rot, qk_rot, qkv3, subw.reshape(1, two_hd))


# -----------------------------------------------------------------------------
# Thin wrappers with a pure-JAX reference path (use_pallas=False)
# -----------------------------------------------------------------------------
def linear(x, w, b=None, relu=False, residual=None, use_pallas=True):
    if use_pallas:
        return pallas_linear(x, w, b, relu=relu, residual=residual)
    y = jnp.dot(x, w, preferred_element_type=jnp.float32)
    if b is not None:
        y = y + b
    if relu:
        y = jnp.maximum(y, 0.0)
    if residual is not None:
        y = y + residual
    return y


def layernorm(x2d, g, b, use_pallas=True):
    if use_pallas:
        return pallas_layernorm(x2d, g, b)
    x = x2d.astype(jnp.float32)
    mu = jnp.mean(x, axis=-1, keepdims=True)
    var = jnp.mean(jnp.square(x - mu), axis=-1, keepdims=True)
    return (x - mu) * jax.lax.rsqrt(var + 1e-5) * g + b


def ref_diff_attn(qk_rot, qkv3, subw, scal, *, H, hd):
    """Pure-JAX reference of the diff-attention core (same inputs as the kernel)."""
    B, T, twoD = qk_rot.shape
    D = twoD // 2
    lam, om = scal[0], scal[1]
    q = qk_rot[..., :D].reshape(B, T, 2 * H, hd).transpose(0, 2, 1, 3)
    k = qk_rot[..., D:].reshape(B, T, 2 * H, hd).transpose(0, 2, 1, 3)
    v = qkv3[..., 2 * D:].reshape(B, T, H, 2 * hd).transpose(0, 2, 1, 3)
    s = jnp.einsum("bhqd,bhkd->bhqk", q, k)
    row = jnp.arange(T)
    mask = jnp.where(row[None, :] > row[:, None], -jnp.inf, 0.0).astype(jnp.float32)
    s = s + mask
    p = jax.nn.softmax(s, axis=-1)
    p = p.reshape(B, H, 2, T, T)
    diff = p[:, :, 0] - lam * p[:, :, 1]
    attn = jnp.einsum("bhqk,bhkd->bhqd", diff, v)
    ms = jnp.mean(jnp.square(attn), axis=-1, keepdims=True)
    attn = attn * jax.lax.rsqrt(ms + 1e-5) * subw
    attn = attn * om
    return attn.transpose(0, 2, 1, 3).reshape(B, T, H * 2 * hd)


# -----------------------------------------------------------------------------
# Interleaved rotary embedding: one fused element-wise pass over the contiguous
# Q|K columns of the fused QKV projection output (no per-tensor split/transpose).
# -----------------------------------------------------------------------------
def _rope_tables(T, hd, n_slots):
    half = hd // 2
    inv_freq = 1.0 / (10000.0 ** (jnp.arange(half, dtype=jnp.float32) / half))
    t = jnp.arange(T, dtype=jnp.float32)
    freqs = t[:, None] * inv_freq[None, :]            # (T, hd/2)
    cos = jnp.repeat(jnp.cos(freqs), 2, axis=1)       # (T, hd)
    sin = jnp.repeat(jnp.sin(freqs), 2, axis=1)       # (T, hd)
    sign = jnp.tile(jnp.array([-1.0, 1.0], jnp.float32), (half,))
    sin = sin * sign[None, :]                          # even col: -sin, odd col: +sin
    return jnp.tile(cos, (1, n_slots)), jnp.tile(sin, (1, n_slots))


def apply_rotary_qk(qk_flat, B, T, D, H, hd):
    """qk_flat: (B*T, 2D) Q|K columns -> rotated (B, T, 2D)."""
    cos, sin = _rope_tables(T, hd, 4 * H)              # (T, 2D)
    qk = qk_flat.reshape(B, T, 2 * D)
    even = (jnp.arange(2 * D) % 2) == 0
    swapped = jnp.where(even[None, None, :],
                        jnp.roll(qk, -1, axis=-1),     # even column j picks x[j+1]
                        jnp.roll(qk, 1, axis=-1))      # odd  column j picks x[j-1]
    return qk * cos[None] + swapped * sin[None]


# -----------------------------------------------------------------------------
# Layer plumbing
# -----------------------------------------------------------------------------
def multihead_diff_attn(xn, lp, n_heads, residual2d, use_pallas=True):
    B, T, D = xn.shape
    H = n_heads
    hd = D // H // 2
    xf = xn.reshape(B * T, D)

    # Fused Q|K|V projection (bias-free; Q scaling folded into Wq at init).
    qkv = linear(xf, lp["wqkv"], use_pallas=use_pallas)         # (B*T, 3D)
    qk_rot = apply_rotary_qk(qkv[:, :2 * D], B, T, D, H, hd)    # (B, T, 2D)
    qkv3 = qkv.reshape(B, T, 3 * D)

    lambda_1 = jnp.exp(jnp.sum(lp["lq1"] * lp["lk1"]))
    lambda_2 = jnp.exp(jnp.sum(lp["lq2"] * lp["lk2"]))
    lambda_full = lambda_1 - lambda_2 + lp["lambda_init"]
    scal = jnp.stack([lambda_full.astype(jnp.float32),
                      jnp.asarray(1.0 - lp["lambda_init"], jnp.float32)])

    if use_pallas:
        attn = pallas_diff_attn(qk_rot, qkv3, lp["subw"], scal, H=H, hd=hd)
    else:
        attn = ref_diff_attn(qk_rot, qkv3, lp["subw"], scal, H=H, hd=hd)

    # Output projection with the residual add fused into the epilogue.
    return linear(attn.reshape(B * T, D), lp["wo"], residual=residual2d,
                  use_pallas=use_pallas)


def encoder_layer(x, lp, n_heads, use_pallas=True):
    B, T, D = x.shape
    x2 = x.reshape(B * T, D)
    # NOTE: the PyTorch EncoderLayer reuses ONE LayerNorm module for both norms.
    xn = layernorm(x2, lp["ln_g"], lp["ln_b"], use_pallas).reshape(B, T, D)
    x2 = multihead_diff_attn(xn, lp, n_heads, residual2d=x2, use_pallas=use_pallas)
    xn2 = layernorm(x2, lp["ln_g"], lp["ln_b"], use_pallas)
    h = linear(xn2, lp["ff_w1"], lp["ff_b1"], relu=True, use_pallas=use_pallas)
    x2 = linear(h, lp["ff_w2"], lp["ff_b2"], residual=x2, use_pallas=use_pallas)
    return x2.reshape(B, T, D)


def encoder_forward(params, src, n_heads, mask=None, use_pallas=True):
    # TODO(synk): only the default causal mask (attn_mask=None) is supported in the
    #             Pallas fast path; custom additive masks are not ported.
    assert mask is None
    B, T = src.shape
    D = params["pos_emb"].shape[1]
    scale = jnp.sqrt(jnp.float32(D))
    x = scale * params["tok_emb"][src] + params["pos_emb"][:T][None, :, :]
    # dropout = identity (eval)
    for lp in params["layers"]:
        x = encoder_layer(x, lp, n_heads, use_pallas)
    x = layernorm(x.reshape(B * T, D), params["ln_g"], params["ln_b"],
                  use_pallas).reshape(B, T, D)
    return x


# -----------------------------------------------------------------------------
# Deterministic parameter initialization (shapes follow the PyTorch __init__)
# -----------------------------------------------------------------------------
def init_params(key, vocab, max_len, d_model, n_heads, n_layers, d_ff):
    hd = d_model // n_heads // 2
    scaling = hd ** -0.5

    def nrm(k, shape, std=0.05):
        return std * jax.random.normal(k, shape, jnp.float32)

    n_per_layer = 10
    keys = jax.random.split(key, 2 + n_per_layer * n_layers)
    params = {
        "tok_emb": nrm(keys[0], (vocab, d_model), 0.1),
        "pos_emb": nrm(keys[1], (max_len, d_model), 0.1),
        "ln_g": jnp.ones((d_model,), jnp.float32),
        "ln_b": jnp.zeros((d_model,), jnp.float32),
        "layers": [],
    }
    for i in range(n_layers):
        kk = keys[2 + n_per_layer * i: 2 + n_per_layer * (i + 1)]
        # Q scaling (head_dim**-0.5) folded into Wq: rotary is a rotation, so
        # scaling before == scaling after; saves a per-block multiply in the kernel.
        wq = nrm(kk[0], (d_model, d_model)) * scaling
        wk = nrm(kk[1], (d_model, d_model))   # n_rep = 1 (kv heads == heads)
        wv = nrm(kk[2], (d_model, d_model))
        lp = {
            "ln_g": jnp.ones((d_model,), jnp.float32),
            "ln_b": jnp.zeros((d_model,), jnp.float32),
            "wqkv": jnp.concatenate([wq, wk, wv], axis=1),   # fused (D, 3D)
            "wo": nrm(kk[3], (d_model, d_model)),
            "lq1": nrm(kk[4], (hd,), 0.1),
            "lk1": nrm(kk[5], (hd,), 0.1),
            "lq2": nrm(kk[6], (hd,), 0.1),
            "lk2": nrm(kk[7], (hd,), 0.1),
            "subw": jnp.ones((2 * hd,), jnp.float32),
            "lambda_init": float(0.8 - 0.6 * math.exp(-0.3 * i)),
            "ff_w1": nrm(kk[8], (d_model, d_ff)),
            "ff_b1": jnp.zeros((d_ff,), jnp.float32),
            "ff_w2": nrm(kk[9], (d_ff, d_model)),
            "ff_b2": jnp.zeros((d_model,), jnp.float32),
        }
        params["layers"].append(lp)
    return params


def _run_case(B, T, d_model, n_heads, n_layers, d_ff, vocab, max_len, seed):
    key = jax.random.PRNGKey(seed)
    pkey, skey = jax.random.split(key)
    params = init_params(pkey, vocab, max_len, d_model, n_heads, n_layers, d_ff)
    src = jax.random.randint(skey, (B, T), 0, vocab, dtype=jnp.int32)

    fwd_pallas = jax.jit(lambda p, s: encoder_forward(p, s, n_heads, mask=None,
                                                      use_pallas=True))
    fwd_ref = jax.jit(lambda p, s: encoder_forward(p, s, n_heads, mask=None,
                                                   use_pallas=False))

    out = jax.block_until_ready(fwd_pallas(params, src))
    ref = jax.block_until_ready(fwd_ref(params, src))

    assert out.shape == (B, T, d_model)
    assert bool(jnp.all(jnp.isfinite(out)))
    assert bool(jnp.allclose(out, ref, atol=3e-3, rtol=3e-3)), "mismatch vs JAX reference"


# -----------------------------------------------------------------------------
if __name__ == "__main__":
    # Small shape (single-block path, full-width attention blocks).
    _run_case(B=2, T=8, d_model=32, n_heads=4, n_layers=2, d_ff=64,
              vocab=32, max_len=16, seed=0)
    # Larger shape exercising multi-block tiling: grid-level causal skip, flash KV
    # accumulation, K-axis accumulation in the tiled linears, lane-aligned column blocks.
    _run_case(B=2, T=512, d_model=256, n_heads=4, n_layers=1, d_ff=512,
              vocab=64, max_len=512, seed=0)
    # TODO(synk): dropout is identity (eval-mode); training-mode RNG dropout not ported.
    print("KERNEL_OK")
</pallas_src>

<mosaic_0001>
module attributes {stable_mosaic.version = 11 : i64} {
  func.func @kernel(%arg0: i32, %arg1: i32, %arg2: i32, %arg3: memref<16x32xf32, #tpu.memory_space<vmem>>, %arg4: memref<32x96xf32, #tpu.memory_space<vmem>>, %arg5: memref<16x96xf32, #tpu.memory_space<vmem>>) attributes {dimension_semantics = [#tpu.dimension_semantics<parallel>, #tpu.dimension_semantics<parallel>, #tpu.dimension_semantics<arbitrary>], iteration_bounds = array<i64: 1, 1, 1>, scalar_prefetch = 0 : i64, scratch_operands = 0 : i64, tpu.core_type = #tpu.core_type<tc>, window_params = [{transform_indices = @transform_0, window_bounds = array<i64: 16, 32>}, {transform_indices = @transform_1, window_bounds = array<i64: 32, 96>}, {transform_indices = @transform_2, window_bounds = array<i64: 16, 96>}]} {
    %c0 = arith.constant 0 : index
    %c0_0 = arith.constant 0 : index
    %0 = vector.load %arg3[%c0, %c0_0] : memref<16x32xf32, #tpu.memory_space<vmem>>, vector<16x32xf32>
    %c0_1 = arith.constant 0 : index
    %c0_2 = arith.constant 0 : index
    %1 = vector.load %arg4[%c0_1, %c0_2] : memref<32x96xf32, #tpu.memory_space<vmem>>, vector<32x96xf32>
    %cst = arith.constant dense<0.000000e+00> : vector<16x96xf32>
    %2 = tpu.matmul %0, %1, %cst {dimension_numbers = #tpu.dot_dimension_numbers<[1], [0], [0], [1], [0, 0, 1, 1], [], []>} : vector<16x32xf32>, vector<32x96xf32>, vector<16x96xf32> -> vector<16x96xf32>
    %c0_i32 = arith.constant 0 : i32
    %3 = arith.cmpi eq, %arg2, %c0_i32 : i32
    %4 = arith.extui %3 : i1 to i32
    %c0_i32_3 = arith.constant 0 : i32
    %5 = arith.cmpi ne, %4, %c0_i32_3 : i32
    scf.if %5 {
      %c0_6 = arith.constant 0 : index
      %c0_7 = arith.constant 0 : index
      %9 = vector.load %arg5[%c0_6, %c0_7] : memref<16x96xf32, #tpu.memory_space<vmem>>, vector<16x96xf32>
      tpu.vector_store %arg5[%c0_6, %c0_7], %2 {strides = array<i32>} : memref<16x96xf32, #tpu.memory_space<vmem>>, vector<16x96xf32>,
    } else {
    }
    %c0_i32_4 = arith.constant 0 : i32
    %6 = arith.cmpi sgt, %arg2, %c0_i32_4 : i32
    %7 = arith.extui %6 : i1 to i32
    %c0_i32_5 = arith.constant 0 : i32
    %8 = arith.cmpi ne, %7, %c0_i32_5 : i32
    scf.if %8 {
      %c0_6 = arith.constant 0 : index
      %c0_7 = arith.constant 0 : index
      %9 = vector.load %arg5[%c0_6, %c0_7] : memref<16x96xf32, #tpu.memory_space<vmem>>, vector<16x96xf32>
      %10 = arith.addf %9, %2 : vector<16x96xf32>
      %c0_8 = arith.constant 0 : index
      %c0_9 = arith.constant 0 : index
      %11 = vector.load %arg5[%c0_8, %c0_9] : memref<16x96xf32, #tpu.memory_space<vmem>>, vector<16x96xf32>
      tpu.vector_store %arg5[%c0_8, %c0_9], %10 {strides = array<i32>} : memref<16x96xf32, #tpu.memory_space<vmem>>, vector<16x96xf32>,
    } else {
    }
    return
  }
  func.func @transform_0(%arg0: i32, %arg1: i32, %arg2: i32) -> (i32, i32) {
    %c0_i32 = arith.constant 0 : i32
    return %arg0, %arg2 : i32, i32
  }
  func.func @transform_1(%arg0: i32, %arg1: i32, %arg2: i32) -> (i32, i32) {
    %c0_i32 = arith.constant 0 : i32
    return %arg2, %arg1 : i32, i32
  }
  func.func @transform_2(%arg0: i32, %arg1: i32, %arg2: i32) -> (i32, i32) {
    %c0_i32 = arith.constant 0 : i32
    return %arg0, %arg1 : i32, i32
  }
}

module attributes {stable_mosaic.version = 11 : i64} {
  func.func @_layernorm_kernel(%arg0: i32, %arg1: memref<16x32xf32, #tpu.memory_space<vmem>>, %arg2: memref<1x32xf32, #tpu.memory_space<vmem>>, %arg3: memref<1x32xf32, #tpu.memory_space<vmem>>, %arg4: memref<16x32xf32, #tpu.memory_space<vmem>>) attributes {dimension_semantics = [#tpu.dimension_semantics<parallel>], iteration_bounds = array<i64: 1>, scalar_prefetch = 0 : i64, scratch_operands = 0 : i64, tpu.core_type = #tpu.core_type<tc>, window_params = [{transform_indices = @transform_0, window_bounds = array<i64: 16, 32>}, {pipeline_mode = #tpu.pipeline_mode<synchronous>, transform_indices = @transform_1, window_bounds = array<i64: 1, 32>}, {pipeline_mode = #tpu.pipeline_mode<synchronous>, transform_indices = @transform_2, window_bounds = array<i64: 1, 32>}, {transform_indices = @transform_3, window_bounds = array<i64: 16, 32>}]} {
    %c0 = arith.constant 0 : index
    %c0_0 = arith.constant 0 : index
    %0 = vector.load %arg1[%c0, %c0_0] : memref<16x32xf32, #tpu.memory_space<vmem>>, vector<16x32xf32>
    %cst = arith.constant dense<0.000000e+00> : vector<16xf32>
    %1 = vector.multi_reduction <add>, %0, %cst [1] : vector<16x32xf32> to vector<16xf32>
    %2 = vector.shape_cast %1 : vector<16xf32> to vector<16x1xf32>
    %cst_1 = arith.constant 3.200000e+01 : f32
    %3 = vector.broadcast %cst_1 : f32 to vector<16x1xf32>
    %4 = arith.divf %2, %3 : vector<16x1xf32>
    %5 = vector.broadcast %4 : vector<16x1xf32> to vector<16x32xf32>
    %6 = arith.subf %0, %5 : vector<16x32xf32>
    %7 = arith.mulf %6, %6 : vector<16x32xf32>
    %cst_2 = arith.constant dense<0.000000e+00> : vector<16xf32>
    %8 = vector.multi_reduction <add>, %7, %cst_2 [1] : vector<16x32xf32> to vector<16xf32>
    %9 = vector.shape_cast %8 : vector<16xf32> to vector<16x1xf32>
    %cst_3 = arith.constant 3.200000e+01 : f32
    %10 = vector.broadcast %cst_3 : f32 to vector<16x1xf32>
    %11 = arith.divf %9, %10 : vector<16x1xf32>
    %12 = vector.broadcast %4 : vector<16x1xf32> to vector<16x32xf32>
    %13 = arith.subf %0, %12 : vector<16x32xf32>
    %cst_4 = arith.constant 9.99999974E-6 : f32
    %14 = vector.broadcast %cst_4 : f32 to vector<16x1xf32>
    %15 = arith.addf %11, %14 : vector<16x1xf32>
    %16 = math.rsqrt %15 : vector<16x1xf32>
    %17 = vector.broadcast %16 : vector<16x1xf32> to vector<16x32xf32>
    %18 = arith.mulf %13, %17 : vector<16x32xf32>
    %c0_5 = arith.constant 0 : index
    %c0_6 = arith.constant 0 : index
    %19 = vector.load %arg2[%c0_5, %c0_6] : memref<1x32xf32, #tpu.memory_space<vmem>>, vector<1x32xf32>
    %20 = vector.broadcast %19 : vector<1x32xf32> to vector<16x32xf32>
    %21 = arith.mulf %18, %20 : vector<16x32xf32>
    %c0_7 = arith.constant 0 : index
    %c0_8 = arith.constant 0 : index
    %22 = vector.load %arg3[%c0_7, %c0_8] : memref<1x32xf32, #tpu.memory_space<vmem>>, vector<1x32xf32>
    %23 = vector.broadcast %22 : vector<1x32xf32> to vector<16x32xf32>
    %24 = arith.addf %21, %23 : vector<16x32xf32>
    %c0_9 = arith.constant 0 : index
    %c0_10 = arith.constant 0 : index
    %25 = vector.load %arg4[%c0_9, %c0_10] : memref<16x32xf32, #tpu.memory_space<vmem>>, vector<16x32xf32>
    tpu.vector_store %arg4[%c0_9, %c0_10], %24 {strides = array<i32>} : memref<16x32xf32, #tpu.memory_space<vmem>>, vector<16x32xf32>,
    return
  }
  func.func @transform_0(%arg0: i32) -> (i32, i32) {
    %c0_i32 = arith.constant 0 : i32
    %c0_i32_0 = arith.constant 0 : i32
    return %arg0, %c0_i32 : i32, i32
  }
  func.func @transform_1(%arg0: i32) -> (i32, i32) {
    %c0_i32 = arith.constant 0 : i32
    %c0_i32_0 = arith.constant 0 : i32
    %c0_i32_1 = arith.constant 0 : i32
    return %c0_i32, %c0_i32_0 : i32, i32
  }
  func.func @transform_2(%arg0: i32) -> (i32, i32) {
    %c0_i32 = arith.constant 0 : i32
    %c0_i32_0 = arith.constant 0 : i32
    %c0_i32_1 = arith.constant 0 : i32
    return %c0_i32, %c0_i32_0 : i32, i32
  }
  func.func @transform_3(%arg0: i32) -> (i32, i32) {
    %c0_i32 = arith.constant 0 : i32
    %c0_i32_0 = arith.constant 0 : i32
    return %arg0, %c0_i32 : i32, i32
  }
}

module attributes {stable_mosaic.version = 11 : i64} {
  func.func @kernel(%arg0: i32, %arg1: i32, %arg2: i32, %arg3: memref<16x32xf32, #tpu.memory_space<vmem>>, %arg4: memref<32x32xf32, #tpu.memory_space<vmem>>, %arg5: memref<16x32xf32, #tpu.memory_space<vmem>>, %arg6: memref<16x32xf32, #tpu.memory_space<vmem>>) attributes {dimension_semantics = [#tpu.dimension_semantics<parallel>, #tpu.dimension_semantics<parallel>, #tpu.dimension_semantics<arbitrary>], iteration_bounds = array<i64: 1, 1, 1>, scalar_prefetch = 0 : i64, scratch_operands = 0 : i64, tpu.core_type = #tpu.core_type<tc>, window_params = [{transform_indices = @transform_0, window_bounds = array<i64: 16, 32>}, {transform_indices = @transform_1, window_bounds = array<i64: 32, 32>}, {transform_indices = @transform_2, window_bounds = array<i64: 16, 32>}, {transform_indices = @transform_3, window_bounds = array<i64: 16, 32>}]} {
    %c0 = arith.constant 0 : index
    %c0_0 = arith.constant 0 : index
    %0 = vector.load %arg3[%c0, %c0_0] : memref<16x32xf32, #tpu.memory_space<vmem>>, vector<16x32xf32>
    %c0_1 = arith.constant 0 : index
    %c0_2 = arith.constant 0 : index
    %1 = vector.load %arg4[%c0_1, %c0_2] : memref<32x32xf32, #tpu.memory_space<vmem>>, vector<32x32xf32>
    %cst = arith.constant dense<0.000000e+00> : vector<16x32xf32>
    %2 = tpu.matmul %0, %1, %cst {dimension_numbers = #tpu.dot_dimension_numbers<[1], [0], [0], [1], [0, 0, 1, 1], [], []>} : vector<16x32xf32>, vector<32x32xf32>, vector<16x32xf32> -> vector<16x32xf32>
    %c0_i32 = arith.constant 0 : i32
    %3 = arith.cmpi eq, %arg2, %c0_i32 : i32
    %4 = arith.extui %3 : i1 to i32
    %c0_i32_3 = arith.constant 0 : i32
    %5 = arith.cmpi ne, %4, %c0_i32_3 : i32
    scf.if %5 {
      %c0_8 = arith.constant 0 : index
      %c0_9 = arith.constant 0 : index
      %12 = vector.load %arg6[%c0_8, %c0_9] : memref<16x32xf32, #tpu.memory_space<vmem>>, vector<16x32xf32>
      tpu.vector_store %arg6[%c0_8, %c0_9], %2 {strides = array<i32>} : memref<16x32xf32, #tpu.memory_space<vmem>>, vector<16x32xf32>,
    } else {
    }
    %c0_i32_4 = arith.constant 0 : i32
    %6 = arith.cmpi sgt, %arg2, %c0_i32_4 : i32
    %7 = arith.extui %6 : i1 to i32
    %c0_i32_5 = arith.constant 0 : i32
    %8 = arith.cmpi ne, %7, %c0_i32_5 : i32
    scf.if %8 {
      %c0_8 = arith.constant 0 : index
      %c0_9 = arith.constant 0 : index
      %12 = vector.load %arg6[%c0_8, %c0_9] : memref<16x32xf32, #tpu.memory_space<vmem>>, vector<16x32xf32>
      %13 = arith.addf %12, %2 : vector<16x32xf32>
      %c0_10 = arith.constant 0 : index
      %c0_11 = arith.constant 0 : index
      %14 = vector.load %arg6[%c0_10, %c0_11] : memref<16x32xf32, #tpu.memory_space<vmem>>, vector<16x32xf32>
      tpu.vector_store %arg6[%c0_10, %c0_11], %13 {strides = array<i32>} : memref<16x32xf32, #tpu.memory_space<vmem>>, vector<16x32xf32>,
    } else {
    }
    %c0_i32_6 = arith.constant 0 : i32
    %9 = arith.cmpi eq, %arg2, %c0_i32_6 : i32
    %10 = arith.extui %9 : i1 to i32
    %c0_i32_7 = arith.constant 0 : i32
    %11 = arith.cmpi ne, %10, %c0_i32_7 : i32
    scf.if %11 {
      %c0_8 = arith.constant 0 : index
      %c0_9 = arith.constant 0 : index
      %12 = vector.load %arg6[%c0_8, %c0_9] : memref<16x32xf32, #tpu.memory_space<vmem>>, vector<16x32xf32>
      %c0_10 = arith.constant 0 : index
      %c0_11 = arith.constant 0 : index
      %13 = vector.load %arg5[%c0_10, %c0_11] : memref<16x32xf32, #tpu.memory_space<vmem>>, vector<16x32xf32>
      %14 = arith.addf %12, %13 : vector<16x32xf32>
      %c0_12 = arith.constant 0 : index
      %c0_13 = arith.constant 0 : index
      %15 = vector.load %arg6[%c0_12, %c0_13] : memref<16x32xf32, #tpu.memory_space<vmem>>, vector<16x32xf32>
      tpu.vector_store %arg6[%c0_12, %c0_13], %14 {strides = array<i32>} : memref<16x32xf32, #tpu.memory_space<vmem>>, vector<16x32xf32>,
    } else {
    }
    return
  }
  func.func @transform_0(%arg0: i32, %arg1: i32, %arg2: i32) -> (i32, i32) {
    %c0_i32 = arith.constant 0 : i32
    return %arg0, %arg2 : i32, i32
  }
  func.func @transform_1(%arg0: i32, %arg1: i32, %arg2: i32) -> (i32, i32) {
    %c0_i32 = arith.constant 0 : i32
    return %arg2, %arg1 : i32, i32
  }
  func.func @transform_2(%arg0: i32, %arg1: i32, %arg2: i32) -> (i32, i32) {
    %c0_i32 = arith.constant 0 : i32
    return %arg0, %arg1 : i32, i32
  }
  func.func @transform_3(%arg0: i32, %arg1: i32, %arg2: i32) -> (i32, i32) {
    %c0_i32 = arith.constant 0 : i32
    return %arg0, %arg1 : i32, i32
  }
}

module attributes {stable_mosaic.version = 11 : i64} {
  func.func @_diff_attn_kernel(%arg0: i32, %arg1: i32, %arg2: memref<1xi32, #tpu.memory_space<smem>>, %arg3: memref<1xi32, #tpu.memory_space<smem>>, %arg4: memref<2xf32, #tpu.memory_space<smem>>, %arg5: memref<1x8x64xf32, #tpu.memory_space<vmem>>, %arg6: memref<1x8x64xf32, #tpu.memory_space<vmem>>, %arg7: memref<1x8x96xf32, #tpu.memory_space<vmem>>, %arg8: memref<1x8xf32, #tpu.memory_space<vmem>>, %arg9: memref<1x8x32xf32, #tpu.memory_space<vmem>>, %arg10: memref<4x8x8xf32, #tpu.memory_space<vmem>>, %arg11: memref<4x8x8xf32, #tpu.memory_space<vmem>>, %arg12: memref<4x8x1xf32, #tpu.memory_space<vmem>>, %arg13: memref<4x8x1xf32, #tpu.memory_space<vmem>>, %arg14: memref<4x8x1xf32, #tpu.memory_space<vmem>>, %arg15: memref<4x8x1xf32, #tpu.memory_space<vmem>>) attributes {dimension_semantics = [#tpu.dimension_semantics<parallel>, #tpu.dimension_semantics<arbitrary>], iteration_bounds = array<i64: 2, 1>, scalar_prefetch = 2 : i64, scratch_operands = 6 : i64, tpu.core_type = #tpu.core_type<tc>, window_params = [{transform_indices = @transform_0, window_bounds = array<i64: 2>}, {transform_indices = @transform_1, window_bounds = array<i64: 1, 8, 64>}, {transform_indices = @transform_2, window_bounds = array<i64: 1, 8, 64>}, {transform_indices = @transform_3, window_bounds = array<i64: 1, 8, 96>}, {pipeline_mode = #tpu.pipeline_mode<synchronous>, transform_indices = @transform_4, window_bounds = array<i64: 1, 8>}, {transform_indices = @transform_5, window_bounds = array<i64: 1, 8, 32>}]} {
    %0 = arith.index_cast %arg1 : i32 to index
    %1 = memref.load %arg2[%0] : memref<1xi32, #tpu.memory_space<smem>>
    %2 = arith.index_cast %arg1 : i32 to index
    %3 = memref.load %arg3[%2] : memref<1xi32, #tpu.memory_space<smem>>
    %c0_i32 = arith.constant 0 : i32
    %4 = arith.cmpi eq, %3, %c0_i32 : i32
    %5 = arith.extui %4 : i1 to i32
    %c0_i32_0 = arith.constant 0 : i32
    %6 = arith.cmpi ne, %5, %c0_i32_0 : i32
    scf.if %6 {
      %cst = arith.constant 0.000000e+00 : f32
      %13 = vector.broadcast %cst : f32 to vector<4x8x8xf32>
      %c0 = arith.constant 0 : index
      %c0_3 = arith.constant 0 : index
      %c0_4 = arith.constant 0 : index
      %14 = vector.load %arg10[%c0, %c0_3, %c0_4] : memref<4x8x8xf32, #tpu.memory_space<vmem>>, vector<4x8x8xf32>
      tpu.vector_store %arg10[%c0, %c0_3, %c0_4], %13 {strides = array<i32>} : memref<4x8x8xf32, #tpu.memory_space<vmem>>, vector<4x8x8xf32>,
      %cst_5 = arith.constant 0.000000e+00 : f32
      %15 = vector.broadcast %cst_5 : f32 to vector<4x8x8xf32>
      %c0_6 = arith.constant 0 : index
      %c0_7 = arith.constant 0 : index
      %c0_8 = arith.constant 0 : index
      %16 = vector.load %arg11[%c0_6, %c0_7, %c0_8] : memref<4x8x8xf32, #tpu.memory_space<vmem>>, vector<4x8x8xf32>
      tpu.vector_store %arg11[%c0_6, %c0_7, %c0_8], %15 {strides = array<i32>} : memref<4x8x8xf32, #tpu.memory_space<vmem>>, vector<4x8x8xf32>,
      %cst_9 = arith.constant 0xFF800000 : f32
      %17 = vector.broadcast %cst_9 : f32 to vector<4x8x1xf32>
      %c0_10 = arith.constant 0 : index
      %c0_11 = arith.constant 0 : index
      %c0_12 = arith.constant 0 : index
      %18 = vector.load %arg12[%c0_10, %c0_11, %c0_12] : memref<4x8x1xf32, #tpu.memory_space<vmem>>, vector<4x8x1xf32>
      tpu.vector_store %arg12[%c0_10, %c0_11, %c0_12], %17 {strides = array<i32>} : memref<4x8x1xf32, #tpu.memory_space<vmem>>, vector<4x8x1xf32>,
      %cst_13 = arith.constant 0xFF800000 : f32
      %19 = vector.broadcast %cst_13 : f32 to vector<4x8x1xf32>
      %c0_14 = arith.constant 0 : index
      %c0_15 = arith.constant 0 : index
      %c0_16 = arith.constant 0 : index
      %20 = vector.load %arg13[%c0_14, %c0_15, %c0_16] : memref<4x8x1xf32, #tpu.memory_space<vmem>>, vector<4x8x1xf32>
      tpu.vector_store %arg13[%c0_14, %c0_15, %c0_16], %19 {strides = array<i32>} : memref<4x8x1xf32, #tpu.memory_space<vmem>>, vector<4x8x1xf32>,
      %cst_17 = arith.constant 0.000000e+00 : f32
      %21 = vector.broadcast %cst_17 : f32 to vector<4x8x1xf32>
      %c0_18 = arith.constant 0 : index
      %c0_19 = arith.constant 0 : index
      %c0_20 = arith.constant 0 : index
      %22 = vector.load %arg14[%c0_18, %c0_19, %c0_20] : memref<4x8x1xf32, #tpu.memory_space<vmem>>, vector<4x8x1xf32>
      tpu.vector_store %arg14[%c0_18, %c0_19, %c0_20], %21 {strides = array<i32>} : memref<4x8x1xf32, #tpu.memory_space<vmem>>, vector<4x8x1xf32>,
      %cst_21 = arith.constant 0.000000e+00 : f32
      %23 = vector.broadcast %cst_21 : f32 to vector<4x8x1xf32>
      %c0_22 = arith.constant 0 : index
      %c0_23 = arith.constant 0 : index
      %c0_24 = arith.constant 0 : index
      %24 = vector.load %arg15[%c0_22, %c0_23, %c0_24] : memref<4x8x1xf32, #tpu.memory_space<vmem>>, vector<4x8x1xf32>
      tpu.vector_store %arg15[%c0_22, %c0_23, %c0_24], %23 {strides = array<i32>} : memref<4x8x1xf32, #tpu.memory_space<vmem>>, vector<4x8x1xf32>,
    } else {
    }
    %7 = arith.cmpi slt, %3, %1 : i32
    %8 = arith.extui %7 : i1 to i32
    %c0_i32_1 = arith.constant 0 : i32
    %9 = arith.cmpi ne, %8, %c0_i32_1 : i32
    scf.if %9 {
      %c0 = arith.constant 0 : index
      %c0_3 = arith.constant 0 : index
      %c64 = arith.constant 64 : index
      %13 = vector.load %arg7[%c0, %c0_3, %c64] : memref<1x8x96xf32, #tpu.memory_space<vmem>>, vector<1x8x8xf32>
      %14 = vector.shape_cast %13 : vector<1x8x8xf32> to vector<8x8xf32>
      %c0_4 = arith.constant 0 : index
      %c0_5 = arith.constant 0 : index
      %c0_6 = arith.constant 0 : index
      %15 = vector.load %arg5[%c0_4, %c0_5, %c0_6] : memref<1x8x64xf32, #tpu.memory_space<vmem>>, vector<1x8x4xf32>
      %16 = vector.shape_cast %15 : vector<1x8x4xf32> to vector<8x4xf32>
      %c0_7 = arith.constant 0 : index
      %c0_8 = arith.constant 0 : index
      %c32 = arith.constant 32 : index
      %17 = vector.load %arg6[%c0_7, %c0_8, %c32] : memref<1x8x64xf32, #tpu.memory_space<vmem>>, vector<1x8x4xf32>
      %18 = vector.shape_cast %17 : vector<1x8x4xf32> to vector<8x4xf32>
      %cst = arith.constant dense<0.000000e+00> : vector<8x8xf32>
      %19 = tpu.matmul %16, %18, %cst {dimension_numbers = #tpu.dot_dimension_numbers<[1], [1], [0], [0], [0, 0, 1, 0], [], []>} : vector<8x4xf32>, vector<8x4xf32>, vector<8x8xf32> -> vector<8x8xf32>
      %c0_9 = arith.constant 0 : index
      %c0_10 = arith.constant 0 : index
      %c0_11 = arith.constant 0 : index
      %20 = vector.load %arg12[%c0_9, %c0_10, %c0_11] : memref<4x8x1xf32, #tpu.memory_space<vmem>>, vector<1x8x1xf32>
      %21 = vector.shape_cast %20 : vector<1x8x1xf32> to vector<8x1xf32>
      %cst_12 = arith.constant dense<0xFF800000> : vector<8xf32>
      %22 = vector.multi_reduction <maximumf>, %19, %cst_12 [1] : vector<8x8xf32> to vector<8xf32>
      %23 = vector.shape_cast %22 : vector<8xf32> to vector<8x1xf32>
      %24 = arith.maximumf %21, %23 : vector<8x1xf32>
      %25 = arith.subf %21, %24 : vector<8x1xf32>
      %26 = math.exp %25 : vector<8x1xf32>
      %27 = vector.broadcast %24 : vector<8x1xf32> to vector<8x8xf32>
      %28 = arith.subf %19, %27 : vector<8x8xf32>
      %29 = math.exp %28 : vector<8x8xf32>
      %c0_13 = arith.constant 0 : index
      %c0_14 = arith.constant 0 : index
      %c0_15 = arith.constant 0 : index
      %30 = vector.load %arg14[%c0_13, %c0_14, %c0_15] : memref<4x8x1xf32, #tpu.memory_space<vmem>>, vector<1x8x1xf32>
      %31 = vector.shape_cast %30 : vector<1x8x1xf32> to vector<8x1xf32>
      %32 = arith.mulf %26, %31 : vector<8x1xf32>
      %cst_16 = arith.constant dense<0.000000e+00> : vector<8xf32>
      %33 = vector.multi_reduction <add>, %29, %cst_16 [1] : vector<8x8xf32> to vector<8xf32>
      %34 = vector.shape_cast %33 : vector<8xf32> to vector<8x1xf32>
      %35 = arith.addf %32, %34 : vector<8x1xf32>
      %c0_17 = arith.constant 0 : index
      %c0_18 = arith.constant 0 : index
      %c0_19 = arith.constant 0 : index
      %36 = vector.load %arg14[%c0_17, %c0_18, %c0_19] : memref<4x8x1xf32, #tpu.memory_space<vmem>>, vector<1x8x1xf32>
      %37 = vector.shape_cast %36 : vector<1x8x1xf32> to vector<8x1xf32>
      %38 = vector.shape_cast %35 : vector<8x1xf32> to vector<1x8x1xf32>
      tpu.vector_store %arg14[%c0_17, %c0_18, %c0_19], %38 {strides = array<i32>} : memref<4x8x1xf32, #tpu.memory_space<vmem>>, vector<1x8x1xf32>,
      %c0_20 = arith.constant 0 : index
      %c0_21 = arith.constant 0 : index
      %c0_22 = arith.constant 0 : index
      %39 = vector.load %arg10[%c0_20, %c0_21, %c0_22] : memref<4x8x8xf32, #tpu.memory_space<vmem>>, vector<1x8x8xf32>
      %40 = vector.shape_cast %39 : vector<1x8x8xf32> to vector<8x8xf32>
      %41 = vector.broadcast %26 : vector<8x1xf32> to vector<8x8xf32>
      %42 = arith.mulf %41, %40 : vector<8x8xf32>
      %cst_23 = arith.constant dense<0.000000e+00> : vector<8x8xf32>
      %43 = tpu.matmul %29, %14, %cst_23 {dimension_numbers = #tpu.dot_dimension_numbers<[1], [0], [0], [1], [0, 0, 1, 1], [], []>} : vector<8x8xf32>, vector<8x8xf32>, vector<8x8xf32> -> vector<8x8xf32>
      %44 = arith.addf %42, %43 : vector<8x8xf32>
      %c0_24 = arith.constant 0 : index
      %c0_25 = arith.constant 0 : index
      %c0_26 = arith.constant 0 : index
      %45 = vector.load %arg10[%c0_24, %c0_25, %c0_26] : memref<4x8x8xf32, #tpu.memory_space<vmem>>, vector<1x8x8xf32>
      %46 = vector.shape_cast %45 : vector<1x8x8xf32> to vector<8x8xf32>
      %47 = vector.shape_cast %44 : vector<8x8xf32> to vector<1x8x8xf32>
      tpu.vector_store %arg10[%c0_24, %c0_25, %c0_26], %47 {strides = array<i32>} : memref<4x8x8xf32, #tpu.memory_space<vmem>>, vector<1x8x8xf32>,
      %c0_27 = arith.constant 0 : index
      %c0_28 = arith.constant 0 : index
      %c0_29 = arith.constant 0 : index
      %48 = vector.load %arg12[%c0_27, %c0_28, %c0_29] : memref<4x8x1xf32, #tpu.memory_space<vmem>>, vector<1x8x1xf32>
      %49 = vector.shape_cast %48 : vector<1x8x1xf32> to vector<8x1xf32>
      %50 = vector.shape_cast %24 : vector<8x1xf32> to vector<1x8x1xf32>
      tpu.vector_store %arg12[%c0_27, %c0_28, %c0_29], %50 {strides = array<i32>} : memref<4x8x1xf32, #tpu.memory_space<vmem>>, vector<1x8x1xf32>,
      %c0_30 = arith.constant 0 : index
      %c0_31 = arith.constant 0 : index
      %c4 = arith.constant 4 : index
      %51 = vector.load %arg5[%c0_30, %c0_31, %c4] : memref<1x8x64xf32, #tpu.memory_space<vmem>>, vector<1x8x4xf32>
      %52 = vector.shape_cast %51 : vector<1x8x4xf32> to vector<8x4xf32>
      %c0_32 = arith.constant 0 : index
      %c0_33 = arith.constant 0 : index
      %c36 = arith.constant 36 : index
      %53 = vector.load %arg6[%c0_32, %c0_33, %c36] : memref<1x8x64xf32, #tpu.memory_space<vmem>>, vector<1x8x4xf32>
      %54 = vector.shape_cast %53 : vector<1x8x4xf32> to vector<8x4xf32>
      %cst_34 = arith.constant dense<0.000000e+00> : vector<8x8xf32>
      %55 = tpu.matmul %52, %54, %cst_34 {dimension_numbers = #tpu.dot_dimension_numbers<[1], [1], [0], [0], [0, 0, 1, 0], [], []>} : vector<8x4xf32>, vector<8x4xf32>, vector<8x8xf32> -> vector<8x8xf32>
      %c0_35 = arith.constant 0 : index
      %c0_36 = arith.constant 0 : index
      %c0_37 = arith.constant 0 : index
      %56 = vector.load %arg13[%c0_35, %c0_36, %c0_37] : memref<4x8x1xf32, #tpu.memory_space<vmem>>, vector<1x8x1xf32>
      %57 = vector.shape_cast %56 : vector<1x8x1xf32> to vector<8x1xf32>
      %cst_38 = arith.constant dense<0xFF800000> : vector<8xf32>
      %58 = vector.multi_reduction <maximumf>, %55, %cst_38 [1] : vector<8x8xf32> to vector<8xf32>
      %59 = vector.shape_cast %58 : vector<8xf32> to vector<8x1xf32>
      %60 = arith.maximumf %57, %59 : vector<8x1xf32>
      %61 = arith.subf %57, %60 : vector<8x1xf32>
      %62 = math.exp %61 : vector<8x1xf32>
      %63 = vector.broadcast %60 : vector<8x1xf32> to vector<8x8xf32>
      %64 = arith.subf %55, %63 : vector<8x8xf32>
      %65 = math.exp %64 : vector<8x8xf32>
      %c0_39 = arith.constant 0 : index
      %c0_40 = arith.constant 0 : index
      %c0_41 = arith.constant 0 : index
      %66 = vector.load %arg15[%c0_39, %c0_40, %c0_41] : memref<4x8x1xf32, #tpu.memory_space<vmem>>, vector<1x8x1xf32>
      %67 = vector.shape_cast %66 : vector<1x8x1xf32> to vector<8x1xf32>
      %68 = arith.mulf %62, %67 : vector<8x1xf32>
      %cst_42 = arith.constant dense<0.000000e+00> : vector<8xf32>
      %69 = vector.multi_reduction <add>, %65, %cst_42 [1] : vector<8x8xf32> to vector<8xf32>
      %70 = vector.shape_cast %69 : vector<8xf32> to vector<8x1xf32>
      %71 = arith.addf %68, %70 : vector<8x1xf32>
      %c0_43 = arith.constant 0 : index
      %c0_44 = arith.constant 0 : index
      %c0_45 = arith.constant 0 : index
      %72 = vector.load %arg15[%c0_43, %c0_44, %c0_45] : memref<4x8x1xf32, #tpu.memory_space<vmem>>, vector<1x8x1xf32>
      %73 = vector.shape_cast %72 : vector<1x8x1xf32> to vector<8x1xf32>
      %74 = vector.shape_cast %71 : vector<8x1xf32> to vector<1x8x1xf32>
      tpu.vector_store %arg15[%c0_43, %c0_44, %c0_45], %74 {strides = array<i32>} : memref<4x8x1xf32, #tpu.memory_space<vmem>>, vector<1x8x1xf32>,
      %c0_46 = arith.constant 0 : index
      %c0_47 = arith.constant 0 : index
      %c0_48 = arith.constant 0 : index
      %75 = vector.load %arg11[%c0_46, %c0_47, %c0_48] : memref<4x8x8xf32, #tpu.memory_space<vmem>>, vector<1x8x8xf32>
      %76 = vector.shape_cast %75 : vector<1x8x8xf32> to vector<8x8xf32>
      %77 = vector.broadcast %62 : vector<8x1xf32> to vector<8x8xf32>
      %78 = arith.mulf %77, %76 : vector<8x8xf32>
      %cst_49 = arith.constant dense<0.000000e+00> : vector<8x8xf32>
      %79 = tpu.matmul %65, %14, %cst_49 {dimension_numbers = #tpu.dot_dimension_numbers<[1], [0], [0], [1], [0, 0, 1, 1], [], []>} : vector<8x8xf32>, vector<8x8xf32>, vector<8x8xf32> -> vector<8x8xf32>
      %80 = arith.addf %78, %79 : vector<8x8xf32>
      %c0_50 = arith.constant 0 : index
      %c0_51 = arith.constant 0 : index
      %c0_52 = arith.constant 0 : index
      %81 = vector.load %arg11[%c0_50, %c0_51, %c0_52] : memref<4x8x8xf32, #tpu.memory_space<vmem>>, vector<1x8x8xf32>
      %82 = vector.shape_cast %81 : vector<1x8x8xf32> to vector<8x8xf32>
      %83 = vector.shape_cast %80 : vector<8x8xf32> to vector<1x8x8xf32>
      tpu.vector_store %arg11[%c0_50, %c0_51, %c0_52], %83 {strides = array<i32>} : memref<4x8x8xf32, #tpu.memory_space<vmem>>, vector<1x8x8xf32>,
      %c0_53 = arith.constant 0 : index
      %c0_54 = arith.constant 0 : index
      %c0_55 = arith.constant 0 : index
      %84 = vector.load %arg13[%c0_53, %c0_54, %c0_55] : memref<4x8x1xf32, #tpu.memory_space<vmem>>, vector<1x8x1xf32>
      %85 = vector.shape_cast %84 : vector<1x8x1xf32> to vector<8x1xf32>
      %86 = vector.shape_cast %60 : vector<8x1xf32> to vector<1x8x1xf32>
      tpu.vector_store %arg13[%c0_53, %c0_54, %c0_55], %86 {strides = array<i32>} : memref<4x8x1xf32, #tpu.memory_space<vmem>>, vector<1x8x1xf32>,
      %c0_56 = arith.constant 0 : index
      %c0_57 = arith.constant 0 : index
      %c72 = arith.constant 72 : index
      %87 = vector.load %arg7[%c0_56, %c0_57, %c72] : memref<1x8x96xf32, #tpu.memory_space<vmem>>, vector<1x8x8xf32>
      %88 = vector.shape_cast %87 : vector<1x8x8xf32> to vector<8x8xf32>
      %c0_58 = arith.constant 0 : index
      %c0_59 = arith.constant 0 : index
      %c8 = arith.constant 8 : index
      %89 = vector.load %arg5[%c0_58, %c0_59, %c8] : memref<1x8x64xf32, #tpu.memory_space<vmem>>, vector<1x8x4xf32>
      %90 = vector.shape_cast %89 : vector<1x8x4xf32> to vector<8x4xf32>
      %c0_60 = arith.constant 0 : index
      %c0_61 = arith.constant 0 : index
      %c40 = arith.constant 40 : index
      %91 = vector.load %arg6[%c0_60, %c0_61, %c40] : memref<1x8x64xf32, #tpu.memory_space<vmem>>, vector<1x8x4xf32>
      %92 = vector.shape_cast %91 : vector<1x8x4xf32> to vector<8x4xf32>
      %cst_62 = arith.constant dense<0.000000e+00> : vector<8x8xf32>
      %93 = tpu.matmul %90, %92, %cst_62 {dimension_numbers = #tpu.dot_dimension_numbers<[1], [1], [0], [0], [0, 0, 1, 0], [], []>} : vector<8x4xf32>, vector<8x4xf32>, vector<8x8xf32> -> vector<8x8xf32>
      %c1 = arith.constant 1 : index
      %c0_63 = arith.constant 0 : index
      %c0_64 = arith.constant 0 : index
      %94 = vector.load %arg12[%c1, %c0_63, %c0_64] : memref<4x8x1xf32, #tpu.memory_space<vmem>>, vector<1x8x1xf32>
      %95 = vector.shape_cast %94 : vector<1x8x1xf32> to vector<8x1xf32>
      %cst_65 = arith.constant dense<0xFF800000> : vector<8xf32>
      %96 = vector.multi_reduction <maximumf>, %93, %cst_65 [1] : vector<8x8xf32> to vector<8xf32>
      %97 = vector.shape_cast %96 : vector<8xf32> to vector<8x1xf32>
      %98 = arith.maximumf %95, %97 : vector<8x1xf32>
      %99 = arith.subf %95, %98 : vector<8x1xf32>
      %100 = math.exp %99 : vector<8x1xf32>
      %101 = vector.broadcast %98 : vector<8x1xf32> to vector<8x8xf32>
      %102 = arith.subf %93, %101 : vector<8x8xf32>
      %103 = math.exp %102 : vector<8x8xf32>
      %c1_66 = arith.constant 1 : index
      %c0_67 = arith.constant 0 : index
      %c0_68 = arith.constant 0 : index
      %104 = vector.load %arg14[%c1_66, %c0_67, %c0_68] : memref<4x8x1xf32, #tpu.memory_space<vmem>>, vector<1x8x1xf32>
      %105 = vector.shape_cast %104 : vector<1x8x1xf32> to vector<8x1xf32>
      %106 = arith.mulf %100, %105 : vector<8x1xf32>
      %cst_69 = arith.constant dense<0.000000e+00> : vector<8xf32>
      %107 = vector.multi_reduction <add>, %103, %cst_69 [1] : vector<8x8xf32> to vector<8xf32>
      %108 = vector.shape_cast %107 : vector<8xf32> to vector<8x1xf32>
      %109 = arith.addf %106, %108 : vector<8x1xf32>
      %c1_70 = arith.constant 1 : index
      %c0_71 = arith.constant 0 : index
      %c0_72 = arith.constant 0 : index
      %110 = vector.load %arg14[%c1_70, %c0_71, %c0_72] : memref<4x8x1xf32, #tpu.memory_space<vmem>>, vector<1x8x1xf32>
      %111 = vector.shape_cast %110 : vector<1x8x1xf32> to vector<8x1xf32>
      %112 = vector.shape_cast %109 : vector<8x1xf32> to vector<1x8x1xf32>
      tpu.vector_store %arg14[%c1_70, %c0_71, %c0_72], %112 {strides = array<i32>} : memref<4x8x1xf32, #tpu.memory_space<vmem>>, vector<1x8x1xf32>,
      %c1_73 = arith.constant 1 : index
      %c0_74 = arith.constant 0 : index
      %c0_75 = arith.constant 0 : index
      %113 = vector.load %arg10[%c1_73, %c0_74, %c0_75] : memref<4x8x8xf32, #tpu.memory_space<vmem>>, vector<1x8x8xf32>
      %114 = vector.shape_cast %113 : vector<1x8x8xf32> to vector<8x8xf32>
      %115 = vector.broadcast %100 : vector<8x1xf32> to vector<8x8xf32>
      %116 = arith.mulf %115, %114 : vector<8x8xf32>
      %cst_76 = arith.constant dense<0.000000e+00> : vector<8x8xf32>
      %117 = tpu.matmul %103, %88, %cst_76 {dimension_numbers = #tpu.dot_dimension_numbers<[1], [0], [0], [1], [0, 0, 1, 1], [], []>} : vector<8x8xf32>, vector<8x8xf32>, vector<8x8xf32> -> vector<8x8xf32>
      %118 = arith.addf %116, %117 : vector<8x8xf32>
      %c1_77 = arith.constant 1 : index
      %c0_78 = arith.constant 0 : index
      %c0_79 = arith.constant 0 : index
      %119 = vector.load %arg10[%c1_77, %c0_78, %c0_79] : memref<4x8x8xf32, #tpu.memory_space<vmem>>, vector<1x8x8xf32>
      %120 = vector.shape_cast %119 : vector<1x8x8xf32> to vector<8x8xf32>
      %121 = vector.shape_cast %118 : vector<8x8xf32> to vector<1x8x8xf32>
      tpu.vector_store %arg10[%c1_77, %c0_78, %c0_79], %121 {strides = array<i32>} : memref<4x8x8xf32, #tpu.memory_space<vmem>>, vector<1x8x8xf32>,
      %c1_80 = arith.constant 1 : index
      %c0_81 = arith.constant 0 : index
      %c0_82 = arith.constant 0 : index
      %122 = vector.load %arg12[%c1_80, %c0_81, %c0_82] : memref<4x8x1xf32, #tpu.memory_space<vmem>>, vector<1x8x1xf32>
      %123 = vector.shape_cast %122 : vector<1x8x1xf32> to vector<8x1xf32>
      %124 = vector.shape_cast %98 : vector<8x1xf32> to vector<1x8x1xf32>
      tpu.vector_store %arg12[%c1_80, %c0_81, %c0_82], %124 {strides = array<i32>} : memref<4x8x1xf32, #tpu.memory_space<vmem>>, vector<1x8x1xf32>,
      %c0_83 = arith.constant 0 : index
      %c0_84 = arith.constant 0 : index
      %c12 = arith.constant 12 : index
      %125 = vector.load %arg5[%c0_83, %c0_84, %c12] : memref<1x8x64xf32, #tpu.memory_space<vmem>>, vector<1x8x4xf32>
      %126 = vector.shape_cast %125 : vector<1x8x4xf32> to vector<8x4xf32>
      %c0_85 = arith.constant 0 : index
      %c0_86 = arith.constant 0 : index
      %c44 = arith.constant 44 : index
      %127 = vector.load %arg6[%c0_85, %c0_86, %c44] : memref<1x8x64xf32, #tpu.memory_space<vmem>>, vector<1x8x4xf32>
      %128 = vector.shape_cast %127 : vector<1x8x4xf32> to vector<8x4xf32>
      %cst_87 = arith.constant dense<0.000000e+00> : vector<8x8xf32>
      %129 = tpu.matmul %126, %128, %cst_87 {dimension_numbers = #tpu.dot_dimension_numbers<[1], [1], [0], [0], [0, 0, 1, 0], [], []>} : vector<8x4xf32>, vector<8x4xf32>, vector<8x8xf32> -> vector<8x8xf32>
      %c1_88 = arith.constant 1 : index
      %c0_89 = arith.constant 0 : index
      %c0_90 = arith.constant 0 : index
      %130 = vector.load %arg13[%c1_88, %c0_89, %c0_90] : memref<4x8x1xf32, #tpu.memory_space<vmem>>, vector<1x8x1xf32>
      %131 = vector.shape_cast %130 : vector<1x8x1xf32> to vector<8x1xf32>
      %cst_91 = arith.constant dense<0xFF800000> : vector<8xf32>
      %132 = vector.multi_reduction <maximumf>, %129, %cst_91 [1] : vector<8x8xf32> to vector<8xf32>
      %133 = vector.shape_cast %132 : vector<8xf32> to vector<8x1xf32>
      %134 = arith.maximumf %131, %133 : vector<8x1xf32>
      %135 = arith.subf %131, %134 : vector<8x1xf32>
      %136 = math.exp %135 : vector<8x1xf32>
      %137 = vector.broadcast %134 : vector<8x1xf32> to vector<8x8xf32>
      %138 = arith.subf %129, %137 : vector<8x8xf32>
      %139 = math.exp %138 : vector<8x8xf32>
      %c1_92 = arith.constant 1 : index
      %c0_93 = arith.constant 0 : index
      %c0_94 = arith.constant 0 : index
      %140 = vector.load %arg15[%c1_92, %c0_93, %c0_94] : memref<4x8x1xf32, #tpu.memory_space<vmem>>, vector<1x8x1xf32>
      %141 = vector.shape_cast %140 : vector<1x8x1xf32> to vector<8x1xf32>
      %142 = arith.mulf %136, %141 : vector<8x1xf32>
      %cst_95 = arith.constant dense<0.000000e+00> : vector<8xf32>
      %143 = vector.multi_reduction <add>, %139, %cst_95 [1] : vector<8x8xf32> to vector<8xf32>
      %144 = vector.shape_cast %143 : vector<8xf32> to vector<8x1xf32>
      %145 = arith.addf %142, %144 : vector<8x1xf32>
      %c1_96 = arith.constant 1 : index
      %c0_97 = arith.constant 0 : index
      %c0_98 = arith.constant 0 : index
      %146 = vector.load %arg15[%c1_96, %c0_97, %c0_98] : memref<4x8x1xf32, #tpu.memory_space<vmem>>, vector<1x8x1xf32>
      %147 = vector.shape_cast %146 : vector<1x8x1xf32> to vector<8x1xf32>
      %148 = vector.shape_cast %145 : vector<8x1xf32> to vector<1x8x1xf32>
      tpu.vector_store %arg15[%c1_96, %c0_97, %c0_98], %148 {strides = array<i32>} : memref<4x8x1xf32, #tpu.memory_space<vmem>>, vector<1x8x1xf32>,
      %c1_99 = arith.constant 1 : index
      %c0_100 = arith.constant 0 : index
      %c0_101 = arith.constant 0 : index
      %149 = vector.load %arg11[%c1_99, %c0_100, %c0_101] : memref<4x8x8xf32, #tpu.memory_space<vmem>>, vector<1x8x8xf32>
      %150 = vector.shape_cast %149 : vector<1x8x8xf32> to vector<8x8xf32>
      %151 = vector.broadcast %136 : vector<8x1xf32> to vector<8x8xf32>
      %152 = arith.mulf %151, %150 : vector<8x8xf32>
      %cst_102 = arith.constant dense<0.000000e+00> : vector<8x8xf32>
      %153 = tpu.matmul %139, %88, %cst_102 {dimension_numbers = #tpu.dot_dimension_numbers<[1], [0], [0], [1], [0, 0, 1, 1], [], []>} : vector<8x8xf32>, vector<8x8xf32>, vector<8x8xf32> -> vector<8x8xf32>
      %154 = arith.addf %152, %153 : vector<8x8xf32>
      %c1_103 = arith.constant 1 : index
      %c0_104 = arith.constant 0 : index
      %c0_105 = arith.constant 0 : index
      %155 = vector.load %arg11[%c1_103, %c0_104, %c0_105] : memref<4x8x8xf32, #tpu.memory_space<vmem>>, vector<1x8x8xf32>
      %156 = vector.shape_cast %155 : vector<1x8x8xf32> to vector<8x8xf32>
      %157 = vector.shape_cast %154 : vector<8x8xf32> to vector<1x8x8xf32>
      tpu.vector_store %arg11[%c1_103, %c0_104, %c0_105], %157 {strides = array<i32>} : memref<4x8x8xf32, #tpu.memory_space<vmem>>, vector<1x8x8xf32>,
      %c1_106 = arith.constant 1 : index
      %c0_107 = arith.constant 0 : index
      %c0_108 = arith.constant 0 : index
      %158 = vector.load %arg13[%c1_106, %c0_107, %c0_108] : memref<4x8x1xf32, #tpu.memory_space<vmem>>, vector<1x8x1xf32>
      %159 = vector.shape_cast %158 : vector<1x8x1xf32> to vector<8x1xf32>
      %160 = vector.shape_cast %134 : vector<8x1xf32> to vector<1x8x1xf32>
      tpu.vector_store %arg13[%c1_106, %c0_107, %c0_108], %160 {strides = array<i32>} : memref<4x8x1xf32, #tpu.memory_space<vmem>>, vector<1x8x1xf32>,
      %c0_109 = arith.constant 0 : index
      %c0_110 = arith.constant 0 : index
      %c80 = arith.constant 80 : index
      %161 = vector.load %arg7[%c0_109, %c0_110, %c80] : memref<1x8x96xf32, #tpu.memory_space<vmem>>, vector<1x8x8xf32>
      %162 = vector.shape_cast %161 : vector<1x8x8xf32> to vector<8x8xf32>
      %c0_111 = arith.constant 0 : index
      %c0_112 = arith.constant 0 : index
      %c16 = arith.constant 16 : index
      %163 = vector.load %arg5[%c0_111, %c0_112, %c16] : memref<1x8x64xf32, #tpu.memory_space<vmem>>, vector<1x8x4xf32>
      %164 = vector.shape_cast %163 : vector<1x8x4xf32> to vector<8x4xf32>
      %c0_113 = arith.constant 0 : index
      %c0_114 = arith.constant 0 : index
      %c48 = arith.constant 48 : index
      %165 = vector.load %arg6[%c0_113, %c0_114, %c48] : memref<1x8x64xf32, #tpu.memory_space<vmem>>, vector<1x8x4xf32>
      %166 = vector.shape_cast %165 : vector<1x8x4xf32> to vector<8x4xf32>
      %cst_115 = arith.constant dense<0.000000e+00> : vector<8x8xf32>
      %167 = tpu.matmul %164, %166, %cst_115 {dimension_numbers = #tpu.dot_dimension_numbers<[1], [1], [0], [0], [0, 0, 1, 0], [], []>} : vector<8x4xf32>, vector<8x4xf32>, vector<8x8xf32> -> vector<8x8xf32>
      %c2 = arith.constant 2 : index
      %c0_116 = arith.constant 0 : index
      %c0_117 = arith.constant 0 : index
      %168 = vector.load %arg12[%c2, %c0_116, %c0_117] : memref<4x8x1xf32, #tpu.memory_space<vmem>>, vector<1x8x1xf32>
      %169 = vector.shape_cast %168 : vector<1x8x1xf32> to vector<8x1xf32>
      %cst_118 = arith.constant dense<0xFF800000> : vector<8xf32>
      %170 = vector.multi_reduction <maximumf>, %167, %cst_118 [1] : vector<8x8xf32> to vector<8xf32>
      %171 = vector.shape_cast %170 : vector<8xf32> to vector<8x1xf32>
      %172 = arith.maximumf %169, %171 : vector<8x1xf32>
      %173 = arith.subf %169, %172 : vector<8x1xf32>
      %174 = math.exp %173 : vector<8x1xf32>
      %175 = vector.broadcast %172 : vector<8x1xf32> to vector<8x8xf32>
      %176 = arith.subf %167, %175 : vector<8x8xf32>
      %177 = math.exp %176 : vector<8x8xf32>
      %c2_119 = arith.constant 2 : index
      %c0_120 = arith.constant 0 : index
      %c0_121 = arith.constant 0 : index
      %178 = vector.load %arg14[%c2_119, %c0_120, %c0_121] : memref<4x8x1xf32, #tpu.memory_space<vmem>>, vector<1x8x1xf32>
      %179 = vector.shape_cast %178 : vector<1x8x1xf32> to vector<8x1xf32>
      %180 = arith.mulf %174, %179 : vector<8x1xf32>
      %cst_122 = arith.constant dense<0.000000e+00> : vector<8xf32>
      %181 = vector.multi_reduction <add>, %177, %cst_122 [1] : vector<8x8xf32> to vector<8xf32>
      %182 = vector.shape_cast %181 : vector<8xf32> to vector<8x1xf32>
      %183 = arith.addf %180, %182 : vector<8x1xf32>
      %c2_123 = arith.constant 2 : index
      %c0_124 = arith.constant 0 : index
      %c0_125 = arith.constant 0 : index
      %184 = vector.load %arg14[%c2_123, %c0_124, %c0_125] : memref<4x8x1xf32, #tpu.memory_space<vmem>>, vector<1x8x1xf32>
      %185 = vector.shape_cast %184 : vector<1x8x1xf32> to vector<8x1xf32>
      %186 = vector.shape_cast %183 : vector<8x1xf32> to vector<1x8x1xf32>
      tpu.vector_store %arg14[%c2_123, %c0_124, %c0_125], %186 {strides = array<i32>} : memref<4x8x1xf32, #tpu.memory_space<vmem>>, vector<1x8x1xf32>,
      %c2_126 = arith.constant 2 : index
      %c0_127 = arith.constant 0 : index
      %c0_128 = arith.constant 0 : index
      %187 = vector.load %arg10[%c2_126, %c0_127, %c0_128] : memref<4x8x8xf32, #tpu.memory_space<vmem>>, vector<1x8x8xf32>
      %188 = vector.shape_cast %187 : vector<1x8x8xf32> to vector<8x8xf32>
      %189 = vector.broadcast %174 : vector<8x1xf32> to vector<8x8xf32>
      %190 = arith.mulf %189, %188 : vector<8x8xf32>
      %cst_129 = arith.constant dense<0.000000e+00> : vector<8x8xf32>
      %191 = tpu.matmul %177, %162, %cst_129 {dimension_numbers = #tpu.dot_dimension_numbers<[1], [0], [0], [1], [0, 0, 1, 1], [], []>} : vector<8x8xf32>, vector<8x8xf32>, vector<8x8xf32> -> vector<8x8xf32>
      %192 = arith.addf %190, %191 : vector<8x8xf32>
      %c2_130 = arith.constant 2 : index
      %c0_131 = arith.constant 0 : index
      %c0_132 = arith.constant 0 : index
      %193 = vector.load %arg10[%c2_130, %c0_131, %c0_132] : memref<4x8x8xf32, #tpu.memory_space<vmem>>, vector<1x8x8xf32>
      %194 = vector.shape_cast %193 : vector<1x8x8xf32> to vector<8x8xf32>
      %195 = vector.shape_cast %192 : vector<8x8xf32> to vector<1x8x8xf32>
      tpu.vector_store %arg10[%c2_130, %c0_131, %c0_132], %195 {strides = array<i32>} : memref<4x8x8xf32, #tpu.memory_space<vmem>>, vector<1x8x8xf32>,
      %c2_133 = arith.constant 2 : index
      %c0_134 = arith.constant 0 : index
      %c0_135 = arith.constant 0 : index
      %196 = vector.load %arg12[%c2_133, %c0_134, %c0_135] : memref<4x8x1xf32, #tpu.memory_space<vmem>>, vector<1x8x1xf32>
      %197 = vector.shape_cast %196 : vector<1x8x1xf32> to vector<8x1xf32>
      %198 = vector.shape_cast %172 : vector<8x1xf32> to vector<1x8x1xf32>
      tpu.vector_store %arg12[%c2_133, %c0_134, %c0_135], %198 {strides = array<i32>} : memref<4x8x1xf32, #tpu.memory_space<vmem>>, vector<1x8x1xf32>,
      %c0_136 = arith.constant 0 : index
      %c0_137 = arith.constant 0 : index
      %c20 = arith.constant 20 : index
      %199 = vector.load %arg5[%c0_136, %c0_137, %c20] : memref<1x8x64xf32, #tpu.memory_space<vmem>>, vector<1x8x4xf32>
      %200 = vector.shape_cast %199 : vector<1x8x4xf32> to vector<8x4xf32>
      %c0_138 = arith.constant 0 : index
      %c0_139 = arith.constant 0 : index
      %c52 = arith.constant 52 : index
      %201 = vector.load %arg6[%c0_138, %c0_139, %c52] : memref<1x8x64xf32, #tpu.memory_space<vmem>>, vector<1x8x4xf32>
      %202 = vector.shape_cast %201 : vector<1x8x4xf32> to vector<8x4xf32>
      %cst_140 = arith.constant dense<0.000000e+00> : vector<8x8xf32>
      %203 = tpu.matmul %200, %202, %cst_140 {dimension_numbers = #tpu.dot_dimension_numbers<[1], [1], [0], [0], [0, 0, 1, 0], [], []>} : vector<8x4xf32>, vector<8x4xf32>, vector<8x8xf32> -> vector<8x8xf32>
      %c2_141 = arith.constant 2 : index
      %c0_142 = arith.constant 0 : index
      %c0_143 = arith.constant 0 : index
      %204 = vector.load %arg13[%c2_141, %c0_142, %c0_143] : memref<4x8x1xf32, #tpu.memory_space<vmem>>, vector<1x8x1xf32>
      %205 = vector.shape_cast %204 : vector<1x8x1xf32> to vector<8x1xf32>
      %cst_144 = arith.constant dense<0xFF800000> : vector<8xf32>
      %206 = vector.multi_reduction <maximumf>, %203, %cst_144 [1] : vector<8x8xf32> to vector<8xf32>
      %207 = vector.shape_cast %206 : vector<8xf32> to vector<8x1xf32>
      %208 = arith.maximumf %205, %207 : vector<8x1xf32>
      %209 = arith.subf %205, %208 : vector<8x1xf32>
      %210 = math.exp %209 : vector<8x1xf32>
      %211 = vector.broadcast %208 : vector<8x1xf32> to vector<8x8xf32>
      %212 = arith.subf %203, %211 : vector<8x8xf32>
      %213 = math.exp %212 : vector<8x8xf32>
      %c2_145 = arith.constant 2 : index
      %c0_146 = arith.constant 0 : index
      %c0_147 = arith.constant 0 : index
      %214 = vector.load %arg15[%c2_145, %c0_146, %c0_147] : memref<4x8x1xf32, #tpu.memory_space<vmem>>, vector<1x8x1xf32>
      %215 = vector.shape_cast %214 : vector<1x8x1xf32> to vector<8x1xf32>
      %216 = arith.mulf %210, %215 : vector<8x1xf32>
      %cst_148 = arith.constant dense<0.000000e+00> : vector<8xf32>
      %217 = vector.multi_reduction <add>, %213, %cst_148 [1] : vector<8x8xf32> to vector<8xf32>
      %218 = vector.shape_cast %217 : vector<8xf32> to vector<8x1xf32>
      %219 = arith.addf %216, %218 : vector<8x1xf32>
      %c2_149 = arith.constant 2 : index
      %c0_150 = arith.constant 0 : index
      %c0_151 = arith.constant 0 : index
      %220 = vector.load %arg15[%c2_149, %c0_150, %c0_151] : memref<4x8x1xf32, #tpu.memory_space<vmem>>, vector<1x8x1xf32>
      %221 = vector.shape_cast %220 : vector<1x8x1xf32> to vector<8x1xf32>
      %222 = vector.shape_cast %219 : vector<8x1xf32> to vector<1x8x1xf32>
      tpu.vector_store %arg15[%c2_149, %c0_150, %c0_151], %222 {strides = array<i32>} : memref<4x8x1xf32, #tpu.memory_space<vmem>>, vector<1x8x1xf32>,
      %c2_152 = arith.constant 2 : index
      %c0_153 = arith.constant 0 : index
      %c0_154 = arith.constant 0 : index
      %223 = vector.load %arg11[%c2_152, %c0_153, %c0_154] : memref<4x8x8xf32, #tpu.memory_space<vmem>>, vector<1x8x8xf32>
      %224 = vector.shape_cast %223 : vector<1x8x8xf32> to vector<8x8xf32>
      %225 = vector.broadcast %210 : vector<8x1xf32> to vector<8x8xf32>
      %226 = arith.mulf %225, %224 : vector<8x8xf32>
      %cst_155 = arith.constant dense<0.000000e+00> : vector<8x8xf32>
      %227 = tpu.matmul %213, %162, %cst_155 {dimension_numbers = #tpu.dot_dimension_numbers<[1], [0], [0], [1], [0, 0, 1, 1], [], []>} : vector<8x8xf32>, vector<8x8xf32>, vector<8x8xf32> -> vector<8x8xf32>
      %228 = arith.addf %226, %227 : vector<8x8xf32>
      %c2_156 = arith.constant 2 : index
      %c0_157 = arith.constant 0 : index
      %c0_158 = arith.constant 0 : index
      %229 = vector.load %arg11[%c2_156, %c0_157, %c0_158] : memref<4x8x8xf32, #tpu.memory_space<vmem>>, vector<1x8x8xf32>
      %230 = vector.shape_cast %229 : vector<1x8x8xf32> to vector<8x8xf32>
      %231 = vector.shape_cast %228 : vector<8x8xf32> to vector<1x8x8xf32>
      tpu.vector_store %arg11[%c2_156, %c0_157, %c0_158], %231 {strides = array<i32>} : memref<4x8x8xf32, #tpu.memory_space<vmem>>, vector<1x8x8xf32>,
      %c2_159 = arith.constant 2 : index
      %c0_160 = arith.constant 0 : index
      %c0_161 = arith.constant 0 : index
      %232 = vector.load %arg13[%c2_159, %c0_160, %c0_161] : memref<4x8x1xf32, #tpu.memory_space<vmem>>, vector<1x8x1xf32>
      %233 = vector.shape_cast %232 : vector<1x8x1xf32> to vector<8x1xf32>
      %234 = vector.shape_cast %208 : vector<8x1xf32> to vector<1x8x1xf32>
      tpu.vector_store %arg13[%c2_159, %c0_160, %c0_161], %234 {strides = array<i32>} : memref<4x8x1xf32, #tpu.memory_space<vmem>>, vector<1x8x1xf32>,
      %c0_162 = arith.constant 0 : index
      %c0_163 = arith.constant 0 : index
      %c88 = arith.constant 88 : index
      %235 = vector.load %arg7[%c0_162, %c0_163, %c88] : memref<1x8x96xf32, #tpu.memory_space<vmem>>, vector<1x8x8xf32>
      %236 = vector.shape_cast %235 : vector<1x8x8xf32> to vector<8x8xf32>
      %c0_164 = arith.constant 0 : index
      %c0_165 = arith.constant 0 : index
      %c24 = arith.constant 24 : index
      %237 = vector.load %arg5[%c0_164, %c0_165, %c24] : memref<1x8x64xf32, #tpu.memory_space<vmem>>, vector<1x8x4xf32>
      %238 = vector.shape_cast %237 : vector<1x8x4xf32> to vector<8x4xf32>
      %c0_166 = arith.constant 0 : index
      %c0_167 = arith.constant 0 : index
      %c56 = arith.constant 56 : index
      %239 = vector.load %arg6[%c0_166, %c0_167, %c56] : memref<1x8x64xf32, #tpu.memory_space<vmem>>, vector<1x8x4xf32>
      %240 = vector.shape_cast %239 : vector<1x8x4xf32> to vector<8x4xf32>
      %cst_168 = arith.constant dense<0.000000e+00> : vector<8x8xf32>
      %241 = tpu.matmul %238, %240, %cst_168 {dimension_numbers = #tpu.dot_dimension_numbers<[1], [1], [0], [0], [0, 0, 1, 0], [], []>} : vector<8x4xf32>, vector<8x4xf32>, vector<8x8xf32> -> vector<8x8xf32>
      %c3 = arith.constant 3 : index
      %c0_169 = arith.constant 0 : index
      %c0_170 = arith.constant 0 : index
      %242 = vector.load %arg12[%c3, %c0_169, %c0_170] : memref<4x8x1xf32, #tpu.memory_space<vmem>>, vector<1x8x1xf32>
      %243 = vector.shape_cast %242 : vector<1x8x1xf32> to vector<8x1xf32>
      %cst_171 = arith.constant dense<0xFF800000> : vector<8xf32>
      %244 = vector.multi_reduction <maximumf>, %241, %cst_171 [1] : vector<8x8xf32> to vector<8xf32>
      %245 = vector.shape_cast %244 : vector<8xf32> to vector<8x1xf32>
      %246 = arith.maximumf %243, %245 : vector<8x1xf32>
      %247 = arith.subf %243, %246 : vector<8x1xf32>
      %248 = math.exp %247 : vector<8x1xf32>
      %249 = vector.broadcast %246 : vector<8x1xf32> to vector<8x8xf32>
      %250 = arith.subf %241, %249 : vector<8x8xf32>
      %251 = math.exp %250 : vector<8x8xf32>
      %c3_172 = arith.constant 3 : index
      %c0_173 = arith.constant 0 : index
      %c0_174 = arith.constant 0 : index
      %252 = vector.load %arg14[%c3_172, %c0_173, %c0_174] : memref<4x8x1xf32, #tpu.memory_space<vmem>>, vector<1x8x1xf32>
      %253 = vector.shape_cast %252 : vector<1x8x1xf32> to vector<8x1xf32>
      %254 = arith.mulf %248, %253 : vector<8x1xf32>
      %cst_175 = arith.constant dense<0.000000e+00> : vector<8xf32>
      %255 = vector.multi_reduction <add>, %251, %cst_175 [1] : vector<8x8xf32> to vector<8xf32>
      %256 = vector.shape_cast %255 : vector<8xf32> to vector<8x1xf32>
      %257 = arith.addf %254, %256 : vector<8x1xf32>
      %c3_176 = arith.constant 3 : index
      %c0_177 = arith.constant 0 : index
      %c0_178 = arith.constant 0 : index
      %258 = vector.load %arg14[%c3_176, %c0_177, %c0_178] : memref<4x8x1xf32, #tpu.memory_space<vmem>>, vector<1x8x1xf32>
      %259 = vector.shape_cast %258 : vector<1x8x1xf32> to vector<8x1xf32>
      %260 = vector.shape_cast %257 : vector<8x1xf32> to vector<1x8x1xf32>
      tpu.vector_store %arg14[%c3_176, %c0_177, %c0_178], %260 {strides = array<i32>} : memref<4x8x1xf32, #tpu.memory_space<vmem>>, vector<1x8x1xf32>,
      %c3_179 = arith.constant 3 : index
      %c0_180 = arith.constant 0 : index
      %c0_181 = arith.constant 0 : index
      %261 = vector.load %arg10[%c3_179, %c0_180, %c0_181] : memref<4x8x8xf32, #tpu.memory_space<vmem>>, vector<1x8x8xf32>
      %262 = vector.shape_cast %261 : vector<1x8x8xf32> to vector<8x8xf32>
      %263 = vector.broadcast %248 : vector<8x1xf32> to vector<8x8xf32>
      %264 = arith.mulf %263, %262 : vector<8x8xf32>
      %cst_182 = arith.constant dense<0.000000e+00> : vector<8x8xf32>
      %265 = tpu.matmul %251, %236, %cst_182 {dimension_numbers = #tpu.dot_dimension_numbers<[1], [0], [0], [1], [0, 0, 1, 1], [], []>} : vector<8x8xf32>, vector<8x8xf32>, vector<8x8xf32> -> vector<8x8xf32>
      %266 = arith.addf %264, %265 : vector<8x8xf32>
      %c3_183 = arith.constant 3 : index
      %c0_184 = arith.constant 0 : index
      %c0_185 = arith.constant 0 : index
      %267 = vector.load %arg10[%c3_183, %c0_184, %c0_185] : memref<4x8x8xf32, #tpu.memory_space<vmem>>, vector<1x8x8xf32>
      %268 = vector.shape_cast %267 : vector<1x8x8xf32> to vector<8x8xf32>
      %269 = vector.shape_cast %266 : vector<8x8xf32> to vector<1x8x8xf32>
      tpu.vector_store %arg10[%c3_183, %c0_184, %c0_185], %269 {strides = array<i32>} : memref<4x8x8xf32, #tpu.memory_space<vmem>>, vector<1x8x8xf32>,
      %c3_186 = arith.constant 3 : index
      %c0_187 = arith.constant 0 : index
      %c0_188 = arith.constant 0 : index
      %270 = vector.load %arg12[%c3_186, %c0_187, %c0_188] : memref<4x8x1xf32, #tpu.memory_space<vmem>>, vector<1x8x1xf32>
      %271 = vector.shape_cast %270 : vector<1x8x1xf32> to vector<8x1xf32>
      %272 = vector.shape_cast %246 : vector<8x1xf32> to vector<1x8x1xf32>
      tpu.vector_store %arg12[%c3_186, %c0_187, %c0_188], %272 {strides = array<i32>} : memref<4x8x1xf32, #tpu.memory_space<vmem>>, vector<1x8x1xf32>,
      %c0_189 = arith.constant 0 : index
      %c0_190 = arith.constant 0 : index
      %c28 = arith.constant 28 : index
      %273 = vector.load %arg5[%c0_189, %c0_190, %c28] : memref<1x8x64xf32, #tpu.memory_space<vmem>>, vector<1x8x4xf32>
      %274 = vector.shape_cast %273 : vector<1x8x4xf32> to vector<8x4xf32>
      %c0_191 = arith.constant 0 : index
      %c0_192 = arith.constant 0 : index
      %c60 = arith.constant 60 : index
      %275 = vector.load %arg6[%c0_191, %c0_192, %c60] : memref<1x8x64xf32, #tpu.memory_space<vmem>>, vector<1x8x4xf32>
      %276 = vector.shape_cast %275 : vector<1x8x4xf32> to vector<8x4xf32>
      %cst_193 = arith.constant dense<0.000000e+00> : vector<8x8xf32>
      %277 = tpu.matmul %274, %276, %cst_193 {dimension_numbers = #tpu.dot_dimension_numbers<[1], [1], [0], [0], [0, 0, 1, 0], [], []>} : vector<8x4xf32>, vector<8x4xf32>, vector<8x8xf32> -> vector<8x8xf32>
      %c3_194 = arith.constant 3 : index
      %c0_195 = arith.constant 0 : index
      %c0_196 = arith.constant 0 : index
      %278 = vector.load %arg13[%c3_194, %c0_195, %c0_196] : memref<4x8x1xf32, #tpu.memory_space<vmem>>, vector<1x8x1xf32>
      %279 = vector.shape_cast %278 : vector<1x8x1xf32> to vector<8x1xf32>
      %cst_197 = arith.constant dense<0xFF800000> : vector<8xf32>
      %280 = vector.multi_reduction <maximumf>, %277, %cst_197 [1] : vector<8x8xf32> to vector<8xf32>
      %281 = vector.shape_cast %280 : vector<8xf32> to vector<8x1xf32>
      %282 = arith.maximumf %279, %281 : vector<8x1xf32>
      %283 = arith.subf %279, %282 : vector<8x1xf32>
      %284 = math.exp %283 : vector<8x1xf32>
      %285 = vector.broadcast %282 : vector<8x1xf32> to vector<8x8xf32>
      %286 = arith.subf %277, %285 : vector<8x8xf32>
      %287 = math.exp %286 : vector<8x8xf32>
      %c3_198 = arith.constant 3 : index
      %c0_199 = arith.constant 0 : index
      %c0_200 = arith.constant 0 : index
      %288 = vector.load %arg15[%c3_198, %c0_199, %c0_200] : memref<4x8x1xf32, #tpu.memory_space<vmem>>, vector<1x8x1xf32>
      %289 = vector.shape_cast %288 : vector<1x8x1xf32> to vector<8x1xf32>
      %290 = arith.mulf %284, %289 : vector<8x1xf32>
      %cst_201 = arith.constant dense<0.000000e+00> : vector<8xf32>
      %291 = vector.multi_reduction <add>, %287, %cst_201 [1] : vector<8x8xf32> to vector<8xf32>
      %292 = vector.shape_cast %291 : vector<8xf32> to vector<8x1xf32>
      %293 = arith.addf %290, %292 : vector<8x1xf32>
      %c3_202 = arith.constant 3 : index
      %c0_203 = arith.constant 0 : index
      %c0_204 = arith.constant 0 : index
      %294 = vector.load %arg15[%c3_202, %c0_203, %c0_204] : memref<4x8x1xf32, #tpu.memory_space<vmem>>, vector<1x8x1xf32>
      %295 = vector.shape_cast %294 : vector<1x8x1xf32> to vector<8x1xf32>
      %296 = vector.shape_cast %293 : vector<8x1xf32> to vector<1x8x1xf32>
      tpu.vector_store %arg15[%c3_202, %c0_203, %c0_204], %296 {strides = array<i32>} : memref<4x8x1xf32, #tpu.memory_space<vmem>>, vector<1x8x1xf32>,
      %c3_205 = arith.constant 3 : index
      %c0_206 = arith.constant 0 : index
      %c0_207 = arith.constant 0 : index
      %297 = vector.load %arg11[%c3_205, %c0_206, %c0_207] : memref<4x8x8xf32, #tpu.memory_space<vmem>>, vector<1x8x8xf32>
      %298 = vector.shape_cast %297 : vector<1x8x8xf32> to vector<8x8xf32>
      %299 = vector.broadcast %284 : vector<8x1xf32> to vector<8x8xf32>
      %300 = arith.mulf %299, %298 : vector<8x8xf32>
      %cst_208 = arith.constant dense<0.000000e+00> : vector<8x8xf32>
      %301 = tpu.matmul %287, %236, %cst_208 {dimension_numbers = #tpu.dot_dimension_numbers<[1], [0], [0], [1], [0, 0, 1, 1], [], []>} : vector<8x8xf32>, vector<8x8xf32>, vector<8x8xf32> -> vector<8x8xf32>
      %302 = arith.addf %300, %301 : vector<8x8xf32>
      %c3_209 = arith.constant 3 : index
      %c0_210 = arith.constant 0 : index
      %c0_211 = arith.constant 0 : index
      %303 = vector.load %arg11[%c3_209, %c0_210, %c0_211] : memref<4x8x8xf32, #tpu.memory_space<vmem>>, vector<1x8x8xf32>
      %304 = vector.shape_cast %303 : vector<1x8x8xf32> to vector<8x8xf32>
      %305 = vector.shape_cast %302 : vector<8x8xf32> to vector<1x8x8xf32>
      tpu.vector_store %arg11[%c3_209, %c0_210, %c0_211], %305 {strides = array<i32>} : memref<4x8x8xf32, #tpu.memory_space<vmem>>, vector<1x8x8xf32>,
      %c3_212 = arith.constant 3 : index
      %c0_213 = arith.constant 0 : index
      %c0_214 = arith.constant 0 : index
      %306 = vector.load %arg13[%c3_212, %c0_213, %c0_214] : memref<4x8x1xf32, #tpu.memory_space<vmem>>, vector<1x8x1xf32>
      %307 = vector.shape_cast %306 : vector<1x8x1xf32> to vector<8x1xf32>
      %308 = vector.shape_cast %282 : vector<8x1xf32> to vector<1x8x1xf32>
      tpu.vector_store %arg13[%c3_212, %c0_213, %c0_214], %308 {strides = array<i32>} : memref<4x8x1xf32, #tpu.memory_space<vmem>>, vector<1x8x1xf32>,
    } else {
    }
    %10 = arith.cmpi eq, %3, %1 : i32
    %11 = arith.extui %10 : i1 to i32
    %c0_i32_2 = arith.constant 0 : i32
    %12 = arith.cmpi ne, %11, %c0_i32_2 : i32
    scf.if %12 {
      %13 = tpu.iota {dimensions = array<i32: 0>} : vector<8x8xi32>
      %14 = tpu.iota {dimensions = array<i32: 1>} : vector<8x8xi32>
      %15 = arith.cmpi sgt, %14, %13 : vector<8x8xi32>
      %cst = arith.constant 0xFF800000 : f32
      %cst_3 = arith.constant 0.000000e+00 : f32
      %16 = vector.broadcast %cst : f32 to vector<8x8xf32>
      %17 = vector.broadcast %cst_3 : f32 to vector<8x8xf32>
      %18 = arith.select %15, %16, %17 : vector<8x8xi1>, vector<8x8xf32>
      %c0 = arith.constant 0 : index
      %c0_4 = arith.constant 0 : index
      %c64 = arith.constant 64 : index
      %19 = vector.load %arg7[%c0, %c0_4, %c64] : memref<1x8x96xf32, #tpu.memory_space<vmem>>, vector<1x8x8xf32>
      %20 = vector.shape_cast %19 : vector<1x8x8xf32> to vector<8x8xf32>
      %c0_5 = arith.constant 0 : index
      %c0_6 = arith.constant 0 : index
      %c0_7 = arith.constant 0 : index
      %21 = vector.load %arg5[%c0_5, %c0_6, %c0_7] : memref<1x8x64xf32, #tpu.memory_space<vmem>>, vector<1x8x4xf32>
      %22 = vector.shape_cast %21 : vector<1x8x4xf32> to vector<8x4xf32>
      %c0_8 = arith.constant 0 : index
      %c0_9 = arith.constant 0 : index
      %c32 = arith.constant 32 : index
      %23 = vector.load %arg6[%c0_8, %c0_9, %c32] : memref<1x8x64xf32, #tpu.memory_space<vmem>>, vector<1x8x4xf32>
      %24 = vector.shape_cast %23 : vector<1x8x4xf32> to vector<8x4xf32>
      %cst_10 = arith.constant dense<0.000000e+00> : vector<8x8xf32>
      %25 = tpu.matmul %22, %24, %cst_10 {dimension_numbers = #tpu.dot_dimension_numbers<[1], [1], [0], [0], [0, 0, 1, 0], [], []>} : vector<8x4xf32>, vector<8x4xf32>, vector<8x8xf32> -> vector<8x8xf32>
      %26 = arith.addf %25, %18 : vector<8x8xf32>
      %c0_11 = arith.constant 0 : index
      %c0_12 = arith.constant 0 : index
      %c0_13 = arith.constant 0 : index
      %27 = vector.load %arg12[%c0_11, %c0_12, %c0_13] : memref<4x8x1xf32, #tpu.memory_space<vmem>>, vector<1x8x1xf32>
      %28 = vector.shape_cast %27 : vector<1x8x1xf32> to vector<8x1xf32>
      %cst_14 = arith.constant dense<0xFF800000> : vector<8xf32>
      %29 = vector.multi_reduction <maximumf>, %26, %cst_14 [1] : vector<8x8xf32> to vector<8xf32>
      %30 = vector.shape_cast %29 : vector<8xf32> to vector<8x1xf32>
      %31 = arith.maximumf %28, %30 : vector<8x1xf32>
      %32 = arith.subf %28, %31 : vector<8x1xf32>
      %33 = math.exp %32 : vector<8x1xf32>
      %34 = vector.broadcast %31 : vector<8x1xf32> to vector<8x8xf32>
      %35 = arith.subf %26, %34 : vector<8x8xf32>
      %36 = math.exp %35 : vector<8x8xf32>
      %c0_15 = arith.constant 0 : index
      %c0_16 = arith.constant 0 : index
      %c0_17 = arith.constant 0 : index
      %37 = vector.load %arg14[%c0_15, %c0_16, %c0_17] : memref<4x8x1xf32, #tpu.memory_space<vmem>>, vector<1x8x1xf32>
      %38 = vector.shape_cast %37 : vector<1x8x1xf32> to vector<8x1xf32>
      %39 = arith.mulf %33, %38 : vector<8x1xf32>
      %cst_18 = arith.constant dense<0.000000e+00> : vector<8xf32>
      %40 = vector.multi_reduction <add>, %36, %cst_18 [1] : vector<8x8xf32> to vector<8xf32>
      %41 = vector.shape_cast %40 : vector<8xf32> to vector<8x1xf32>
      %42 = arith.addf %39, %41 : vector<8x1xf32>
      %c0_19 = arith.constant 0 : index
      %c0_20 = arith.constant 0 : index
      %c0_21 = arith.constant 0 : index
      %43 = vector.load %arg14[%c0_19, %c0_20, %c0_21] : memref<4x8x1xf32, #tpu.memory_space<vmem>>, vector<1x8x1xf32>
      %44 = vector.shape_cast %43 : vector<1x8x1xf32> to vector<8x1xf32>
      %45 = vector.shape_cast %42 : vector<8x1xf32> to vector<1x8x1xf32>
      tpu.vector_store %arg14[%c0_19, %c0_20, %c0_21], %45 {strides = array<i32>} : memref<4x8x1xf32, #tpu.memory_space<vmem>>, vector<1x8x1xf32>,
      %c0_22 = arith.constant 0 : index
      %c0_23 = arith.constant 0 : index
      %c0_24 = arith.constant 0 : index
      %46 = vector.load %arg10[%c0_22, %c0_23, %c0_24] : memref<4x8x8xf32, #tpu.memory_space<vmem>>, vector<1x8x8xf32>
      %47 = vector.shape_cast %46 : vector<1x8x8xf32> to vector<8x8xf32>
      %48 = vector.broadcast %33 : vector<8x1xf32> to vector<8x8xf32>
      %49 = arith.mulf %48, %47 : vector<8x8xf32>
      %cst_25 = arith.constant dense<0.000000e+00> : vector<8x8xf32>
      %50 = tpu.matmul %36, %20, %cst_25 {dimension_numbers = #tpu.dot_dimension_numbers<[1], [0], [0], [1], [0, 0, 1, 1], [], []>} : vector<8x8xf32>, vector<8x8xf32>, vector<8x8xf32> -> vector<8x8xf32>
      %51 = arith.addf %49, %50 : vector<8x8xf32>
      %c0_26 = arith.constant 0 : index
      %c0_27 = arith.constant 0 : index
      %c0_28 = arith.constant 0 : index
      %52 = vector.load %arg10[%c0_26, %c0_27, %c0_28] : memref<4x8x8xf32, #tpu.memory_space<vmem>>, vector<1x8x8xf32>
      %53 = vector.shape_cast %52 : vector<1x8x8xf32> to vector<8x8xf32>
      %54 = vector.shape_cast %51 : vector<8x8xf32> to vector<1x8x8xf32>
      tpu.vector_store %arg10[%c0_26, %c0_27, %c0_28], %54 {strides = array<i32>} : memref<4x8x8xf32, #tpu.memory_space<vmem>>, vector<1x8x8xf32>,
      %c0_29 = arith.constant 0 : index
      %c0_30 = arith.constant 0 : index
      %c0_31 = arith.constant 0 : index
      %55 = vector.load %arg12[%c0_29, %c0_30, %c0_31] : memref<4x8x1xf32, #tpu.memory_space<vmem>>, vector<1x8x1xf32>
      %56 = vector.shape_cast %55 : vector<1x8x1xf32> to vector<8x1xf32>
      %57 = vector.shape_cast %31 : vector<8x1xf32> to vector<1x8x1xf32>
      tpu.vector_store %arg12[%c0_29, %c0_30, %c0_31], %57 {strides = array<i32>} : memref<4x8x1xf32, #tpu.memory_space<vmem>>, vector<1x8x1xf32>,
      %c0_32 = arith.constant 0 : index
      %c0_33 = arith.constant 0 : index
      %c4 = arith.constant 4 : index
      %58 = vector.load %arg5[%c0_32, %c0_33, %c4] : memref<1x8x64xf32, #tpu.memory_space<vmem>>, vector<1x8x4xf32>
      %59 = vector.shape_cast %58 : vector<1x8x4xf32> to vector<8x4xf32>
      %c0_34 = arith.constant 0 : index
      %c0_35 = arith.constant 0 : index
      %c36 = arith.constant 36 : index
      %60 = vector.load %arg6[%c0_34, %c0_35, %c36] : memref<1x8x64xf32, #tpu.memory_space<vmem>>, vector<1x8x4xf32>
      %61 = vector.shape_cast %60 : vector<1x8x4xf32> to vector<8x4xf32>
      %cst_36 = arith.constant dense<0.000000e+00> : vector<8x8xf32>
      %62 = tpu.matmul %59, %61, %cst_36 {dimension_numbers = #tpu.dot_dimension_numbers<[1], [1], [0], [0], [0, 0, 1, 0], [], []>} : vector<8x4xf32>, vector<8x4xf32>, vector<8x8xf32> -> vector<8x8xf32>
      %63 = arith.addf %62, %18 : vector<8x8xf32>
      %c0_37 = arith.constant 0 : index
      %c0_38 = arith.constant 0 : index
      %c0_39 = arith.constant 0 : index
      %64 = vector.load %arg13[%c0_37, %c0_38, %c0_39] : memref<4x8x1xf32, #tpu.memory_space<vmem>>, vector<1x8x1xf32>
      %65 = vector.shape_cast %64 : vector<1x8x1xf32> to vector<8x1xf32>
      %cst_40 = arith.constant dense<0xFF800000> : vector<8xf32>
      %66 = vector.multi_reduction <maximumf>, %63, %cst_40 [1] : vector<8x8xf32> to vector<8xf32>
      %67 = vector.shape_cast %66 : vector<8xf32> to vector<8x1xf32>
      %68 = arith.maximumf %65, %67 : vector<8x1xf32>
      %69 = arith.subf %65, %68 : vector<8x1xf32>
      %70 = math.exp %69 : vector<8x1xf32>
      %71 = vector.broadcast %68 : vector<8x1xf32> to vector<8x8xf32>
      %72 = arith.subf %63, %71 : vector<8x8xf32>
      %73 = math.exp %72 : vector<8x8xf32>
      %c0_41 = arith.constant 0 : index
      %c0_42 = arith.constant 0 : index
      %c0_43 = arith.constant 0 : index
      %74 = vector.load %arg15[%c0_41, %c0_42, %c0_43] : memref<4x8x1xf32, #tpu.memory_space<vmem>>, vector<1x8x1xf32>
      %75 = vector.shape_cast %74 : vector<1x8x1xf32> to vector<8x1xf32>
      %76 = arith.mulf %70, %75 : vector<8x1xf32>
      %cst_44 = arith.constant dense<0.000000e+00> : vector<8xf32>
      %77 = vector.multi_reduction <add>, %73, %cst_44 [1] : vector<8x8xf32> to vector<8xf32>
      %78 = vector.shape_cast %77 : vector<8xf32> to vector<8x1xf32>
      %79 = arith.addf %76, %78 : vector<8x1xf32>
      %c0_45 = arith.constant 0 : index
      %c0_46 = arith.constant 0 : index
      %c0_47 = arith.constant 0 : index
      %80 = vector.load %arg15[%c0_45, %c0_46, %c0_47] : memref<4x8x1xf32, #tpu.memory_space<vmem>>, vector<1x8x1xf32>
      %81 = vector.shape_cast %80 : vector<1x8x1xf32> to vector<8x1xf32>
      %82 = vector.shape_cast %79 : vector<8x1xf32> to vector<1x8x1xf32>
      tpu.vector_store %arg15[%c0_45, %c0_46, %c0_47], %82 {strides = array<i32>} : memref<4x8x1xf32, #tpu.memory_space<vmem>>, vector<1x8x1xf32>,
      %c0_48 = arith.constant 0 : index
      %c0_49 = arith.constant 0 : index
      %c0_50 = arith.constant 0 : index
      %83 = vector.load %arg11[%c0_48, %c0_49, %c0_50] : memref<4x8x8xf32, #tpu.memory_space<vmem>>, vector<1x8x8xf32>
      %84 = vector.shape_cast %83 : vector<1x8x8xf32> to vector<8x8xf32>
      %85 = vector.broadcast %70 : vector<8x1xf32> to vector<8x8xf32>
      %86 = arith.mulf %85, %84 : vector<8x8xf32>
      %cst_51 = arith.constant dense<0.000000e+00> : vector<8x8xf32>
      %87 = tpu.matmul %73, %20, %cst_51 {dimension_numbers = #tpu.dot_dimension_numbers<[1], [0], [0], [1], [0, 0, 1, 1], [], []>} : vector<8x8xf32>, vector<8x8xf32>, vector<8x8xf32> -> vector<8x8xf32>
      %88 = arith.addf %86, %87 : vector<8x8xf32>
      %c0_52 = arith.constant 0 : index
      %c0_53 = arith.constant 0 : index
      %c0_54 = arith.constant 0 : index
      %89 = vector.load %arg11[%c0_52, %c0_53, %c0_54] : memref<4x8x8xf32, #tpu.memory_space<vmem>>, vector<1x8x8xf32>
      %90 = vector.shape_cast %89 : vector<1x8x8xf32> to vector<8x8xf32>
      %91 = vector.shape_cast %88 : vector<8x8xf32> to vector<1x8x8xf32>
      tpu.vector_store %arg11[%c0_52, %c0_53, %c0_54], %91 {strides = array<i32>} : memref<4x8x8xf32, #tpu.memory_space<vmem>>, vector<1x8x8xf32>,
      %c0_55 = arith.constant 0 : index
      %c0_56 = arith.constant 0 : index
      %c0_57 = arith.constant 0 : index
      %92 = vector.load %arg13[%c0_55, %c0_56, %c0_57] : memref<4x8x1xf32, #tpu.memory_space<vmem>>, vector<1x8x1xf32>
      %93 = vector.shape_cast %92 : vector<1x8x1xf32> to vector<8x1xf32>
      %94 = vector.shape_cast %68 : vector<8x1xf32> to vector<1x8x1xf32>
      tpu.vector_store %arg13[%c0_55, %c0_56, %c0_57], %94 {strides = array<i32>} : memref<4x8x1xf32, #tpu.memory_space<vmem>>, vector<1x8x1xf32>,
      %c0_58 = arith.constant 0 : index
      %c0_59 = arith.constant 0 : index
      %c72 = arith.constant 72 : index
      %95 = vector.load %arg7[%c0_58, %c0_59, %c72] : memref<1x8x96xf32, #tpu.memory_space<vmem>>, vector<1x8x8xf32>
      %96 = vector.shape_cast %95 : vector<1x8x8xf32> to vector<8x8xf32>
      %c0_60 = arith.constant 0 : index
      %c0_61 = arith.constant 0 : index
      %c8 = arith.constant 8 : index
      %97 = vector.load %arg5[%c0_60, %c0_61, %c8] : memref<1x8x64xf32, #tpu.memory_space<vmem>>, vector<1x8x4xf32>
      %98 = vector.shape_cast %97 : vector<1x8x4xf32> to vector<8x4xf32>
      %c0_62 = arith.constant 0 : index
      %c0_63 = arith.constant 0 : index
      %c40 = arith.constant 40 : index
      %99 = vector.load %arg6[%c0_62, %c0_63, %c40] : memref<1x8x64xf32, #tpu.memory_space<vmem>>, vector<1x8x4xf32>
      %100 = vector.shape_cast %99 : vector<1x8x4xf32> to vector<8x4xf32>
      %cst_64 = arith.constant dense<0.000000e+00> : vector<8x8xf32>
      %101 = tpu.matmul %98, %100, %cst_64 {dimension_numbers = #tpu.dot_dimension_numbers<[1], [1], [0], [0], [0, 0, 1, 0], [], []>} : vector<8x4xf32>, vector<8x4xf32>, vector<8x8xf32> -> vector<8x8xf32>
      %102 = arith.addf %101, %18 : vector<8x8xf32>
      %c1 = arith.constant 1 : index
      %c0_65 = arith.constant 0 : index
      %c0_66 = arith.constant 0 : index
      %103 = vector.load %arg12[%c1, %c0_65, %c0_66] : memref<4x8x1xf32, #tpu.memory_space<vmem>>, vector<1x8x1xf32>
      %104 = vector.shape_cast %103 : vector<1x8x1xf32> to vector<8x1xf32>
      %cst_67 = arith.constant dense<0xFF800000> : vector<8xf32>
      %105 = vector.multi_reduction <maximumf>, %102, %cst_67 [1] : vector<8x8xf32> to vector<8xf32>
      %106 = vector.shape_cast %105 : vector<8xf32> to vector<8x1xf32>
      %107 = arith.maximumf %104, %106 : vector<8x1xf32>
      %108 = arith.subf %104, %107 : vector<8x1xf32>
      %109 = math.exp %108 : vector<8x1xf32>
      %110 = vector.broadcast %107 : vector<8x1xf32> to vector<8x8xf32>
      %111 = arith.subf %102, %110 : vector<8x8xf32>
      %112 = math.exp %111 : vector<8x8xf32>
      %c1_68 = arith.constant 1 : index
      %c0_69 = arith.constant 0 : index
      %c0_70 = arith.constant 0 : index
      %113 = vector.load %arg14[%c1_68, %c0_69, %c0_70] : memref<4x8x1xf32, #tpu.memory_space<vmem>>, vector<1x8x1xf32>
      %114 = vector.shape_cast %113 : vector<1x8x1xf32> to vector<8x1xf32>
      %115 = arith.mulf %109, %114 : vector<8x1xf32>
      %cst_71 = arith.constant dense<0.000000e+00> : vector<8xf32>
      %116 = vector.multi_reduction <add>, %112, %cst_71 [1] : vector<8x8xf32> to vector<8xf32>
      %117 = vector.shape_cast %116 : vector<8xf32> to vector<8x1xf32>
      %118 = arith.addf %115, %117 : vector<8x1xf32>
      %c1_72 = arith.constant 1 : index
      %c0_73 = arith.constant 0 : index
      %c0_74 = arith.constant 0 : index
      %119 = vector.load %arg14[%c1_72, %c0_73, %c0_74] : memref<4x8x1xf32, #tpu.memory_space<vmem>>, vector<1x8x1xf32>
      %120 = vector.shape_cast %119 : vector<1x8x1xf32> to vector<8x1xf32>
      %121 = vector.shape_cast %118 : vector<8x1xf32> to vector<1x8x1xf32>
      tpu.vector_store %arg14[%c1_72, %c0_73, %c0_74], %121 {strides = array<i32>} : memref<4x8x1xf32, #tpu.memory_space<vmem>>, vector<1x8x1xf32>,
      %c1_75 = arith.constant 1 : index
      %c0_76 = arith.constant 0 : index
      %c0_77 = arith.constant 0 : index
      %122 = vector.load %arg10[%c1_75, %c0_76, %c0_77] : memref<4x8x8xf32, #tpu.memory_space<vmem>>, vector<1x8x8xf32>
      %123 = vector.shape_cast %122 : vector<1x8x8xf32> to vector<8x8xf32>
      %124 = vector.broadcast %109 : vector<8x1xf32> to vector<8x8xf32>
      %125 = arith.mulf %124, %123 : vector<8x8xf32>
      %cst_78 = arith.constant dense<0.000000e+00> : vector<8x8xf32>
      %126 = tpu.matmul %112, %96, %cst_78 {dimension_numbers = #tpu.dot_dimension_numbers<[1], [0], [0], [1], [0, 0, 1, 1], [], []>} : vector<8x8xf32>, vector<8x8xf32>, vector<8x8xf32> -> vector<8x8xf32>
      %127 = arith.addf %125, %126 : vector<8x8xf32>
      %c1_79 = arith.constant 1 : index
      %c0_80 = arith.constant 0 : index
      %c0_81 = arith.constant 0 : index
      %128 = vector.load %arg10[%c1_79, %c0_80, %c0_81] : memref<4x8x8xf32, #tpu.memory_space<vmem>>, vector<1x8x8xf32>
      %129 = vector.shape_cast %128 : vector<1x8x8xf32> to vector<8x8xf32>
      %130 = vector.shape_cast %127 : vector<8x8xf32> to vector<1x8x8xf32>
      tpu.vector_store %arg10[%c1_79, %c0_80, %c0_81], %130 {strides = array<i32>} : memref<4x8x8xf32, #tpu.memory_space<vmem>>, vector<1x8x8xf32>,
      %c1_82 = arith.constant 1 : index
      %c0_83 = arith.constant 0 : index
      %c0_84 = arith.constant 0 : index
      %131 = vector.load %arg12[%c1_82, %c0_83, %c0_84] : memref<4x8x1xf32, #tpu.memory_space<vmem>>, vector<1x8x1xf32>
      %132 = vector.shape_cast %131 : vector<1x8x1xf32> to vector<8x1xf32>
      %133 = vector.shape_cast %107 : vector<8x1xf32> to vector<1x8x1xf32>
      tpu.vector_store %arg12[%c1_82, %c0_83, %c0_84], %133 {strides = array<i32>} : memref<4x8x1xf32, #tpu.memory_space<vmem>>, vector<1x8x1xf32>,
      %c0_85 = arith.constant 0 : index
      %c0_86 = arith.constant 0 : index
      %c12 = arith.constant 12 : index
      %134 = vector.load %arg5[%c0_85, %c0_86, %c12] : memref<1x8x64xf32, #tpu.memory_space<vmem>>, vector<1x8x4xf32>
      %135 = vector.shape_cast %134 : vector<1x8x4xf32> to vector<8x4xf32>
      %c0_87 = arith.constant 0 : index
      %c0_88 = arith.constant 0 : index
      %c44 = arith.constant 44 : index
      %136 = vector.load %arg6[%c0_87, %c0_88, %c44] : memref<1x8x64xf32, #tpu.memory_space<vmem>>, vector<1x8x4xf32>
      %137 = vector.shape_cast %136 : vector<1x8x4xf32> to vector<8x4xf32>
      %cst_89 = arith.constant dense<0.000000e+00> : vector<8x8xf32>
      %138 = tpu.matmul %135, %137, %cst_89 {dimension_numbers = #tpu.dot_dimension_numbers<[1], [1], [0], [0], [0, 0, 1, 0], [], []>} : vector<8x4xf32>, vector<8x4xf32>, vector<8x8xf32> -> vector<8x8xf32>
      %139 = arith.addf %138, %18 : vector<8x8xf32>
      %c1_90 = arith.constant 1 : index
      %c0_91 = arith.constant 0 : index
      %c0_92 = arith.constant 0 : index
      %140 = vector.load %arg13[%c1_90, %c0_91, %c0_92] : memref<4x8x1xf32, #tpu.memory_space<vmem>>, vector<1x8x1xf32>
      %141 = vector.shape_cast %140 : vector<1x8x1xf32> to vector<8x1xf32>
      %cst_93 = arith.constant dense<0xFF800000> : vector<8xf32>
      %142 = vector.multi_reduction <maximumf>, %139, %cst_93 [1] : vector<8x8xf32> to vector<8xf32>
      %143 = vector.shape_cast %142 : vector<8xf32> to vector<8x1xf32>
      %144 = arith.maximumf %141, %143 : vector<8x1xf32>
      %145 = arith.subf %141, %144 : vector<8x1xf32>
      %146 = math.exp %145 : vector<8x1xf32>
      %147 = vector.broadcast %144 : vector<8x1xf32> to vector<8x8xf32>
      %148 = arith.subf %139, %147 : vector<8x8xf32>
      %149 = math.exp %148 : vector<8x8xf32>
      %c1_94 = arith.constant 1 : index
      %c0_95 = arith.constant 0 : index
      %c0_96 = arith.constant 0 : index
      %150 = vector.load %arg15[%c1_94, %c0_95, %c0_96] : memref<4x8x1xf32, #tpu.memory_space<vmem>>, vector<1x8x1xf32>
      %151 = vector.shape_cast %150 : vector<1x8x1xf32> to vector<8x1xf32>
      %152 = arith.mulf %146, %151 : vector<8x1xf32>
      %cst_97 = arith.constant dense<0.000000e+00> : vector<8xf32>
      %153 = vector.multi_reduction <add>, %149, %cst_97 [1] : vector<8x8xf32> to vector<8xf32>
      %154 = vector.shape_cast %153 : vector<8xf32> to vector<8x1xf32>
      %155 = arith.addf %152, %154 : vector<8x1xf32>
      %c1_98 = arith.constant 1 : index
      %c0_99 = arith.constant 0 : index
      %c0_100 = arith.constant 0 : index
      %156 = vector.load %arg15[%c1_98, %c0_99, %c0_100] : memref<4x8x1xf32, #tpu.memory_space<vmem>>, vector<1x8x1xf32>
      %157 = vector.shape_cast %156 : vector<1x8x1xf32> to vector<8x1xf32>
      %158 = vector.shape_cast %155 : vector<8x1xf32> to vector<1x8x1xf32>
      tpu.vector_store %arg15[%c1_98, %c0_99, %c0_100], %158 {strides = array<i32>} : memref<4x8x1xf32, #tpu.memory_space<vmem>>, vector<1x8x1xf32>,
      %c1_101 = arith.constant 1 : index
      %c0_102 = arith.constant 0 : index
      %c0_103 = arith.constant 0 : index
      %159 = vector.load %arg11[%c1_101, %c0_102, %c0_103] : memref<4x8x8xf32, #tpu.memory_space<vmem>>, vector<1x8x8xf32>
      %160 = vector.shape_cast %159 : vector<1x8x8xf32> to vector<8x8xf32>
      %161 = vector.broadcast %146 : vector<8x1xf32> to vector<8x8xf32>
      %162 = arith.mulf %161, %160 : vector<8x8xf32>
      %cst_104 = arith.constant dense<0.000000e+00> : vector<8x8xf32>
      %163 = tpu.matmul %149, %96, %cst_104 {dimension_numbers = #tpu.dot_dimension_numbers<[1], [0], [0], [1], [0, 0, 1, 1], [], []>} : vector<8x8xf32>, vector<8x8xf32>, vector<8x8xf32> -> vector<8x8xf32>
      %164 = arith.addf %162, %163 : vector<8x8xf32>
      %c1_105 = arith.constant 1 : index
      %c0_106 = arith.constant 0 : index
      %c0_107 = arith.constant 0 : index
      %165 = vector.load %arg11[%c1_105, %c0_106, %c0_107] : memref<4x8x8xf32, #tpu.memory_space<vmem>>, vector<1x8x8xf32>
      %166 = vector.shape_cast %165 : vector<1x8x8xf32> to vector<8x8xf32>
      %167 = vector.shape_cast %164 : vector<8x8xf32> to vector<1x8x8xf32>
      tpu.vector_store %arg11[%c1_105, %c0_106, %c0_107], %167 {strides = array<i32>} : memref<4x8x8xf32, #tpu.memory_space<vmem>>, vector<1x8x8xf32>,
      %c1_108 = arith.constant 1 : index
      %c0_109 = arith.constant 0 : index
      %c0_110 = arith.constant 0 : index
      %168 = vector.load %arg13[%c1_108, %c0_109, %c0_110] : memref<4x8x1xf32, #tpu.memory_space<vmem>>, vector<1x8x1xf32>
      %169 = vector.shape_cast %168 : vector<1x8x1xf32> to vector<8x1xf32>
      %170 = vector.shape_cast %144 : vector<8x1xf32> to vector<1x8x1xf32>
      tpu.vector_store %arg13[%c1_108, %c0_109, %c0_110], %170 {strides = array<i32>} : memref<4x8x1xf32, #tpu.memory_space<vmem>>, vector<1x8x1xf32>,
      %c0_111 = arith.constant 0 : index
      %c0_112 = arith.constant 0 : index
      %c80 = arith.constant 80 : index
      %171 = vector.load %arg7[%c0_111, %c0_112, %c80] : memref<1x8x96xf32, #tpu.memory_space<vmem>>, vector<1x8x8xf32>
      %172 = vector.shape_cast %171 : vector<1x8x8xf32> to vector<8x8xf32>
      %c0_113 = arith.constant 0 : index
      %c0_114 = arith.constant 0 : index
      %c16 = arith.constant 16 : index
      %173 = vector.load %arg5[%c0_113, %c0_114, %c16] : memref<1x8x64xf32, #tpu.memory_space<vmem>>, vector<1x8x4xf32>
      %174 = vector.shape_cast %173 : vector<1x8x4xf32> to vector<8x4xf32>
      %c0_115 = arith.constant 0 : index
      %c0_116 = arith.constant 0 : index
      %c48 = arith.constant 48 : index
      %175 = vector.load %arg6[%c0_115, %c0_116, %c48] : memref<1x8x64xf32, #tpu.memory_space<vmem>>, vector<1x8x4xf32>
      %176 = vector.shape_cast %175 : vector<1x8x4xf32> to vector<8x4xf32>
      %cst_117 = arith.constant dense<0.000000e+00> : vector<8x8xf32>
      %177 = tpu.matmul %174, %176, %cst_117 {dimension_numbers = #tpu.dot_dimension_numbers<[1], [1], [0], [0], [0, 0, 1, 0], [], []>} : vector<8x4xf32>, vector<8x4xf32>, vector<8x8xf32> -> vector<8x8xf32>
      %178 = arith.addf %177, %18 : vector<8x8xf32>
      %c2 = arith.constant 2 : index
      %c0_118 = arith.constant 0 : index
      %c0_119 = arith.constant 0 : index
      %179 = vector.load %arg12[%c2, %c0_118, %c0_119] : memref<4x8x1xf32, #tpu.memory_space<vmem>>, vector<1x8x1xf32>
      %180 = vector.shape_cast %179 : vector<1x8x1xf32> to vector<8x1xf32>
      %cst_120 = arith.constant dense<0xFF800000> : vector<8xf32>
      %181 = vector.multi_reduction <maximumf>, %178, %cst_120 [1] : vector<8x8xf32> to vector<8xf32>
      %182 = vector.shape_cast %181 : vector<8xf32> to vector<8x1xf32>
      %183 = arith.maximumf %180, %182 : vector<8x1xf32>
      %184 = arith.subf %180, %183 : vector<8x1xf32>
      %185 = math.exp %184 : vector<8x1xf32>
      %186 = vector.broadcast %183 : vector<8x1xf32> to vector<8x8xf32>
      %187 = arith.subf %178, %186 : vector<8x8xf32>
      %188 = math.exp %187 : vector<8x8xf32>
      %c2_121 = arith.constant 2 : index
      %c0_122 = arith.constant 0 : index
      %c0_123 = arith.constant 0 : index
      %189 = vector.load %arg14[%c2_121, %c0_122, %c0_123] : memref<4x8x1xf32, #tpu.memory_space<vmem>>, vector<1x8x1xf32>
      %190 = vector.shape_cast %189 : vector<1x8x1xf32> to vector<8x1xf32>
      %191 = arith.mulf %185, %190 : vector<8x1xf32>
      %cst_124 = arith.constant dense<0.000000e+00> : vector<8xf32>
      %192 = vector.multi_reduction <add>, %188, %cst_124 [1] : vector<8x8xf32> to vector<8xf32>
      %193 = vector.shape_cast %192 : vector<8xf32> to vector<8x1xf32>
      %194 = arith.addf %191, %193 : vector<8x1xf32>
      %c2_125 = arith.constant 2 : index
      %c0_126 = arith.constant 0 : index
      %c0_127 = arith.constant 0 : index
      %195 = vector.load %arg14[%c2_125, %c0_126, %c0_127] : memref<4x8x1xf32, #tpu.memory_space<vmem>>, vector<1x8x1xf32>
      %196 = vector.shape_cast %195 : vector<1x8x1xf32> to vector<8x1xf32>
      %197 = vector.shape_cast %194 : vector<8x1xf32> to vector<1x8x1xf32>
      tpu.vector_store %arg14[%c2_125, %c0_126, %c0_127], %197 {strides = array<i32>} : memref<4x8x1xf32, #tpu.memory_space<vmem>>, vector<1x8x1xf32>,
      %c2_128 = arith.constant 2 : index
      %c0_129 = arith.constant 0 : index
      %c0_130 = arith.constant 0 : index
      %198 = vector.load %arg10[%c2_128, %c0_129, %c0_130] : memref<4x8x8xf32, #tpu.memory_space<vmem>>, vector<1x8x8xf32>
      %199 = vector.shape_cast %198 : vector<1x8x8xf32> to vector<8x8xf32>
      %200 = vector.broadcast %185 : vector<8x1xf32> to vector<8x8xf32>
      %201 = arith.mulf %200, %199 : vector<8x8xf32>
      %cst_131 = arith.constant dense<0.000000e+00> : vector<8x8xf32>
      %202 = tpu.matmul %188, %172, %cst_131 {dimension_numbers = #tpu.dot_dimension_numbers<[1], [0], [0], [1], [0, 0, 1, 1], [], []>} : vector<8x8xf32>, vector<8x8xf32>, vector<8x8xf32> -> vector<8x8xf32>
      %203 = arith.addf %201, %202 : vector<8x8xf32>
      %c2_132 = arith.constant 2 : index
      %c0_133 = arith.constant 0 : index
      %c0_134 = arith.constant 0 : index
      %204 = vector.load %arg10[%c2_132, %c0_133, %c0_134] : memref<4x8x8xf32, #tpu.memory_space<vmem>>, vector<1x8x8xf32>
      %205 = vector.shape_cast %204 : vector<1x8x8xf32> to vector<8x8xf32>
      %206 = vector.shape_cast %203 : vector<8x8xf32> to vector<1x8x8xf32>
      tpu.vector_store %arg10[%c2_132, %c0_133, %c0_134], %206 {strides = array<i32>} : memref<4x8x8xf32, #tpu.memory_space<vmem>>, vector<1x8x8xf32>,
      %c2_135 = arith.constant 2 : index
      %c0_136 = arith.constant 0 : index
      %c0_137 = arith.constant 0 : index
      %207 = vector.load %arg12[%c2_135, %c0_136, %c0_137] : memref<4x8x1xf32, #tpu.memory_space<vmem>>, vector<1x8x1xf32>
      %208 = vector.shape_cast %207 : vector<1x8x1xf32> to vector<8x1xf32>
      %209 = vector.shape_cast %183 : vector<8x1xf32> to vector<1x8x1xf32>
      tpu.vector_store %arg12[%c2_135, %c0_136, %c0_137], %209 {strides = array<i32>} : memref<4x8x1xf32, #tpu.memory_space<vmem>>, vector<1x8x1xf32>,
      %c0_138 = arith.constant 0 : index
      %c0_139 = arith.constant 0 : index
      %c20 = arith.constant 20 : index
      %210 = vector.load %arg5[%c0_138, %c0_139, %c20] : memref<1x8x64xf32, #tpu.memory_space<vmem>>, vector<1x8x4xf32>
      %211 = vector.shape_cast %210 : vector<1x8x4xf32> to vector<8x4xf32>
      %c0_140 = arith.constant 0 : index
      %c0_141 = arith.constant 0 : index
      %c52 = arith.constant 52 : index
      %212 = vector.load %arg6[%c0_140, %c0_141, %c52] : memref<1x8x64xf32, #tpu.memory_space<vmem>>, vector<1x8x4xf32>
      %213 = vector.shape_cast %212 : vector<1x8x4xf32> to vector<8x4xf32>
      %cst_142 = arith.constant dense<0.000000e+00> : vector<8x8xf32>
      %214 = tpu.matmul %211, %213, %cst_142 {dimension_numbers = #tpu.dot_dimension_numbers<[1], [1], [0], [0], [0, 0, 1, 0], [], []>} : vector<8x4xf32>, vector<8x4xf32>, vector<8x8xf32> -> vector<8x8xf32>
      %215 = arith.addf %214, %18 : vector<8x8xf32>
      %c2_143 = arith.constant 2 : index
      %c0_144 = arith.constant 0 : index
      %c0_145 = arith.constant 0 : index
      %216 = vector.load %arg13[%c2_143, %c0_144, %c0_145] : memref<4x8x1xf32, #tpu.memory_space<vmem>>, vector<1x8x1xf32>
      %217 = vector.shape_cast %216 : vector<1x8x1xf32> to vector<8x1xf32>
      %cst_146 = arith.constant dense<0xFF800000> : vector<8xf32>
      %218 = vector.multi_reduction <maximumf>, %215, %cst_146 [1] : vector<8x8xf32> to vector<8xf32>
      %219 = vector.shape_cast %218 : vector<8xf32> to vector<8x1xf32>
      %220 = arith.maximumf %217, %219 : vector<8x1xf32>
      %221 = arith.subf %217, %220 : vector<8x1xf32>
      %222 = math.exp %221 : vector<8x1xf32>
      %223 = vector.broadcast %220 : vector<8x1xf32> to vector<8x8xf32>
      %224 = arith.subf %215, %223 : vector<8x8xf32>
      %225 = math.exp %224 : vector<8x8xf32>
      %c2_147 = arith.constant 2 : index
      %c0_148 = arith.constant 0 : index
      %c0_149 = arith.constant 0 : index
      %226 = vector.load %arg15[%c2_147, %c0_148, %c0_149] : memref<4x8x1xf32, #tpu.memory_space<vmem>>, vector<1x8x1xf32>
      %227 = vector.shape_cast %226 : vector<1x8x1xf32> to vector<8x1xf32>
      %228 = arith.mulf %222, %227 : vector<8x1xf32>
      %cst_150 = arith.constant dense<0.000000e+00> : vector<8xf32>
      %229 = vector.multi_reduction <add>, %225, %cst_150 [1] : vector<8x8xf32> to vector<8xf32>
      %230 = vector.shape_cast %229 : vector<8xf32> to vector<8x1xf32>
      %231 = arith.addf %228, %230 : vector<8x1xf32>
      %c2_151 = arith.constant 2 : index
      %c0_152 = arith.constant 0 : index
      %c0_153 = arith.constant 0 : index
      %232 = vector.load %arg15[%c2_151, %c0_152, %c0_153] : memref<4x8x1xf32, #tpu.memory_space<vmem>>, vector<1x8x1xf32>
      %233 = vector.shape_cast %232 : vector<1x8x1xf32> to vector<8x1xf32>
      %234 = vector.shape_cast %231 : vector<8x1xf32> to vector<1x8x1xf32>
      tpu.vector_store %arg15[%c2_151, %c0_152, %c0_153], %234 {strides = array<i32>} : memref<4x8x1xf32, #tpu.memory_space<vmem>>, vector<1x8x1xf32>,
      %c2_154 = arith.constant 2 : index
      %c0_155 = arith.constant 0 : index
      %c0_156 = arith.constant 0 : index
      %235 = vector.load %arg11[%c2_154, %c0_155, %c0_156] : memref<4x8x8xf32, #tpu.memory_space<vmem>>, vector<1x8x8xf32>
      %236 = vector.shape_cast %235 : vector<1x8x8xf32> to vector<8x8xf32>
      %237 = vector.broadcast %222 : vector<8x1xf32> to vector<8x8xf32>
      %238 = arith.mulf %237, %236 : vector<8x8xf32>
      %cst_157 = arith.constant dense<0.000000e+00> : vector<8x8xf32>
      %239 = tpu.matmul %225, %172, %cst_157 {dimension_numbers = #tpu.dot_dimension_numbers<[1], [0], [0], [1], [0, 0, 1, 1], [], []>} : vector<8x8xf32>, vector<8x8xf32>, vector<8x8xf32> -> vector<8x8xf32>
      %240 = arith.addf %238, %239 : vector<8x8xf32>
      %c2_158 = arith.constant 2 : index
      %c0_159 = arith.constant 0 : index
      %c0_160 = arith.constant 0 : index
      %241 = vector.load %arg11[%c2_158, %c0_159, %c0_160] : memref<4x8x8xf32, #tpu.memory_space<vmem>>, vector<1x8x8xf32>
      %242 = vector.shape_cast %241 : vector<1x8x8xf32> to vector<8x8xf32>
      %243 = vector.shape_cast %240 : vector<8x8xf32> to vector<1x8x8xf32>
      tpu.vector_store %arg11[%c2_158, %c0_159, %c0_160], %243 {strides = array<i32>} : memref<4x8x8xf32, #tpu.memory_space<vmem>>, vector<1x8x8xf32>,
      %c2_161 = arith.constant 2 : index
      %c0_162 = arith.constant 0 : index
      %c0_163 = arith.constant 0 : index
      %244 = vector.load %arg13[%c2_161, %c0_162, %c0_163] : memref<4x8x1xf32, #tpu.memory_space<vmem>>, vector<1x8x1xf32>
      %245 = vector.shape_cast %244 : vector<1x8x1xf32> to vector<8x1xf32>
      %246 = vector.shape_cast %220 : vector<8x1xf32> to vector<1x8x1xf32>
      tpu.vector_store %arg13[%c2_161, %c0_162, %c0_163], %246 {strides = array<i32>} : memref<4x8x1xf32, #tpu.memory_space<vmem>>, vector<1x8x1xf32>,
      %c0_164 = arith.constant 0 : index
      %c0_165 = arith.constant 0 : index
      %c88 = arith.constant 88 : index
      %247 = vector.load %arg7[%c0_164, %c0_165, %c88] : memref<1x8x96xf32, #tpu.memory_space<vmem>>, vector<1x8x8xf32>
      %248 = vector.shape_cast %247 : vector<1x8x8xf32> to vector<8x8xf32>
      %c0_166 = arith.constant 0 : index
      %c0_167 = arith.constant 0 : index
      %c24 = arith.constant 24 : index
      %249 = vector.load %arg5[%c0_166, %c0_167, %c24] : memref<1x8x64xf32, #tpu.memory_space<vmem>>, vector<1x8x4xf32>
      %250 = vector.shape_cast %249 : vector<1x8x4xf32> to vector<8x4xf32>
      %c0_168 = arith.constant 0 : index
      %c0_169 = arith.constant 0 : index
      %c56 = arith.constant 56 : index
      %251 = vector.load %arg6[%c0_168, %c0_169, %c56] : memref<1x8x64xf32, #tpu.memory_space<vmem>>, vector<1x8x4xf32>
      %252 = vector.shape_cast %251 : vector<1x8x4xf32> to vector<8x4xf32>
      %cst_170 = arith.constant dense<0.000000e+00> : vector<8x8xf32>
      %253 = tpu.matmul %250, %252, %cst_170 {dimension_numbers = #tpu.dot_dimension_numbers<[1], [1], [0], [0], [0, 0, 1, 0], [], []>} : vector<8x4xf32>, vector<8x4xf32>, vector<8x8xf32> -> vector<8x8xf32>
      %254 = arith.addf %253, %18 : vector<8x8xf32>
      %c3 = arith.constant 3 : index
      %c0_171 = arith.constant 0 : index
      %c0_172 = arith.constant 0 : index
      %255 = vector.load %arg12[%c3, %c0_171, %c0_172] : memref<4x8x1xf32, #tpu.memory_space<vmem>>, vector<1x8x1xf32>
      %256 = vector.shape_cast %255 : vector<1x8x1xf32> to vector<8x1xf32>
      %cst_173 = arith.constant dense<0xFF800000> : vector<8xf32>
      %257 = vector.multi_reduction <maximumf>, %254, %cst_173 [1] : vector<8x8xf32> to vector<8xf32>
      %258 = vector.shape_cast %257 : vector<8xf32> to vector<8x1xf32>
      %259 = arith.maximumf %256, %258 : vector<8x1xf32>
      %260 = arith.subf %256, %259 : vector<8x1xf32>
      %261 = math.exp %260 : vector<8x1xf32>
      %262 = vector.broadcast %259 : vector<8x1xf32> to vector<8x8xf32>
      %263 = arith.subf %254, %262 : vector<8x8xf32>
      %264 = math.exp %263 : vector<8x8xf32>
      %c3_174 = arith.constant 3 : index
      %c0_175 = arith.constant 0 : index
      %c0_176 = arith.constant 0 : index
      %265 = vector.load %arg14[%c3_174, %c0_175, %c0_176] : memref<4x8x1xf32, #tpu.memory_space<vmem>>, vector<1x8x1xf32>
      %266 = vector.shape_cast %265 : vector<1x8x1xf32> to vector<8x1xf32>
      %267 = arith.mulf %261, %266 : vector<8x1xf32>
      %cst_177 = arith.constant dense<0.000000e+00> : vector<8xf32>
      %268 = vector.multi_reduction <add>, %264, %cst_177 [1] : vector<8x8xf32> to vector<8xf32>
      %269 = vector.shape_cast %268 : vector<8xf32> to vector<8x1xf32>
      %270 = arith.addf %267, %269 : vector<8x1xf32>
      %c3_178 = arith.constant 3 : index
      %c0_179 = arith.constant 0 : index
      %c0_180 = arith.constant 0 : index
      %271 = vector.load %arg14[%c3_178, %c0_179, %c0_180] : memref<4x8x1xf32, #tpu.memory_space<vmem>>, vector<1x8x1xf32>
      %272 = vector.shape_cast %271 : vector<1x8x1xf32> to vector<8x1xf32>
      %273 = vector.shape_cast %270 : vector<8x1xf32> to vector<1x8x1xf32>
      tpu.vector_store %arg14[%c3_178, %c0_179, %c0_180], %273 {strides = array<i32>} : memref<4x8x1xf32, #tpu.memory_space<vmem>>, vector<1x8x1xf32>,
      %c3_181 = arith.constant 3 : index
      %c0_182 = arith.constant 0 : index
      %c0_183 = arith.constant 0 : index
      %274 = vector.load %arg10[%c3_181, %c0_182, %c0_183] : memref<4x8x8xf32, #tpu.memory_space<vmem>>, vector<1x8x8xf32>
      %275 = vector.shape_cast %274 : vector<1x8x8xf32> to vector<8x8xf32>
      %276 = vector.broadcast %261 : vector<8x1xf32> to vector<8x8xf32>
      %277 = arith.mulf %276, %275 : vector<8x8xf32>
      %cst_184 = arith.constant dense<0.000000e+00> : vector<8x8xf32>
      %278 = tpu.matmul %264, %248, %cst_184 {dimension_numbers = #tpu.dot_dimension_numbers<[1], [0], [0], [1], [0, 0, 1, 1], [], []>} : vector<8x8xf32>, vector<8x8xf32>, vector<8x8xf32> -> vector<8x8xf32>
      %279 = arith.addf %277, %278 : vector<8x8xf32>
      %c3_185 = arith.constant 3 : index
      %c0_186 = arith.constant 0 : index
      %c0_187 = arith.constant 0 : index
      %280 = vector.load %arg10[%c3_185, %c0_186, %c0_187] : memref<4x8x8xf32, #tpu.memory_space<vmem>>, vector<1x8x8xf32>
      %281 = vector.shape_cast %280 : vector<1x8x8xf32> to vector<8x8xf32>
      %282 = vector.shape_cast %279 : vector<8x8xf32> to vector<1x8x8xf32>
      tpu.vector_store %arg10[%c3_185, %c0_186, %c0_187], %282 {strides = array<i32>} : memref<4x8x8xf32, #tpu.memory_space<vmem>>, vector<1x8x8xf32>,
      %c3_188 = arith.constant 3 : index
      %c0_189 = arith.constant 0 : index
      %c0_190 = arith.constant 0 : index
      %283 = vector.load %arg12[%c3_188, %c0_189, %c0_190] : memref<4x8x1xf32, #tpu.memory_space<vmem>>, vector<1x8x1xf32>
      %284 = vector.shape_cast %283 : vector<1x8x1xf32> to vector<8x1xf32>
      %285 = vector.shape_cast %259 : vector<8x1xf32> to vector<1x8x1xf32>
      tpu.vector_store %arg12[%c3_188, %c0_189, %c0_190], %285 {strides = array<i32>} : memref<4x8x1xf32, #tpu.memory_space<vmem>>, vector<1x8x1xf32>,
      %c0_191 = arith.constant 0 : index
      %c0_192 = arith.constant 0 : index
      %c28 = arith.constant 28 : index
      %286 = vector.load %arg5[%c0_191, %c0_192, %c28] : memref<1x8x64xf32, #tpu.memory_space<vmem>>, vector<1x8x4xf32>
      %287 = vector.shape_cast %286 : vector<1x8x4xf32> to vector<8x4xf32>
      %c0_193 = arith.constant 0 : index
      %c0_194 = arith.constant 0 : index
      %c60 = arith.constant 60 : index
      %288 = vector.load %arg6[%c0_193, %c0_194, %c60] : memref<1x8x64xf32, #tpu.memory_space<vmem>>, vector<1x8x4xf32>
      %289 = vector.shape_cast %288 : vector<1x8x4xf32> to vector<8x4xf32>
      %cst_195 = arith.constant dense<0.000000e+00> : vector<8x8xf32>
      %290 = tpu.matmul %287, %289, %cst_195 {dimension_numbers = #tpu.dot_dimension_numbers<[1], [1], [0], [0], [0, 0, 1, 0], [], []>} : vector<8x4xf32>, vector<8x4xf32>, vector<8x8xf32> -> vector<8x8xf32>
      %291 = arith.addf %290, %18 : vector<8x8xf32>
      %c3_196 = arith.constant 3 : index
      %c0_197 = arith.constant 0 : index
      %c0_198 = arith.constant 0 : index
      %292 = vector.load %arg13[%c3_196, %c0_197, %c0_198] : memref<4x8x1xf32, #tpu.memory_space<vmem>>, vector<1x8x1xf32>
      %293 = vector.shape_cast %292 : vector<1x8x1xf32> to vector<8x1xf32>
      %cst_199 = arith.constant dense<0xFF800000> : vector<8xf32>
      %294 = vector.multi_reduction <maximumf>, %291, %cst_199 [1] : vector<8x8xf32> to vector<8xf32>
      %295 = vector.shape_cast %294 : vector<8xf32> to vector<8x1xf32>
      %296 = arith.maximumf %293, %295 : vector<8x1xf32>
      %297 = arith.subf %293, %296 : vector<8x1xf32>
      %298 = math.exp %297 : vector<8x1xf32>
      %299 = vector.broadcast %296 : vector<8x1xf32> to vector<8x8xf32>
      %300 = arith.subf %291, %299 : vector<8x8xf32>
      %301 = math.exp %300 : vector<8x8xf32>
      %c3_200 = arith.constant 3 : index
      %c0_201 = arith.constant 0 : index
      %c0_202 = arith.constant 0 : index
      %302 = vector.load %arg15[%c3_200, %c0_201, %c0_202] : memref<4x8x1xf32, #tpu.memory_space<vmem>>, vector<1x8x1xf32>
      %303 = vector.shape_cast %302 : vector<1x8x1xf32> to vector<8x1xf32>
      %304 = arith.mulf %298, %303 : vector<8x1xf32>
      %cst_203 = arith.constant dense<0.000000e+00> : vector<8xf32>
      %305 = vector.multi_reduction <add>, %301, %cst_203 [1] : vector<8x8xf32> to vector<8xf32>
      %306 = vector.shape_cast %305 : vector<8xf32> to vector<8x1xf32>
      %307 = arith.addf %304, %306 : vector<8x1xf32>
      %c3_204 = arith.constant 3 : index
      %c0_205 = arith.constant 0 : index
      %c0_206 = arith.constant 0 : index
      %308 = vector.load %arg15[%c3_204, %c0_205, %c0_206] : memref<4x8x1xf32, #tpu.memory_space<vmem>>, vector<1x8x1xf32>
      %309 = vector.shape_cast %308 : vector<1x8x1xf32> to vector<8x1xf32>
      %310 = vector.shape_cast %307 : vector<8x1xf32> to vector<1x8x1xf32>
      tpu.vector_store %arg15[%c3_204, %c0_205, %c0_206], %310 {strides = array<i32>} : memref<4x8x1xf32, #tpu.memory_space<vmem>>, vector<1x8x1xf32>,
      %c3_207 = arith.constant 3 : index
      %c0_208 = arith.constant 0 : index
      %c0_209 = arith.constant 0 : index
      %311 = vector.load %arg11[%c3_207, %c0_208, %c0_209] : memref<4x8x8xf32, #tpu.memory_space<vmem>>, vector<1x8x8xf32>
      %312 = vector.shape_cast %311 : vector<1x8x8xf32> to vector<8x8xf32>
      %313 = vector.broadcast %298 : vector<8x1xf32> to vector<8x8xf32>
      %314 = arith.mulf %313, %312 : vector<8x8xf32>
      %cst_210 = arith.constant dense<0.000000e+00> : vector<8x8xf32>
      %315 = tpu.matmul %301, %248, %cst_210 {dimension_numbers = #tpu.dot_dimension_numbers<[1], [0], [0], [1], [0, 0, 1, 1], [], []>} : vector<8x8xf32>, vector<8x8xf32>, vector<8x8xf32> -> vector<8x8xf32>
      %316 = arith.addf %314, %315 : vector<8x8xf32>
      %c3_211 = arith.constant 3 : index
      %c0_212 = arith.constant 0 : index
      %c0_213 = arith.constant 0 : index
      %317 = vector.load %arg11[%c3_211, %c0_212, %c0_213] : memref<4x8x8xf32, #tpu.memory_space<vmem>>, vector<1x8x8xf32>
      %318 = vector.shape_cast %317 : vector<1x8x8xf32> to vector<8x8xf32>
      %319 = vector.shape_cast %316 : vector<8x8xf32> to vector<1x8x8xf32>
      tpu.vector_store %arg11[%c3_211, %c0_212, %c0_213], %319 {strides = array<i32>} : memref<4x8x8xf32, #tpu.memory_space<vmem>>, vector<1x8x8xf32>,
      %c3_214 = arith.constant 3 : index
      %c0_215 = arith.constant 0 : index
      %c0_216 = arith.constant 0 : index
      %320 = vector.load %arg13[%c3_214, %c0_215, %c0_216] : memref<4x8x1xf32, #tpu.memory_space<vmem>>, vector<1x8x1xf32>
      %321 = vector.shape_cast %320 : vector<1x8x1xf32> to vector<8x1xf32>
      %322 = vector.shape_cast %296 : vector<8x1xf32> to vector<1x8x1xf32>
      tpu.vector_store %arg13[%c3_214, %c0_215, %c0_216], %322 {strides = array<i32>} : memref<4x8x1xf32, #tpu.memory_space<vmem>>, vector<1x8x1xf32>,
      %c0_217 = arith.constant 0 : index
      %323 = memref.load %arg4[%c0_217] : memref<2xf32, #tpu.memory_space<smem>>
      %c1_218 = arith.constant 1 : index
      %324 = memref.load %arg4[%c1_218] : memref<2xf32, #tpu.memory_space<smem>>
      %c0_219 = arith.constant 0 : index
      %c0_220 = arith.constant 0 : index
      %325 = vector.load %arg8[%c0_219, %c0_220] : memref<1x8xf32, #tpu.memory_space<vmem>>, vector<1x8xf32>
      %c0_221 = arith.constant 0 : index
      %c0_222 = arith.constant 0 : index
      %c0_223 = arith.constant 0 : index
      %326 = vector.load %arg10[%c0_221, %c0_222, %c0_223] : memref<4x8x8xf32, #tpu.memory_space<vmem>>, vector<1x8x8xf32>
      %327 = vector.shape_cast %326 : vector<1x8x8xf32> to vector<8x8xf32>
      %c0_224 = arith.constant 0 : index
      %c0_225 = arith.constant 0 : index
      %c0_226 = arith.constant 0 : index
      %328 = vector.load %arg14[%c0_224, %c0_225, %c0_226] : memref<4x8x1xf32, #tpu.memory_space<vmem>>, vector<1x8x1xf32>
      %329 = vector.shape_cast %328 : vector<1x8x1xf32> to vector<8x1xf32>
      %330 = tpu.reciprocal %329 {approx = true} : vector<8x1xf32> -> vector<8x1xf32>
      %331 = vector.broadcast %330 : vector<8x1xf32> to vector<8x8xf32>
      %332 = arith.mulf %327, %331 : vector<8x8xf32>
      %c0_227 = arith.constant 0 : index
      %c0_228 = arith.constant 0 : index
      %c0_229 = arith.constant 0 : index
      %333 = vector.load %arg11[%c0_227, %c0_228, %c0_229] : memref<4x8x8xf32, #tpu.memory_space<vmem>>, vector<1x8x8xf32>
      %334 = vector.shape_cast %333 : vector<1x8x8xf32> to vector<8x8xf32>
      %c0_230 = arith.constant 0 : index
      %c0_231 = arith.constant 0 : index
      %c0_232 = arith.constant 0 : index
      %335 = vector.load %arg15[%c0_230, %c0_231, %c0_232] : memref<4x8x1xf32, #tpu.memory_space<vmem>>, vector<1x8x1xf32>
      %336 = vector.shape_cast %335 : vector<1x8x1xf32> to vector<8x1xf32>
      %337 = tpu.reciprocal %336 {approx = true} : vector<8x1xf32> -> vector<8x1xf32>
      %338 = vector.broadcast %337 : vector<8x1xf32> to vector<8x8xf32>
      %339 = arith.mulf %334, %338 : vector<8x8xf32>
      %340 = vector.broadcast %323 : f32 to vector<8x8xf32>
      %341 = arith.mulf %340, %339 : vector<8x8xf32>
      %342 = arith.subf %332, %341 : vector<8x8xf32>
      %343 = arith.mulf %342, %342 : vector<8x8xf32>
      %cst_233 = arith.constant dense<0.000000e+00> : vector<8xf32>
      %344 = vector.multi_reduction <add>, %343, %cst_233 [1] : vector<8x8xf32> to vector<8xf32>
      %345 = vector.shape_cast %344 : vector<8xf32> to vector<8x1xf32>
      %cst_234 = arith.constant 8.000000e+00 : f32
      %346 = vector.broadcast %cst_234 : f32 to vector<8x1xf32>
      %347 = arith.divf %345, %346 : vector<8x1xf32>
      %cst_235 = arith.constant 9.99999974E-6 : f32
      %348 = vector.broadcast %cst_235 : f32 to vector<8x1xf32>
      %349 = arith.addf %347, %348 : vector<8x1xf32>
      %350 = math.rsqrt %349 : vector<8x1xf32>
      %351 = vector.broadcast %350 : vector<8x1xf32> to vector<8x8xf32>
      %352 = arith.mulf %342, %351 : vector<8x8xf32>
      %353 = vector.broadcast %325 : vector<1x8xf32> to vector<8x8xf32>
      %354 = arith.mulf %352, %353 : vector<8x8xf32>
      %355 = vector.broadcast %324 : f32 to vector<8x8xf32>
      %356 = arith.mulf %354, %355 : vector<8x8xf32>
      %c1_236 = arith.constant 1 : index
      %c0_237 = arith.constant 0 : index
      %c0_238 = arith.constant 0 : index
      %357 = vector.load %arg10[%c1_236, %c0_237, %c0_238] : memref<4x8x8xf32, #tpu.memory_space<vmem>>, vector<1x8x8xf32>
      %358 = vector.shape_cast %357 : vector<1x8x8xf32> to vector<8x8xf32>
      %c1_239 = arith.constant 1 : index
      %c0_240 = arith.constant 0 : index
      %c0_241 = arith.constant 0 : index
      %359 = vector.load %arg14[%c1_239, %c0_240, %c0_241] : memref<4x8x1xf32, #tpu.memory_space<vmem>>, vector<1x8x1xf32>
      %360 = vector.shape_cast %359 : vector<1x8x1xf32> to vector<8x1xf32>
      %361 = tpu.reciprocal %360 {approx = true} : vector<8x1xf32> -> vector<8x1xf32>
      %362 = vector.broadcast %361 : vector<8x1xf32> to vector<8x8xf32>
      %363 = arith.mulf %358, %362 : vector<8x8xf32>
      %c1_242 = arith.constant 1 : index
      %c0_243 = arith.constant 0 : index
      %c0_244 = arith.constant 0 : index
      %364 = vector.load %arg11[%c1_242, %c0_243, %c0_244] : memref<4x8x8xf32, #tpu.memory_space<vmem>>, vector<1x8x8xf32>
      %365 = vector.shape_cast %364 : vector<1x8x8xf32> to vector<8x8xf32>
      %c1_245 = arith.constant 1 : index
      %c0_246 = arith.constant 0 : index
      %c0_247 = arith.constant 0 : index
      %366 = vector.load %arg15[%c1_245, %c0_246, %c0_247] : memref<4x8x1xf32, #tpu.memory_space<vmem>>, vector<1x8x1xf32>
      %367 = vector.shape_cast %366 : vector<1x8x1xf32> to vector<8x1xf32>
      %368 = tpu.reciprocal %367 {approx = true} : vector<8x1xf32> -> vector<8x1xf32>
      %369 = vector.broadcast %368 : vector<8x1xf32> to vector<8x8xf32>
      %370 = arith.mulf %365, %369 : vector<8x8xf32>
      %371 = vector.broadcast %323 : f32 to vector<8x8xf32>
      %372 = arith.mulf %371, %370 : vector<8x8xf32>
      %373 = arith.subf %363, %372 : vector<8x8xf32>
      %374 = arith.mulf %373, %373 : vector<8x8xf32>
      %cst_248 = arith.constant dense<0.000000e+00> : vector<8xf32>
      %375 = vector.multi_reduction <add>, %374, %cst_248 [1] : vector<8x8xf32> to vector<8xf32>
      %376 = vector.shape_cast %375 : vector<8xf32> to vector<8x1xf32>
      %cst_249 = arith.constant 8.000000e+00 : f32
      %377 = vector.broadcast %cst_249 : f32 to vector<8x1xf32>
      %378 = arith.divf %376, %377 : vector<8x1xf32>
      %cst_250 = arith.constant 9.99999974E-6 : f32
      %379 = vector.broadcast %cst_250 : f32 to vector<8x1xf32>
      %380 = arith.addf %378, %379 : vector<8x1xf32>
      %381 = math.rsqrt %380 : vector<8x1xf32>
      %382 = vector.broadcast %381 : vector<8x1xf32> to vector<8x8xf32>
      %383 = arith.mulf %373, %382 : vector<8x8xf32>
      %384 = vector.broadcast %325 : vector<1x8xf32> to vector<8x8xf32>
      %385 = arith.mulf %383, %384 : vector<8x8xf32>
      %386 = vector.broadcast %324 : f32 to vector<8x8xf32>
      %387 = arith.mulf %385, %386 : vector<8x8xf32>
      %c2_251 = arith.constant 2 : index
      %c0_252 = arith.constant 0 : index
      %c0_253 = arith.constant 0 : index
      %388 = vector.load %arg10[%c2_251, %c0_252, %c0_253] : memref<4x8x8xf32, #tpu.memory_space<vmem>>, vector<1x8x8xf32>
      %389 = vector.shape_cast %388 : vector<1x8x8xf32> to vector<8x8xf32>
      %c2_254 = arith.constant 2 : index
      %c0_255 = arith.constant 0 : index
      %c0_256 = arith.constant 0 : index
      %390 = vector.load %arg14[%c2_254, %c0_255, %c0_256] : memref<4x8x1xf32, #tpu.memory_space<vmem>>, vector<1x8x1xf32>
      %391 = vector.shape_cast %390 : vector<1x8x1xf32> to vector<8x1xf32>
      %392 = tpu.reciprocal %391 {approx = true} : vector<8x1xf32> -> vector<8x1xf32>
      %393 = vector.broadcast %392 : vector<8x1xf32> to vector<8x8xf32>
      %394 = arith.mulf %389, %393 : vector<8x8xf32>
      %c2_257 = arith.constant 2 : index
      %c0_258 = arith.constant 0 : index
      %c0_259 = arith.constant 0 : index
      %395 = vector.load %arg11[%c2_257, %c0_258, %c0_259] : memref<4x8x8xf32, #tpu.memory_space<vmem>>, vector<1x8x8xf32>
      %396 = vector.shape_cast %395 : vector<1x8x8xf32> to vector<8x8xf32>
      %c2_260 = arith.constant 2 : index
      %c0_261 = arith.constant 0 : index
      %c0_262 = arith.constant 0 : index
      %397 = vector.load %arg15[%c2_260, %c0_261, %c0_262] : memref<4x8x1xf32, #tpu.memory_space<vmem>>, vector<1x8x1xf32>
      %398 = vector.shape_cast %397 : vector<1x8x1xf32> to vector<8x1xf32>
      %399 = tpu.reciprocal %398 {approx = true} : vector<8x1xf32> -> vector<8x1xf32>
      %400 = vector.broadcast %399 : vector<8x1xf32> to vector<8x8xf32>
      %401 = arith.mulf %396, %400 : vector<8x8xf32>
      %402 = vector.broadcast %323 : f32 to vector<8x8xf32>
      %403 = arith.mulf %402, %401 : vector<8x8xf32>
      %404 = arith.subf %394, %403 : vector<8x8xf32>
      %405 = arith.mulf %404, %404 : vector<8x8xf32>
      %cst_263 = arith.constant dense<0.000000e+00> : vector<8xf32>
      %406 = vector.multi_reduction <add>, %405, %cst_263 [1] : vector<8x8xf32> to vector<8xf32>
      %407 = vector.shape_cast %406 : vector<8xf32> to vector<8x1xf32>
      %cst_264 = arith.constant 8.000000e+00 : f32
      %408 = vector.broadcast %cst_264 : f32 to vector<8x1xf32>
      %409 = arith.divf %407, %408 : vector<8x1xf32>
      %cst_265 = arith.constant 9.99999974E-6 : f32
      %410 = vector.broadcast %cst_265 : f32 to vector<8x1xf32>
      %411 = arith.addf %409, %410 : vector<8x1xf32>
      %412 = math.rsqrt %411 : vector<8x1xf32>
      %413 = vector.broadcast %412 : vector<8x1xf32> to vector<8x8xf32>
      %414 = arith.mulf %404, %413 : vector<8x8xf32>
      %415 = vector.broadcast %325 : vector<1x8xf32> to vector<8x8xf32>
      %416 = arith.mulf %414, %415 : vector<8x8xf32>
      %417 = vector.broadcast %324 : f32 to vector<8x8xf32>
      %418 = arith.mulf %416, %417 : vector<8x8xf32>
      %c3_266 = arith.constant 3 : index
      %c0_267 = arith.constant 0 : index
      %c0_268 = arith.constant 0 : index
      %419 = vector.load %arg10[%c3_266, %c0_267, %c0_268] : memref<4x8x8xf32, #tpu.memory_space<vmem>>, vector<1x8x8xf32>
      %420 = vector.shape_cast %419 : vector<1x8x8xf32> to vector<8x8xf32>
      %c3_269 = arith.constant 3 : index
      %c0_270 = arith.constant 0 : index
      %c0_271 = arith.constant 0 : index
      %421 = vector.load %arg14[%c3_269, %c0_270, %c0_271] : memref<4x8x1xf32, #tpu.memory_space<vmem>>, vector<1x8x1xf32>
      %422 = vector.shape_cast %421 : vector<1x8x1xf32> to vector<8x1xf32>
      %423 = tpu.reciprocal %422 {approx = true} : vector<8x1xf32> -> vector<8x1xf32>
      %424 = vector.broadcast %423 : vector<8x1xf32> to vector<8x8xf32>
      %425 = arith.mulf %420, %424 : vector<8x8xf32>
      %c3_272 = arith.constant 3 : index
      %c0_273 = arith.constant 0 : index
      %c0_274 = arith.constant 0 : index
      %426 = vector.load %arg11[%c3_272, %c0_273, %c0_274] : memref<4x8x8xf32, #tpu.memory_space<vmem>>, vector<1x8x8xf32>
      %427 = vector.shape_cast %426 : vector<1x8x8xf32> to vector<8x8xf32>
      %c3_275 = arith.constant 3 : index
      %c0_276 = arith.constant 0 : index
      %c0_277 = arith.constant 0 : index
      %428 = vector.load %arg15[%c3_275, %c0_276, %c0_277] : memref<4x8x1xf32, #tpu.memory_space<vmem>>, vector<1x8x1xf32>
      %429 = vector.shape_cast %428 : vector<1x8x1xf32> to vector<8x1xf32>
      %430 = tpu.reciprocal %429 {approx = true} : vector<8x1xf32> -> vector<8x1xf32>
      %431 = vector.broadcast %430 : vector<8x1xf32> to vector<8x8xf32>
      %432 = arith.mulf %427, %431 : vector<8x8xf32>
      %433 = vector.broadcast %323 : f32 to vector<8x8xf32>
      %434 = arith.mulf %433, %432 : vector<8x8xf32>
      %435 = arith.subf %425, %434 : vector<8x8xf32>
      %436 = arith.mulf %435, %435 : vector<8x8xf32>
      %cst_278 = arith.constant dense<0.000000e+00> : vector<8xf32>
      %437 = vector.multi_reduction <add>, %436, %cst_278 [1] : vector<8x8xf32> to vector<8xf32>
      %438 = vector.shape_cast %437 : vector<8xf32> to vector<8x1xf32>
      %cst_279 = arith.constant 8.000000e+00 : f32
      %439 = vector.broadcast %cst_279 : f32 to vector<8x1xf32>
      %440 = arith.divf %438, %439 : vector<8x1xf32>
      %cst_280 = arith.constant 9.99999974E-6 : f32
      %441 = vector.broadcast %cst_280 : f32 to vector<8x1xf32>
      %442 = arith.addf %440, %441 : vector<8x1xf32>
      %443 = math.rsqrt %442 : vector<8x1xf32>
      %444 = vector.broadcast %443 : vector<8x1xf32> to vector<8x8xf32>
      %445 = arith.mulf %435, %444 : vector<8x8xf32>
      %446 = vector.broadcast %325 : vector<1x8xf32> to vector<8x8xf32>
      %447 = arith.mulf %445, %446 : vector<8x8xf32>
      %448 = vector.broadcast %324 : f32 to vector<8x8xf32>
      %449 = arith.mulf %447, %448 : vector<8x8xf32>
      %450 = tpu.concatenate %356, %387, %418, %449 in 1 : vector<8x8xf32>, vector<8x8xf32>, vector<8x8xf32>, vector<8x8xf32> -> vector<8x32xf32>
      %c0_281 = arith.constant 0 : index
      %c0_282 = arith.constant 0 : index
      %c0_283 = arith.constant 0 : index
      %451 = vector.load %arg9[%c0_281, %c0_282, %c0_283] : memref<1x8x32xf32, #tpu.memory_space<vmem>>, vector<1x8x32xf32>
      %452 = vector.shape_cast %451 : vector<1x8x32xf32> to vector<8x32xf32>
      %453 = vector.shape_cast %450 : vector<8x32xf32> to vector<1x8x32xf32>
      tpu.vector_store %arg9[%c0_281, %c0_282, %c0_283], %453 {strides = array<i32>} : memref<1x8x32xf32, #tpu.memory_space<vmem>>, vector<1x8x32xf32>,
    } else {
    }
    return
  }
  func.func @transform_0(%arg0: i32, %arg1: i32, %arg2: memref<1xi32, #tpu.memory_space<smem>>, %arg3: memref<1xi32, #tpu.memory_space<smem>>) -> i32 {
    %c0_i32 = arith.constant 0 : i32
    %c0_i32_0 = arith.constant 0 : i32
    return %c0_i32 : i32
  }
  func.func @transform_1(%arg0: i32, %arg1: i32, %arg2: memref<1xi32, #tpu.memory_space<smem>>, %arg3: memref<1xi32, #tpu.memory_space<smem>>) -> (i32, i32, i32) {
    %0 = arith.index_cast %arg1 : i32 to index
    %1 = memref.load %arg2[%0] : memref<1xi32, #tpu.memory_space<smem>>
    %c0_i32 = arith.constant 0 : i32
    %c0_i32_0 = arith.constant 0 : i32
    return %arg0, %1, %c0_i32 : i32, i32, i32
  }
  func.func @transform_2(%arg0: i32, %arg1: i32, %arg2: memref<1xi32, #tpu.memory_space<smem>>, %arg3: memref<1xi32, #tpu.memory_space<smem>>) -> (i32, i32, i32) {
    %0 = arith.index_cast %arg1 : i32 to index
    %1 = memref.load %arg3[%0] : memref<1xi32, #tpu.memory_space<smem>>
    %c0_i32 = arith.constant 0 : i32
    %c0_i32_0 = arith.constant 0 : i32
    return %arg0, %1, %c0_i32 : i32, i32, i32
  }
  func.func @transform_3(%arg0: i32, %arg1: i32, %arg2: memref<1xi32, #tpu.memory_space<smem>>, %arg3: memref<1xi32, #tpu.memory_space<smem>>) -> (i32, i32, i32) {
    %0 = arith.index_cast %arg1 : i32 to index
    %1 = memref.load %arg3[%0] : memref<1xi32, #tpu.memory_space<smem>>
    %c0_i32 = arith.constant 0 : i32
    %c0_i32_0 = arith.constant 0 : i32
    return %arg0, %1, %c0_i32 : i32, i32, i32
  }
  func.func @transform_4(%arg0: i32, %arg1: i32, %arg2: memref<1xi32, #tpu.memory_space<smem>>, %arg3: memref<1xi32, #tpu.memory_space<smem>>) -> (i32, i32) {
    %c0_i32 = arith.constant 0 : i32
    %c0_i32_0 = arith.constant 0 : i32
    %c0_i32_1 = arith.constant 0 : i32
    return %c0_i32, %c0_i32_0 : i32, i32
  }
  func.func @transform_5(%arg0: i32, %arg1: i32, %arg2: memref<1xi32, #tpu.memory_space<smem>>, %arg3: memref<1xi32, #tpu.memory_space<smem>>) -> (i32, i32, i32) {
    %0 = arith.index_cast %arg1 : i32 to index
    %1 = memref.load %arg2[%0] : memref<1xi32, #tpu.memory_space<smem>>
    %c0_i32 = arith.constant 0 : i32
    %c0_i32_0 = arith.constant 0 : i32
    return %arg0, %1, %c0_i32 : i32, i32, i32
  }
}

module attributes {stable_mosaic.version = 11 : i64} {
  func.func @kernel(%arg0: i32, %arg1: i32, %arg2: i32, %arg3: memref<16x32xf32, #tpu.memory_space<vmem>>, %arg4: memref<32x64xf32, #tpu.memory_space<vmem>>, %arg5: memref<1x64xf32, #tpu.memory_space<vmem>>, %arg6: memref<16x64xf32, #tpu.memory_space<vmem>>) attributes {dimension_semantics = [#tpu.dimension_semantics<parallel>, #tpu.dimension_semantics<parallel>, #tpu.dimension_semantics<arbitrary>], iteration_bounds = array<i64: 1, 1, 1>, scalar_prefetch = 0 : i64, scratch_operands = 0 : i64, tpu.core_type = #tpu.core_type<tc>, window_params = [{transform_indices = @transform_0, window_bounds = array<i64: 16, 32>}, {transform_indices = @transform_1, window_bounds = array<i64: 32, 64>}, {transform_indices = @transform_2, window_bounds = array<i64: 1, 64>}, {transform_indices = @transform_3, window_bounds = array<i64: 16, 64>}]} {
    %c0 = arith.constant 0 : index
    %c0_0 = arith.constant 0 : index
    %0 = vector.load %arg3[%c0, %c0_0] : memref<16x32xf32, #tpu.memory_space<vmem>>, vector<16x32xf32>
    %c0_1 = arith.constant 0 : index
    %c0_2 = arith.constant 0 : index
    %1 = vector.load %arg4[%c0_1, %c0_2] : memref<32x64xf32, #tpu.memory_space<vmem>>, vector<32x64xf32>
    %cst = arith.constant dense<0.000000e+00> : vector<16x64xf32>
    %2 = tpu.matmul %0, %1, %cst {dimension_numbers = #tpu.dot_dimension_numbers<[1], [0], [0], [1], [0, 0, 1, 1], [], []>} : vector<16x32xf32>, vector<32x64xf32>, vector<16x64xf32> -> vector<16x64xf32>
    %c0_i32 = arith.constant 0 : i32
    %3 = arith.cmpi eq, %arg2, %c0_i32 : i32
    %4 = arith.extui %3 : i1 to i32
    %c0_i32_3 = arith.constant 0 : i32
    %5 = arith.cmpi ne, %4, %c0_i32_3 : i32
    scf.if %5 {
      %c0_8 = arith.constant 0 : index
      %c0_9 = arith.constant 0 : index
      %12 = vector.load %arg6[%c0_8, %c0_9] : memref<16x64xf32, #tpu.memory_space<vmem>>, vector<16x64xf32>
      tpu.vector_store %arg6[%c0_8, %c0_9], %2 {strides = array<i32>} : memref<16x64xf32, #tpu.memory_space<vmem>>, vector<16x64xf32>,
    } else {
    }
    %c0_i32_4 = arith.constant 0 : i32
    %6 = arith.cmpi sgt, %arg2, %c0_i32_4 : i32
    %7 = arith.extui %6 : i1 to i32
    %c0_i32_5 = arith.constant 0 : i32
    %8 = arith.cmpi ne, %7, %c0_i32_5 : i32
    scf.if %8 {
      %c0_8 = arith.constant 0 : index
      %c0_9 = arith.constant 0 : index
      %12 = vector.load %arg6[%c0_8, %c0_9] : memref<16x64xf32, #tpu.memory_space<vmem>>, vector<16x64xf32>
      %13 = arith.addf %12, %2 : vector<16x64xf32>
      %c0_10 = arith.constant 0 : index
      %c0_11 = arith.constant 0 : index
      %14 = vector.load %arg6[%c0_10, %c0_11] : memref<16x64xf32, #tpu.memory_space<vmem>>, vector<16x64xf32>
      tpu.vector_store %arg6[%c0_10, %c0_11], %13 {strides = array<i32>} : memref<16x64xf32, #tpu.memory_space<vmem>>, vector<16x64xf32>,
    } else {
    }
    %c0_i32_6 = arith.constant 0 : i32
    %9 = arith.cmpi eq, %arg2, %c0_i32_6 : i32
    %10 = arith.extui %9 : i1 to i32
    %c0_i32_7 = arith.constant 0 : i32
    %11 = arith.cmpi ne, %10, %c0_i32_7 : i32
    scf.if %11 {
      %c0_8 = arith.constant 0 : index
      %c0_9 = arith.constant 0 : index
      %12 = vector.load %arg6[%c0_8, %c0_9] : memref<16x64xf32, #tpu.memory_space<vmem>>, vector<16x64xf32>
      %c0_10 = arith.constant 0 : index
      %c0_11 = arith.constant 0 : index
      %13 = vector.load %arg5[%c0_10, %c0_11] : memref<1x64xf32, #tpu.memory_space<vmem>>, vector<1x64xf32>
      %14 = vector.broadcast %13 : vector<1x64xf32> to vector<16x64xf32>
      %15 = arith.addf %12, %14 : vector<16x64xf32>
      %cst_12 = arith.constant 0.000000e+00 : f32
      %16 = vector.broadcast %cst_12 : f32 to vector<16x64xf32>
      %17 = arith.maximumf %15, %16 : vector<16x64xf32>
      %c0_13 = arith.constant 0 : index
      %c0_14 = arith.constant 0 : index
      %18 = vector.load %arg6[%c0_13, %c0_14] : memref<16x64xf32, #tpu.memory_space<vmem>>, vector<16x64xf32>
      tpu.vector_store %arg6[%c0_13, %c0_14], %17 {strides = array<i32>} : memref<16x64xf32, #tpu.memory_space<vmem>>, vector<16x64xf32>,
    } else {
    }
    return
  }
  func.func @transform_0(%arg0: i32, %arg1: i32, %arg2: i32) -> (i32, i32) {
    %c0_i32 = arith.constant 0 : i32
    return %arg0, %arg2 : i32, i32
  }
  func.func @transform_1(%arg0: i32, %arg1: i32, %arg2: i32) -> (i32, i32) {
    %c0_i32 = arith.constant 0 : i32
    return %arg2, %arg1 : i32, i32
  }
  func.func @transform_2(%arg0: i32, %arg1: i32, %arg2: i32) -> (i32, i32) {
    %c0_i32 = arith.constant 0 : i32
    %c0_i32_0 = arith.constant 0 : i32
    return %c0_i32, %arg1 : i32, i32
  }
  func.func @transform_3(%arg0: i32, %arg1: i32, %arg2: i32) -> (i32, i32) {
    %c0_i32 = arith.constant 0 : i32
    return %arg0, %arg1 : i32, i32
  }
}

module attributes {stable_mosaic.version = 11 : i64} {
  func.func @kernel(%arg0: i32, %arg1: i32, %arg2: i32, %arg3: memref<16x64xf32, #tpu.memory_space<vmem>>, %arg4: memref<64x32xf32, #tpu.memory_space<vmem>>, %arg5: memref<1x32xf32, #tpu.memory_space<vmem>>, %arg6: memref<16x32xf32, #tpu.memory_space<vmem>>, %arg7: memref<16x32xf32, #tpu.memory_space<vmem>>) attributes {dimension_semantics = [#tpu.dimension_semantics<parallel>, #tpu.dimension_semantics<parallel>, #tpu.dimension_semantics<arbitrary>], iteration_bounds = array<i64: 1, 1, 1>, scalar_prefetch = 0 : i64, scratch_operands = 0 : i64, tpu.core_type = #tpu.core_type<tc>, window_params = [{transform_indices = @transform_0, window_bounds = array<i64: 16, 64>}, {transform_indices = @transform_1, window_bounds = array<i64: 64, 32>}, {transform_indices = @transform_2, window_bounds = array<i64: 1, 32>}, {transform_indices = @transform_3, window_bounds = array<i64: 16, 32>}, {transform_indices = @transform_4, window_bounds = array<i64: 16, 32>}]} {
    %c0 = arith.constant 0 : index
    %c0_0 = arith.constant 0 : index
    %0 = vector.load %arg3[%c0, %c0_0] : memref<16x64xf32, #tpu.memory_space<vmem>>, vector<16x64xf32>
    %c0_1 = arith.constant 0 : index
    %c0_2 = arith.constant 0 : index
    %1 = vector.load %arg4[%c0_1, %c0_2] : memref<64x32xf32, #tpu.memory_space<vmem>>, vector<64x32xf32>
    %cst = arith.constant dense<0.000000e+00> : vector<16x32xf32>
    %2 = tpu.matmul %0, %1, %cst {dimension_numbers = #tpu.dot_dimension_numbers<[1], [0], [0], [1], [0, 0, 1, 1], [], []>} : vector<16x64xf32>, vector<64x32xf32>, vector<16x32xf32> -> vector<16x32xf32>
    %c0_i32 = arith.constant 0 : i32
    %3 = arith.cmpi eq, %arg2, %c0_i32 : i32
    %4 = arith.extui %3 : i1 to i32
    %c0_i32_3 = arith.constant 0 : i32
    %5 = arith.cmpi ne, %4, %c0_i32_3 : i32
    scf.if %5 {
      %c0_8 = arith.constant 0 : index
      %c0_9 = arith.constant 0 : index
      %12 = vector.load %arg7[%c0_8, %c0_9] : memref<16x32xf32, #tpu.memory_space<vmem>>, vector<16x32xf32>
      tpu.vector_store %arg7[%c0_8, %c0_9], %2 {strides = array<i32>} : memref<16x32xf32, #tpu.memory_space<vmem>>, vector<16x32xf32>,
    } else {
    }
    %c0_i32_4 = arith.constant 0 : i32
    %6 = arith.cmpi sgt, %arg2, %c0_i32_4 : i32
    %7 = arith.extui %6 : i1 to i32
    %c0_i32_5 = arith.constant 0 : i32
    %8 = arith.cmpi ne, %7, %c0_i32_5 : i32
    scf.if %8 {
      %c0_8 = arith.constant 0 : index
      %c0_9 = arith.constant 0 : index
      %12 = vector.load %arg7[%c0_8, %c0_9] : memref<16x32xf32, #tpu.memory_space<vmem>>, vector<16x32xf32>
      %13 = arith.addf %12, %2 : vector<16x32xf32>
      %c0_10 = arith.constant 0 : index
      %c0_11 = arith.constant 0 : index
      %14 = vector.load %arg7[%c0_10, %c0_11] : memref<16x32xf32, #tpu.memory_space<vmem>>, vector<16x32xf32>
      tpu.vector_store %arg7[%c0_10, %c0_11], %13 {strides = array<i32>} : memref<16x32xf32, #tpu.memory_space<vmem>>, vector<16x32xf32>,
    } else {
    }
    %c0_i32_6 = arith.constant 0 : i32
    %9 = arith.cmpi eq, %arg2, %c0_i32_6 : i32
    %10 = arith.extui %9 : i1 to i32
    %c0_i32_7 = arith.constant 0 : i32
    %11 = arith.cmpi ne, %10, %c0_i32_7 : i32
    scf.if %11 {
      %c0_8 = arith.constant 0 : index
      %c0_9 = arith.constant 0 : index
      %12 = vector.load %arg7[%c0_8, %c0_9] : memref<16x32xf32, #tpu.memory_space<vmem>>, vector<16x32xf32>
      %c0_10 = arith.constant 0 : index
      %c0_11 = arith.constant 0 : index
      %13 = vector.load %arg5[%c0_10, %c0_11] : memref<1x32xf32, #tpu.memory_space<vmem>>, vector<1x32xf32>
      %14 = vector.broadcast %13 : vector<1x32xf32> to vector<16x32xf32>
      %15 = arith.addf %12, %14 : vector<16x32xf32>
      %c0_12 = arith.constant 0 : index
      %c0_13 = arith.constant 0 : index
      %16 = vector.load %arg6[%c0_12, %c0_13] : memref<16x32xf32, #tpu.memory_space<vmem>>, vector<16x32xf32>
      %17 = arith.addf %15, %16 : vector<16x32xf32>
      %c0_14 = arith.constant 0 : index
      %c0_15 = arith.constant 0 : index
      %18 = vector.load %arg7[%c0_14, %c0_15] : memref<16x32xf32, #tpu.memory_space<vmem>>, vector<16x32xf32>
      tpu.vector_store %arg7[%c0_14, %c0_15], %17 {strides = array<i32>} : memref<16x32xf32, #tpu.memory_space<vmem>>, vector<16x32xf32>,
    } else {
    }
    return
  }
  func.func @transform_0(%arg0: i32, %arg1: i32, %arg2: i32) -> (i32, i32) {
    %c0_i32 = arith.constant 0 : i32
    return %arg0, %arg2 : i32, i32
  }
  func.func @transform_1(%arg0: i32, %arg1: i32, %arg2: i32) -> (i32, i32) {
    %c0_i32 = arith.constant 0 : i32
    return %arg2, %arg1 : i32, i32
  }
  func.func @transform_2(%arg0: i32, %arg1: i32, %arg2: i32) -> (i32, i32) {
    %c0_i32 = arith.constant 0 : i32
    %c0_i32_0 = arith.constant 0 : i32
    return %c0_i32, %arg1 : i32, i32
  }
  func.func @transform_3(%arg0: i32, %arg1: i32, %arg2: i32) -> (i32, i32) {
    %c0_i32 = arith.constant 0 : i32
    return %arg0, %arg1 : i32, i32
  }
  func.func @transform_4(%arg0: i32, %arg1: i32, %arg2: i32) -> (i32, i32) {
    %c0_i32 = arith.constant 0 : i32
    return %arg0, %arg1 : i32, i32
  }
}

</mosaic_0001>

<bundles_post_ra>
// kernel: tile.28
= control target key start
LH: loop header
LB: loop body
LE: loop exit
PB: predicated region body
PF: predicated region fallthrough
CT: control target
= control target key end

     0   :  { %s22_s0 = inlined_call_operand.vmem [shape: f32[2], index: 0, kind: input, shape index: {}]   ;;  %s23_s1 = inlined_call_operand.vmem [shape: f32[2,2], index: 1, kind: output, shape index: {}]  }
   0x1   :  { %v4_v0 = vld [vmem:[%s22_s0] ss:$0 sm:$0xff] }
   0x2   :  { %5 = vst [vmem:[%s23_s1] sm:$0x3] %v4_v0 }

// kernel: _lambda_.16
= control target key start
LH: loop header
LB: loop body
LE: loop exit
PB: predicated region body
PF: predicated region fallthrough
CT: control target
= control target key end

     0   :  { %7 = vsyncpa [#allocation3], 0  ;;  %s333_s0 = inlined_call_operand.hbm [shape: f32[16,32], index: 0, kind: input, shape index: {}]   ;;  %s334_s1 = inlined_call_operand.hbm [shape: f32[32,96], index: 1, kind: input, shape index: {}]   ;;  %s335_s2 = inlined_call_operand.hbm [shape: f32[16,96], index: 2, kind: output, shape index: {}]  }
   0x1   :  { %8 = vsyncpa [#allocation6], 0 }
   0x2   :  { %9 = vsyncpa [#allocation4], 0  ;;  %s268_s9 = smov [#allocation2]   ;;  %s196_s13 = scalar_lea.hbm %s333_s0, 256 }
   0x3   :  { %s15_s10 = sshll.u32 %s268_s9, 4  ;;  %p197_p0 = scmp.ne.s32.totalorder %s333_s0, %s196_s13  ;;  %s16_s10 = int_to_ptr.vmem [resolvable:$true] %s15_s10 }
   0x4   :  { %p200_p1 = scmp.lt.u32.totalorder %s196_s13, %s333_s0 }
   0x6   :  { %p202_p2 = pnand %p200_p1, %p197_p0 }
   0x8   :  { %205 = shalt.err (!%p202_p2)
}
   0x9   :  { %s206_s18 = scalar_lea.vmem %s16_s10, 256  ;;  %p211_p4 = scmp.lt.s32.totalorder %s16_s10, %s16_s10 }
   0xa   :  { %p207_p3 = scmp.ne.s32.totalorder %s16_s10, %s206_s18  ;;  %p212_p5 = scmp.lt.s32.totalorder %s206_s18, %s206_s18 }
   0xc   :  { %p213_p6 = por %p212_p5, %p211_p4 }
   0xe   :  { %p214_p7 = pnand %p213_p6, %p207_p3 }
  0x10   :  { %217 = shalt.err (!%p214_p7)
}
  0x11   :  { %s269_s19 = smov 128   ;;  %s270_s20 = smov 8  }
  0x12   :  { %21 = dma.hbm_to_vmem [thread:$0]  %s333_s0, 256, %s16_s10, [#allocation3], %s269_s19, %s269_s19, %s270_s20  }
  0x13   :  { %s271_s23 = smov [#allocation5]   ;;  %s218_s27 = scalar_lea.hbm %s334_s1, 512 }
  0x14   :  { %s27_s24 = sshll.u32 %s271_s23, 4  ;;  %p219_p8 = scmp.ne.s32.totalorder %s334_s1, %s218_s27  ;;  %s28_s24 = int_to_ptr.vmem [resolvable:$true] %s27_s24 }
  0x15   :  { %p222_p9 = scmp.lt.u32.totalorder %s218_s27, %s334_s1 }
  0x17   :  { %p224_p10 = pnand %p222_p9, %p219_p8 }
  0x19   :  { %227 = shalt.err (!%p224_p10)
}
  0x1a   :  { %s228_s4 = scalar_lea.vmem %s28_s24, 512  ;;  %p233_p12 = scmp.lt.s32.totalorder %s28_s24, %s28_s24 }
  0x1b   :  { %p229_p11 = scmp.ne.s32.totalorder %s28_s24, %s228_s4  ;;  %p234_p13 = scmp.lt.s32.totalorder %s228_s4, %s228_s4 }
  0x1d   :  { %p235_p0 = por %p234_p13, %p233_p12 }
  0x1f   :  { %p236_p1 = pnand %p235_p0, %p229_p11 }
  0x21   :  { %239 = shalt.err (!%p236_p1)
}
  0x22   :  { %33 = dma.hbm_to_vmem [thread:$0]  %s334_s1, 512, %s28_s24, [#allocation6], %s269_s19, %s269_s19, %s270_s20  }
  0x23   :  { %262 = dma.done.wait [#allocation3], 256  }
  0x24   :  { %263 = vsyncadd [#allocation3], 4294967040 }
  0x25   :  { %264 = dma.done.wait [#allocation6], 512  }
  0x26   :  { %265 = vsyncadd [#allocation6], 4294966784  ;;  %vm46_vm0 = vcmask 261120   ;;  %v42_v0 = vld [vmem:[#allocation5] sm:$0xff]  ;;  %v43_v1 = vld [vmem:[#allocation5 + $0x8] sm:$0xff]  ;;  %s272_s1 = smov [#allocation7]  }
  0x27   :  { %v44_v2 = vld [vmem:[#allocation5 + $0x10] sm:$0xff]  ;;  %v183_v3 = vpack.c.bf16 %v43_v1, %v42_v0  ;;  %v45_v4 = vld [vmem:[#allocation5 + $0x18] sm:$0xff]  ;;  %s151_s6 = sshll.u32 %s272_s1, 4  ;;  %vm132_vm1 = vcmask 785408   ;;  %s152_s6 = int_to_ptr.vmem [resolvable:$true] %s151_s6 }
  0x28   :  { %v40_v5 = vld [vmem:[#allocation2] sm:$0xff]  ;;  %v187_v6 = vpack.c.bf16 %v45_v4, %v44_v2  ;;  %v41_v7 = vld [vmem:[#allocation2 + $0x8] sm:$0xff]  ;;  %s240_s7 = scalar_lea.vmem %s152_s6, 256  ;;  %p245_p3 = scmp.lt.s32.totalorder %s152_s6, %s152_s6 }
  0x29   :  { %180 = vmatprep.mubr.msk.f32.mxu0 %vm46_vm0, %v40_v5  ;;  %184 = vmatprep.subr.bf16.mxu0 %v183_v3  ;;  %p241_p2 = scmp.ne.s32.totalorder %s152_s6, %s240_s7  ;;  %p246_p4 = scmp.lt.s32.totalorder %s240_s7, %s240_s7 }
  0x2a   :  { %186 = vmatpush3.bf16.msra.mxu0 %v183_v3 }
  0x2b   :  { %188 = vmatprep.subr.bf16.mxu0 %v187_v6  ;;  %p247_p5 = por %p246_p4, %p245_p3 }
  0x2d   :  { %p248_p6 = pnand %p247_p5, %p241_p2 }
  0x2e   :  { %190 = vmatpush3.bf16.msra.mxu0 %v187_v6 }
  0x31   :  { %181 = vmatmul.mubr.msk.f32.vlgmr.msra.gmra.mrb[0].mxu0 %vm46_vm0, %v41_v7 }
 0x104   :  { %v182_v8 = vpop.f32.mrb[0].mxu0 }
 0x105   :  { %134 = vst.msk [vmem:[#allocation7 + $0x8] sm:$0xff] %vm132_vm1, %v182_v8  ;;  %v119_v9 = vpop.f32.mrb[1].mxu0 }
 0x106   :  { %133 = vst.msk [vmem:[#allocation7] sm:$0xff] %vm132_vm1, %v119_v9 }
 0x107   :  { %251 = shalt.err (!%p248_p6)
}
 0x108   :  { %s252_s10 = scalar_lea.hbm %s335_s2, 256 }
 0x109   :  { %p253_p7 = scmp.ne.s32.totalorder %s335_s2, %s252_s10  ;;  %p256_p8 = scmp.lt.u32.totalorder %s252_s10, %s335_s2 }
 0x10b   :  { %p258_p9 = pnand %p256_p8, %p253_p7 }
 0x10d   :  { %261 = shalt.err (!%p258_p9)
}
 0x10e   :  { %157 = dma.vmem_to_hbm [thread:$0]  %s152_s6, 256, %s335_s2, [#allocation4], %s269_s19, %s269_s19, %s270_s20  }
 0x10f   :  { %266 = dma.done.wait [#allocation4], 256  }
 0x110   :  { %267 = vsyncadd [#allocation4], 4294967040 }
 0x111   :  { %161 = vsyncpa [#allocation3], 1 }
 0x112   :  { %162 = vsyncpa [#allocation6], 1 }
 0x113   :  { %163 = vsyncpa [#allocation4], 1 }

// kernel: _lambda_.15
= control target key start
LH: loop header
LB: loop body
LE: loop exit
PB: predicated region body
PF: predicated region fallthrough
CT: control target
= control target key end

     0   :  { %8 = vsyncpa [#allocation3], 0  ;;  %s319_s0 = inlined_call_operand.hbm [shape: f32[16,32], index: 0, kind: input, shape index: {}]   ;;  %s320_s1 = inlined_call_operand.hbm [shape: f32[1,32], index: 1, kind: input, shape index: {}]   ;;  %s321_s2 = inlined_call_operand.hbm [shape: f32[1,32], index: 2, kind: input, shape index: {}]   ;;  %s322_s3 = inlined_call_operand.hbm [shape: f32[16,32], index: 3, kind: output, shape index: {}]  }
   0x1   :  { %9 = vsyncpa [#allocation6], 0 }
   0x2   :  { %10 = vsyncpa [#allocation4], 0  ;;  %s226_s12 = smov [#allocation5]   ;;  %s227_s14 = smov [#allocation2]  }
   0x3   :  { %s29_s13 = sshll.u32 %s226_s12, 4  ;;  %s16_s15 = sshll.u32 %s227_s14, 4  ;;  %s30_s13 = int_to_ptr.vmem [resolvable:$true] %s29_s13  ;;  %s252_s15 = int_to_ptr.vmem [resolvable:$true] %s16_s15 }
   0x4   :  { %s132_s18 = scalar_lea.hbm %s320_s1, 16 }
   0x5   :  { %p133_p0 = scmp.ne.s32.totalorder %s320_s1, %s132_s18  ;;  %p136_p1 = scmp.lt.u32.totalorder %s132_s18, %s320_s1 }
   0x7   :  { %p138_p2 = pnand %p136_p1, %p133_p0 }
   0x9   :  { %141 = shalt.err (!%p138_p2)
}
   0xa   :  { %s142_s23 = scalar_lea.vmem %s30_s13, 16  ;;  %s146_s24 = scalar_lea.vmem %s30_s13, 32 }
   0xb   :  { %p143_p3 = scmp.ne.s32.totalorder %s30_s13, %s142_s23  ;;  %p147_p4 = scmp.lt.s32.totalorder %s30_s13, %s30_s13 }
   0xc   :  { %p148_p5 = scmp.lt.s32.totalorder %s146_s24, %s142_s23 }
   0xe   :  { %p149_p6 = por %p148_p5, %p147_p4 }
  0x10   :  { %p150_p7 = pnand %p149_p6, %p143_p3 }
  0x12   :  { %153 = shalt.err (!%p150_p7)
}
  0x13   :  { %32 = dma.hbm_to_vmem [thread:$0]  %s320_s1, 16, %s30_s13, [#allocation6]  }
  0x14   :  { %s154_s29 = scalar_lea.hbm %s319_s0, 256 }
  0x15   :  { %p155_p8 = scmp.ne.s32.totalorder %s319_s0, %s154_s29  ;;  %p158_p9 = scmp.lt.u32.totalorder %s154_s29, %s319_s0 }
  0x17   :  { %p160_p10 = pnand %p158_p9, %p155_p8 }
  0x19   :  { %163 = shalt.err (!%p160_p10)
}
  0x1a   :  { %s164_s7 = scalar_lea.vmem %s252_s15, 256  ;;  %p169_p12 = scmp.lt.s32.totalorder %s252_s15, %s252_s15 }
  0x1b   :  { %p165_p11 = scmp.ne.s32.totalorder %s252_s15, %s164_s7  ;;  %p170_p13 = scmp.lt.s32.totalorder %s164_s7, %s164_s7 }
  0x1d   :  { %p171_p0 = por %p170_p13, %p169_p12 }
  0x1f   :  { %p172_p1 = pnand %p171_p0, %p165_p11 }
  0x21   :  { %175 = shalt.err (!%p172_p1)
}
  0x22   :  { %s228_s1 = smov 128   ;;  %s229_s8 = smov 8  }
  0x23   :  { %22 = dma.hbm_to_vmem [thread:$0]  %s319_s0, 256, %s252_s15, [#allocation3], %s228_s1, %s228_s1, %s229_s8  }
  0x24   :  { %s230_s11 = smov [#allocation7]   ;;  %s176_s16 = scalar_lea.hbm %s321_s2, 16 }
  0x25   :  { %s39_s12 = sshll.u32 %s230_s11, 4  ;;  %p177_p2 = scmp.ne.s32.totalorder %s321_s2, %s176_s16  ;;  %s40_s12 = int_to_ptr.vmem [resolvable:$true] %s39_s12 }
  0x26   :  { %p180_p3 = scmp.lt.u32.totalorder %s176_s16, %s321_s2 }
  0x28   :  { %p182_p4 = pnand %p180_p3, %p177_p2 }
  0x2a   :  { %185 = shalt.err (!%p182_p4)
}
  0x2b   :  { %s186_s21 = scalar_lea.vmem %s40_s12, 16  ;;  %s190_s0 = scalar_lea.vmem %s40_s12, 32 }
  0x2c   :  { %p187_p5 = scmp.ne.s32.totalorder %s40_s12, %s186_s21  ;;  %p191_p6 = scmp.lt.s32.totalorder %s40_s12, %s40_s12 }
  0x2d   :  { %p192_p7 = scmp.lt.s32.totalorder %s190_s0, %s186_s21 }
  0x2f   :  { %p193_p8 = por %p192_p7, %p191_p6 }
  0x31   :  { %p194_p9 = pnand %p193_p8, %p187_p5 }
  0x33   :  { %197 = shalt.err (!%p194_p9)
}
  0x34   :  { %42 = dma.hbm_to_vmem [thread:$0]  %s321_s2, 16, %s40_s12, [#allocation6]  }
  0x35   :  { %220 = dma.done.wait [#allocation3], 256  }
  0x36   :  { %221 = vsyncadd [#allocation3], 4294967040 }
  0x37   :  { %222 = dma.done.wait [#allocation6], 32  }
  0x38   :  { %223 = vsyncadd [#allocation6], 4294967264  ;;  %vm54_vm0 = vcmask 261120   ;;  %v52_v0 = vld [vmem:[#allocation2] sm:$0xff]  ;;  %v53_v1 = vld [vmem:[#allocation2 + $0x8] sm:$0xff]  ;;  %s231_s2 = smov [#allocation8]  }
  0x39   :  { %v55_v2 = vsel %vm54_vm0, %v52_v0, 0.0  ;;  %v58_v3 = vsel %vm54_vm0, %v53_v1, 0.0  ;;  %v120_v21 = vld [vmem:[#allocation5] ss:$0 sm:$0xff]  ;;  %v121_v23 = vld [vmem:[#allocation7] ss:$0 sm:$0xff] }
  0x3a   :  { %56 = vadd.xlane.f32.xlu0 %v55_v2  ;;  %s107_s23 = sshll.u32 %s231_s2, 4  ;;  %s108_s23 = int_to_ptr.vmem [resolvable:$true] %s107_s23 }
  0x3b   :  { %s198_s24 = scalar_lea.vmem %s108_s23, 256  ;;  %p203_p11 = scmp.lt.s32.totalorder %s108_s23, %s108_s23 }
  0x3c   :  { %p199_p10 = scmp.ne.s32.totalorder %s108_s23, %s198_s24  ;;  %p204_p12 = scmp.lt.s32.totalorder %s198_s24, %s198_s24 }
  0x3e   :  { %59 = vadd.xlane.f32.xlu0 %v58_v3  ;;  %p205_p13 = por %p204_p12, %p203_p11 }
  0x40   :  { %p206_p0 = pnand %p205_p13, %p199_p10 }
  0xc7   :  { %v57_v4 = vpop.xlane.xlu0 %56 }
  0xc8   :  { %v62_v5 = vmul.f32 0.03125, %v57_v4 }
  0xca   :  { %v64_v6 = vsub.f32 %v52_v0, %v62_v5 }
  0xcb   :  { %v60_v7 = vpop.xlane.xlu0 %59 }
  0xcc   :  { %v63_v8 = vmul.f32 0.03125, %v60_v7  ;;  %v66_v9 = vmul.f32 %v64_v6, %v64_v6 }
  0xce   :  { %v65_v10 = vsub.f32 %v53_v1, %v63_v8  ;;  %v68_v11 = vsel %vm54_vm0, %v66_v9, 0.0 }
  0xcf   :  { %69 = vadd.xlane.f32.xlu1 %v68_v11 }
  0xd0   :  { %v67_v12 = vmul.f32 %v65_v10, %v65_v10 }
  0xd2   :  { %v71_v13 = vsel %vm54_vm0, %v67_v12, 0.0 }
  0xd3   :  { %72 = vadd.xlane.f32.xlu1 %v71_v13 }
 0x15c   :  { %v70_v14 = vpop.xlane.xlu1 %69 }
 0x15d   :  { %v74_v15 = vmul.f32 0.03125, %v70_v14 }
 0x15f   :  { %v76_v16 = vadd.f32 1e-05, %v74_v15 }
 0x160   :  { %v73_v17 = vpop.xlane.xlu1 %72 }
 0x161   :  { %128 = vrsqrt.f32 %v76_v16  ;;  %v75_v18 = vmul.f32 0.03125, %v73_v17 }
 0x163   :  { %v77_v19 = vadd.f32 1e-05, %v75_v18 }
 0x165   :  { %130 = vrsqrt.f32 %v77_v19 }
 0x16b   :  { %v129_v20 = vpop.eup %128 }
 0x16c   :  { %v80_v22 = vmul.f32 %v129_v20, %v64_v6 }
 0x16e   :  { %v89_v24 = vmul.f32 %v120_v21, %v80_v22 }
 0x16f   :  { %v131_v25 = vpop.eup %130 }
 0x170   :  { %v81_v26 = vmul.f32 %v131_v25, %v65_v10  ;;  %v98_v27 = vadd.f32 %v121_v23, %v89_v24 }
 0x172   :  { %v90_v28 = vmul.f32 %v120_v21, %v81_v26  ;;  %100 = vst.msk [vmem:[#allocation8] sm:$0xff] %vm54_vm0, %v98_v27 }
 0x174   :  { %v99_v29 = vadd.f32 %v121_v23, %v90_v28 }
 0x176   :  { %101 = vst.msk [vmem:[#allocation8 + $0x8] sm:$0xff] %vm54_vm0, %v99_v29 }
 0x177   :  { %209 = shalt.err (!%p206_p0)
}
 0x178   :  { %s210_s27 = scalar_lea.hbm %s322_s3, 256 }
 0x179   :  { %p211_p1 = scmp.ne.s32.totalorder %s322_s3, %s210_s27  ;;  %p214_p2 = scmp.lt.u32.totalorder %s210_s27, %s322_s3 }
 0x17b   :  { %p216_p3 = pnand %p214_p2, %p211_p1 }
 0x17d   :  { %219 = shalt.err (!%p216_p3)
}
 0x17e   :  { %113 = dma.vmem_to_hbm [thread:$0]  %s108_s23, 256, %s322_s3, [#allocation4], %s228_s1, %s228_s1, %s229_s8  }
 0x17f   :  { %224 = dma.done.wait [#allocation4], 256  }
 0x180   :  { %225 = vsyncadd [#allocation4], 4294967040 }
 0x181   :  { %117 = vsyncpa [#allocation3], 1 }
 0x182   :  { %118 = vsyncpa [#allocation6], 1 }
 0x183   :  { %119 = vsyncpa [#allocation4], 1 }

// kernel: _lambda_.18
= control target key start
LH: loop header
LB: loop body
LE: loop exit
PB: predicated region body
PF: predicated region fallthrough
CT: control target
= control target key end

     0   :  { %8 = vsyncpa [#allocation3], 0  ;;  %s415_s0 = inlined_call_operand.hbm [shape: f32[16,32], index: 0, kind: input, shape index: {}]   ;;  %s416_s1 = inlined_call_operand.hbm [shape: f32[32,32], index: 1, kind: input, shape index: {}]   ;;  %s417_s2 = inlined_call_operand.hbm [shape: f32[16,32], index: 2, kind: input, shape index: {}]   ;;  %s418_s3 = inlined_call_operand.hbm [shape: f32[16,32], index: 3, kind: output, shape index: {}]  }
   0x1   :  { %9 = vsyncpa [#allocation6], 0 }
   0x2   :  { %10 = vsyncpa [#allocation4], 0  ;;  %s316_s12 = smov [#allocation5]   ;;  %s317_s14 = smov [#allocation2]  }
   0x3   :  { %s28_s13 = sshll.u32 %s316_s12, 4  ;;  %s16_s15 = sshll.u32 %s317_s14, 4  ;;  %s29_s13 = int_to_ptr.vmem [resolvable:$true] %s28_s13  ;;  %s342_s15 = int_to_ptr.vmem [resolvable:$true] %s16_s15 }
   0x4   :  { %s222_s18 = scalar_lea.hbm %s416_s1, 512 }
   0x5   :  { %p223_p0 = scmp.ne.s32.totalorder %s416_s1, %s222_s18  ;;  %p226_p1 = scmp.lt.u32.totalorder %s222_s18, %s416_s1 }
   0x7   :  { %p228_p2 = pnand %p226_p1, %p223_p0 }
   0x9   :  { %231 = shalt.err (!%p228_p2)
}
   0xa   :  { %s232_s23 = scalar_lea.vmem %s29_s13, 512  ;;  %p237_p4 = scmp.lt.s32.totalorder %s29_s13, %s29_s13 }
   0xb   :  { %p233_p3 = scmp.ne.s32.totalorder %s29_s13, %s232_s23  ;;  %p238_p5 = scmp.lt.s32.totalorder %s232_s23, %s232_s23 }
   0xd   :  { %p239_p6 = por %p238_p5, %p237_p4 }
   0xf   :  { %p240_p7 = pnand %p239_p6, %p233_p3 }
  0x11   :  { %243 = shalt.err (!%p240_p7)
}
  0x12   :  { %s318_s24 = smov 128   ;;  %s319_s25 = smov 8  }
  0x13   :  { %34 = dma.hbm_to_vmem [thread:$0]  %s416_s1, 512, %s29_s13, [#allocation6], %s318_s24, %s318_s24, %s319_s25  }
  0x14   :  { %s244_s30 = scalar_lea.hbm %s415_s0, 256 }
  0x15   :  { %p245_p8 = scmp.ne.s32.totalorder %s415_s0, %s244_s30  ;;  %p248_p9 = scmp.lt.u32.totalorder %s244_s30, %s415_s0 }
  0x17   :  { %p250_p10 = pnand %p248_p9, %p245_p8 }
  0x19   :  { %253 = shalt.err (!%p250_p10)
}
  0x1a   :  { %s254_s8 = scalar_lea.vmem %s342_s15, 256  ;;  %p259_p12 = scmp.lt.s32.totalorder %s342_s15, %s342_s15 }
  0x1b   :  { %p255_p11 = scmp.ne.s32.totalorder %s342_s15, %s254_s8  ;;  %p260_p13 = scmp.lt.s32.totalorder %s254_s8, %s254_s8 }
  0x1d   :  { %p261_p0 = por %p260_p13, %p259_p12 }
  0x1f   :  { %p262_p1 = pnand %p261_p0, %p255_p11 }
  0x21   :  { %265 = shalt.err (!%p262_p1)
}
  0x22   :  { %22 = dma.hbm_to_vmem [thread:$0]  %s415_s0, 256, %s342_s15, [#allocation3], %s318_s24, %s318_s24, %s319_s25  }
  0x23   :  { %s320_s10 = smov [#allocation7]   ;;  %s266_s14 = scalar_lea.hbm %s417_s2, 256 }
  0x24   :  { %s40_s11 = sshll.u32 %s320_s10, 4  ;;  %p267_p2 = scmp.ne.s32.totalorder %s417_s2, %s266_s14  ;;  %s41_s11 = int_to_ptr.vmem [resolvable:$true] %s40_s11 }
  0x25   :  { %p270_p3 = scmp.lt.u32.totalorder %s266_s14, %s417_s2 }
  0x27   :  { %p272_p4 = pnand %p270_p3, %p267_p2 }
  0x29   :  { %275 = shalt.err (!%p272_p4)
}
  0x2a   :  { %s276_s20 = scalar_lea.vmem %s41_s11, 256  ;;  %p281_p6 = scmp.lt.s32.totalorder %s41_s11, %s41_s11 }
  0x2b   :  { %p277_p5 = scmp.ne.s32.totalorder %s41_s11, %s276_s20  ;;  %p282_p7 = scmp.lt.s32.totalorder %s276_s20, %s276_s20 }
  0x2d   :  { %p283_p8 = por %p282_p7, %p281_p6 }
  0x2f   :  { %p284_p9 = pnand %p283_p8, %p277_p5 }
  0x31   :  { %287 = shalt.err (!%p284_p9)
}
  0x32   :  { %46 = dma.hbm_to_vmem [thread:$0]  %s417_s2, 256, %s41_s11, [#allocation6], %s318_s24, %s318_s24, %s319_s25  }
  0x33   :  { %310 = dma.done.wait [#allocation3], 256  }
  0x34   :  { %311 = vsyncadd [#allocation3], 4294967040 }
  0x35   :  { %312 = dma.done.wait [#allocation6], 768  }
  0x36   :  { %313 = vsyncadd [#allocation6], 4294966528  ;;  %vm62_vm0 = vcmask 261120   ;;  %v58_v0 = vld [vmem:[#allocation5] sm:$0xff]  ;;  %v59_v1 = vld [vmem:[#allocation5 + $0x8] sm:$0xff]  ;;  %s321_s2 = smov [#allocation8]  }
  0x37   :  { %v60_v2 = vld [vmem:[#allocation5 + $0x10] sm:$0xff]  ;;  %v208_v3 = vpack.c.bf16 %v59_v1, %v58_v0  ;;  %v61_v4 = vld [vmem:[#allocation5 + $0x18] sm:$0xff]  ;;  %v166_v10 = vld [vmem:[#allocation7 + $0x8] sm:$0xff]  ;;  %s176_s21 = sshll.u32 %s321_s2, 4  ;;  %s177_s21 = int_to_ptr.vmem [resolvable:$true] %s176_s21 }
  0x38   :  { %v56_v5 = vld [vmem:[#allocation2] sm:$0xff]  ;;  %v212_v6 = vpack.c.bf16 %v61_v4, %v60_v2  ;;  %v57_v7 = vld [vmem:[#allocation2 + $0x8] sm:$0xff]  ;;  %v165_v11 = vld [vmem:[#allocation7] sm:$0xff]  ;;  %s288_s22 = scalar_lea.vmem %s177_s21, 256  ;;  %p293_p11 = scmp.lt.s32.totalorder %s177_s21, %s177_s21 }
  0x39   :  { %205 = vmatprep.mubr.msk.f32.mxu0 %vm62_vm0, %v56_v5  ;;  %209 = vmatprep.subr.bf16.mxu0 %v208_v3  ;;  %p289_p10 = scmp.ne.s32.totalorder %s177_s21, %s288_s22  ;;  %p294_p12 = scmp.lt.s32.totalorder %s288_s22, %s288_s22 }
  0x3a   :  { %211 = vmatpush3.bf16.msra.mxu0 %v208_v3 }
  0x3b   :  { %213 = vmatprep.subr.bf16.mxu0 %v212_v6  ;;  %p295_p13 = por %p294_p12, %p293_p11 }
  0x3d   :  { %p296_p0 = pnand %p295_p13, %p289_p10 }
  0x3e   :  { %215 = vmatpush3.bf16.msra.mxu0 %v212_v6 }
  0x41   :  { %206 = vmatmul.mubr.msk.f32.vlgmr.msra.gmra.mrb[0].mxu0 %vm62_vm0, %v57_v7 }
 0x114   :  { %v207_v8 = vpop.f32.mrb[0].mxu0 }
 0x115   :  { %149 = vst.msk [vmem:[#allocation8 + $0x8] sm:$0xff] %vm62_vm0, %v207_v8  ;;  %v135_v9 = vpop.f32.mrb[1].mxu0 }
 0x116   :  { %148 = vst.msk [vmem:[#allocation8] sm:$0xff] %vm62_vm0, %v135_v9 }
 0x11c   :  { %v164_v12 = vld [vmem:[#allocation8 + $0x8] sm:$0xff] }
 0x11d   :  { %v163_v13 = vld [vmem:[#allocation8] sm:$0xff]  ;;  %v168_v14 = vadd.f32 %v166_v10, %v164_v12 }
 0x11e   :  { %v167_v15 = vadd.f32 %v165_v11, %v163_v13 }
 0x11f   :  { %170 = vst.msk [vmem:[#allocation8 + $0x8] sm:$0xff] %vm62_vm0, %v168_v14 }
 0x120   :  { %169 = vst.msk [vmem:[#allocation8] sm:$0xff] %vm62_vm0, %v167_v15 }
 0x121   :  { %299 = shalt.err (!%p296_p0)
}
 0x122   :  { %s300_s27 = scalar_lea.hbm %s418_s3, 256 }
 0x123   :  { %p301_p1 = scmp.ne.s32.totalorder %s418_s3, %s300_s27  ;;  %p304_p2 = scmp.lt.u32.totalorder %s300_s27, %s418_s3 }
 0x125   :  { %p306_p3 = pnand %p304_p2, %p301_p1 }
 0x127   :  { %309 = shalt.err (!%p306_p3)
}
 0x128   :  { %182 = dma.vmem_to_hbm [thread:$0]  %s177_s21, 256, %s418_s3, [#allocation4], %s318_s24, %s318_s24, %s319_s25  }
 0x129   :  { %314 = dma.done.wait [#allocation4], 256  }
 0x12a   :  { %315 = vsyncadd [#allocation4], 4294967040 }
 0x12b   :  { %186 = vsyncpa [#allocation3], 1 }
 0x12c   :  { %187 = vsyncpa [#allocation6], 1 }
 0x12d   :  { %188 = vsyncpa [#allocation4], 1 }

// kernel: _lambda_.20
= control target key start
LH: loop header
LB: loop body
LE: loop exit
PB: predicated region body
PF: predicated region fallthrough
CT: control target
= control target key end

     0   :  { %8 = vsyncpa [#allocation3], 0  ;;  %s419_s0 = inlined_call_operand.hbm [shape: f32[16,32], index: 0, kind: input, shape index: {}]   ;;  %s420_s1 = inlined_call_operand.hbm [shape: f32[32,64], index: 1, kind: input, shape index: {}]   ;;  %s421_s2 = inlined_call_operand.hbm [shape: f32[1,64], index: 2, kind: input, shape index: {}]   ;;  %s422_s3 = inlined_call_operand.hbm [shape: f32[16,64], index: 3, kind: output, shape index: {}]  }
   0x1   :  { %9 = vsyncpa [#allocation6], 0 }
   0x2   :  { %10 = vsyncpa [#allocation4], 0  ;;  %s325_s12 = smov [#allocation5]   ;;  %s326_s14 = smov [#allocation2]  }
   0x3   :  { %s28_s13 = sshll.u32 %s325_s12, 4  ;;  %s16_s15 = sshll.u32 %s326_s14, 4  ;;  %s29_s13 = int_to_ptr.vmem [resolvable:$true] %s28_s13  ;;  %s351_s15 = int_to_ptr.vmem [resolvable:$true] %s16_s15 }
   0x4   :  { %s231_s18 = scalar_lea.hbm %s420_s1, 512 }
   0x5   :  { %p232_p0 = scmp.ne.s32.totalorder %s420_s1, %s231_s18  ;;  %p235_p1 = scmp.lt.u32.totalorder %s231_s18, %s420_s1 }
   0x7   :  { %p237_p2 = pnand %p235_p1, %p232_p0 }
   0x9   :  { %240 = shalt.err (!%p237_p2)
}
   0xa   :  { %s241_s23 = scalar_lea.vmem %s29_s13, 512  ;;  %p246_p4 = scmp.lt.s32.totalorder %s29_s13, %s29_s13 }
   0xb   :  { %p242_p3 = scmp.ne.s32.totalorder %s29_s13, %s241_s23  ;;  %p247_p5 = scmp.lt.s32.totalorder %s241_s23, %s241_s23 }
   0xd   :  { %p248_p6 = por %p247_p5, %p246_p4 }
   0xf   :  { %p249_p7 = pnand %p248_p6, %p242_p3 }
  0x11   :  { %252 = shalt.err (!%p249_p7)
}
  0x12   :  { %s327_s24 = smov 128   ;;  %s328_s25 = smov 8  }
  0x13   :  { %34 = dma.hbm_to_vmem [thread:$0]  %s420_s1, 512, %s29_s13, [#allocation6], %s327_s24, %s327_s24, %s328_s25  }
  0x14   :  { %s253_s30 = scalar_lea.hbm %s419_s0, 256 }
  0x15   :  { %p254_p8 = scmp.ne.s32.totalorder %s419_s0, %s253_s30  ;;  %p257_p9 = scmp.lt.u32.totalorder %s253_s30, %s419_s0 }
  0x17   :  { %p259_p10 = pnand %p257_p9, %p254_p8 }
  0x19   :  { %262 = shalt.err (!%p259_p10)
}
  0x1a   :  { %s263_s8 = scalar_lea.vmem %s351_s15, 256  ;;  %p268_p12 = scmp.lt.s32.totalorder %s351_s15, %s351_s15 }
  0x1b   :  { %p264_p11 = scmp.ne.s32.totalorder %s351_s15, %s263_s8  ;;  %p269_p13 = scmp.lt.s32.totalorder %s263_s8, %s263_s8 }
  0x1d   :  { %p270_p0 = por %p269_p13, %p268_p12 }
  0x1f   :  { %p271_p1 = pnand %p270_p0, %p264_p11 }
  0x21   :  { %274 = shalt.err (!%p271_p1)
}
  0x22   :  { %22 = dma.hbm_to_vmem [thread:$0]  %s419_s0, 256, %s351_s15, [#allocation3], %s327_s24, %s327_s24, %s328_s25  }
  0x23   :  { %s329_s10 = smov [#allocation7]   ;;  %s275_s14 = scalar_lea.hbm %s421_s2, 16 }
  0x24   :  { %s41_s11 = sshll.u32 %s329_s10, 4  ;;  %p276_p2 = scmp.ne.s32.totalorder %s421_s2, %s275_s14  ;;  %s42_s11 = int_to_ptr.vmem [resolvable:$true] %s41_s11 }
  0x25   :  { %p279_p3 = scmp.lt.u32.totalorder %s275_s14, %s421_s2 }
  0x27   :  { %p281_p4 = pnand %p279_p3, %p276_p2 }
  0x29   :  { %284 = shalt.err (!%p281_p4)
}
  0x2a   :  { %s285_s20 = scalar_lea.vmem %s42_s11, 16  ;;  %s289_s0 = scalar_lea.vmem %s42_s11, 32 }
  0x2b   :  { %p286_p5 = scmp.ne.s32.totalorder %s42_s11, %s285_s20  ;;  %p290_p6 = scmp.lt.s32.totalorder %s42_s11, %s42_s11 }
  0x2c   :  { %p291_p7 = scmp.lt.s32.totalorder %s289_s0, %s285_s20 }
  0x2e   :  { %p292_p8 = por %p291_p7, %p290_p6 }
  0x30   :  { %p293_p9 = pnand %p292_p8, %p286_p5 }
  0x32   :  { %296 = shalt.err (!%p293_p9)
}
  0x33   :  { %44 = dma.hbm_to_vmem [thread:$0]  %s421_s2, 16, %s42_s11, [#allocation6]  }
  0x34   :  { %319 = dma.done.wait [#allocation3], 256  }
  0x35   :  { %320 = vsyncadd [#allocation3], 4294967040 }
  0x36   :  { %321 = dma.done.wait [#allocation6], 528  }
  0x37   :  { %322 = vsyncadd [#allocation6], 4294966768  ;;  %vm60_vm0 = vcmask 261120   ;;  %v56_v0 = vld [vmem:[#allocation5] sm:$0xff]  ;;  %v57_v1 = vld [vmem:[#allocation5 + $0x8] sm:$0xff]  ;;  %vm146_vm1 = vcmask 523264  }
  0x38   :  { %v58_v2 = vld [vmem:[#allocation5 + $0x10] sm:$0xff]  ;;  %v217_v3 = vpack.c.bf16 %v57_v1, %v56_v0  ;;  %v59_v4 = vld [vmem:[#allocation5 + $0x18] sm:$0xff]  ;;  %v199_v10 = vld [vmem:[#allocation7] ss:$0 sm:$0xff]  ;;  %s330_s2 = smov [#allocation8]  }
  0x39   :  { %v54_v5 = vld [vmem:[#allocation2] sm:$0xff]  ;;  %v221_v6 = vpack.c.bf16 %v59_v4, %v58_v2  ;;  %v55_v7 = vld [vmem:[#allocation2 + $0x8] sm:$0xff]  ;;  %s184_s22 = sshll.u32 %s330_s2, 4  ;;  %s185_s22 = int_to_ptr.vmem [resolvable:$true] %s184_s22 }
  0x3a   :  { %214 = vmatprep.mubr.msk.f32.mxu0 %vm60_vm0, %v54_v5  ;;  %218 = vmatprep.subr.bf16.mxu0 %v217_v3  ;;  %s297_s23 = scalar_lea.vmem %s185_s22, 256  ;;  %p302_p11 = scmp.lt.s32.totalorder %s185_s22, %s185_s22 }
  0x3b   :  { %220 = vmatpush3.bf16.msra.mxu0 %v217_v3  ;;  %p298_p10 = scmp.ne.s32.totalorder %s185_s22, %s297_s23  ;;  %p303_p12 = scmp.lt.s32.totalorder %s297_s23, %s297_s23 }
  0x3c   :  { %222 = vmatprep.subr.bf16.mxu0 %v221_v6 }
  0x3d   :  { %p304_p13 = por %p303_p12, %p302_p11 }
  0x3f   :  { %224 = vmatpush3.bf16.msra.mxu0 %v221_v6  ;;  %p305_p0 = pnand %p304_p13, %p298_p10 }
  0x42   :  { %215 = vmatmul.mubr.msk.f32.vlgmr.msra.gmra.mrb[0].mxu0 %vm60_vm0, %v55_v7 }
 0x115   :  { %v216_v8 = vpop.f32.mrb[0].mxu0 }
 0x116   :  { %148 = vst.msk [vmem:[#allocation8 + $0x8] sm:$0xff] %vm146_vm1, %v216_v8  ;;  %v133_v9 = vpop.f32.mrb[1].mxu0 }
 0x117   :  { %147 = vst.msk [vmem:[#allocation8] sm:$0xff] %vm146_vm1, %v133_v9 }
 0x11d   :  { %v164_v11 = vld [vmem:[#allocation8 + $0x8] sm:$0xff] }
 0x11e   :  { %v163_v12 = vld [vmem:[#allocation8] sm:$0xff]  ;;  %v173_v13 = vadd.f32 %v199_v10, %v164_v11 }
 0x11f   :  { %v172_v14 = vadd.f32 %v199_v10, %v163_v12 }
 0x120   :  { %v175_v15 = vmax.f32 %v173_v13, 0.0 }
 0x121   :  { %v174_v16 = vmax.f32 %v172_v14, 0.0 }
 0x122   :  { %178 = vst.msk [vmem:[#allocation8 + $0x8] sm:$0xff] %vm146_vm1, %v175_v15 }
 0x123   :  { %177 = vst.msk [vmem:[#allocation8] sm:$0xff] %vm146_vm1, %v174_v16 }
 0x124   :  { %308 = shalt.err (!%p305_p0)
}
 0x125   :  { %s309_s28 = scalar_lea.hbm %s422_s3, 256 }
 0x126   :  { %p310_p1 = scmp.ne.s32.totalorder %s422_s3, %s309_s28  ;;  %p313_p2 = scmp.lt.u32.totalorder %s309_s28, %s422_s3 }
 0x128   :  { %p315_p3 = pnand %p313_p2, %p310_p1 }
 0x12a   :  { %318 = shalt.err (!%p315_p3)
}
 0x12b   :  { %190 = dma.vmem_to_hbm [thread:$0]  %s185_s22, 256, %s422_s3, [#allocation4], %s327_s24, %s327_s24, %s328_s25  }
 0x12c   :  { %323 = dma.done.wait [#allocation4], 256  }
 0x12d   :  { %324 = vsyncadd [#allocation4], 4294967040 }
 0x12e   :  { %194 = vsyncpa [#allocation3], 1 }
 0x12f   :  { %195 = vsyncpa [#allocation6], 1 }
 0x130   :  { %196 = vsyncpa [#allocation4], 1 }

// kernel: _lambda_.21
= control target key start
LH: loop header
LB: loop body
LE: loop exit
PB: predicated region body
PF: predicated region fallthrough
CT: control target
= control target key end

     0   :  { %9 = vsyncpa [#allocation3], 0  ;;  %s518_s0 = inlined_call_operand.hbm [shape: f32[16,64], index: 0, kind: input, shape index: {}]   ;;  %s519_s1 = inlined_call_operand.hbm [shape: f32[64,32], index: 1, kind: input, shape index: {}]   ;;  %s520_s2 = inlined_call_operand.hbm [shape: f32[1,32], index: 2, kind: input, shape index: {}]   ;;  %s521_s3 = inlined_call_operand.hbm [shape: f32[16,32], index: 3, kind: input, shape index: {}]   ;;  %s522_s4 = inlined_call_operand.hbm [shape: f32[16,32], index: 4, kind: output, shape index: {}]  }
   0x1   :  { %10 = vsyncpa [#allocation6], 0 }
   0x2   :  { %11 = vsyncpa [#allocation9], 0 }
   0x3   :  { %12 = vsyncpa [#allocation4], 0  ;;  %s394_s15 = smov [#allocation5]   ;;  %s395_s17 = smov [#allocation2]  }
   0x4   :  { %s30_s16 = sshll.u32 %s394_s15, 4  ;;  %s18_s18 = sshll.u32 %s395_s17, 4  ;;  %s31_s16 = int_to_ptr.vmem [resolvable:$true] %s30_s16  ;;  %s426_s18 = int_to_ptr.vmem [resolvable:$true] %s18_s18 }
   0x5   :  { %s276_s21 = scalar_lea.hbm %s519_s1, 1024 }
   0x6   :  { %p277_p0 = scmp.ne.s32.totalorder %s519_s1, %s276_s21  ;;  %p280_p1 = scmp.lt.u32.totalorder %s276_s21, %s519_s1 }
   0x8   :  { %p282_p2 = pnand %p280_p1, %p277_p0 }
   0xa   :  { %285 = shalt.err (!%p282_p2)
}
   0xb   :  { %s286_s26 = scalar_lea.vmem %s31_s16, 1024  ;;  %p291_p4 = scmp.lt.s32.totalorder %s31_s16, %s31_s16 }
   0xc   :  { %p287_p3 = scmp.ne.s32.totalorder %s31_s16, %s286_s26  ;;  %p292_p5 = scmp.lt.s32.totalorder %s286_s26, %s286_s26 }
   0xe   :  { %p293_p6 = por %p292_p5, %p291_p4 }
  0x10   :  { %p294_p7 = pnand %p293_p6, %p287_p3 }
  0x12   :  { %297 = shalt.err (!%p294_p7)
}
  0x13   :  { %s396_s27 = smov 128   ;;  %s397_s28 = smov 8  }
  0x14   :  { %36 = dma.hbm_to_vmem [thread:$0]  %s519_s1, 1024, %s31_s16, [#allocation6], %s396_s27, %s396_s27, %s397_s28  }
  0x15   :  { %s298_s7 = scalar_lea.hbm %s518_s0, 256 }
  0x16   :  { %p299_p8 = scmp.ne.s32.totalorder %s518_s0, %s298_s7  ;;  %p302_p9 = scmp.lt.u32.totalorder %s298_s7, %s518_s0 }
  0x18   :  { %p304_p10 = pnand %p302_p9, %p299_p8 }
  0x1a   :  { %307 = shalt.err (!%p304_p10)
}
  0x1b   :  { %s308_s12 = scalar_lea.vmem %s426_s18, 256  ;;  %p313_p12 = scmp.lt.s32.totalorder %s426_s18, %s426_s18 }
  0x1c   :  { %p309_p11 = scmp.ne.s32.totalorder %s426_s18, %s308_s12  ;;  %p314_p13 = scmp.lt.s32.totalorder %s308_s12, %s308_s12 }
  0x1e   :  { %p315_p0 = por %p314_p13, %p313_p12 }
  0x20   :  { %p316_p1 = pnand %p315_p0, %p309_p11 }
  0x22   :  { %319 = shalt.err (!%p316_p1)
}
  0x23   :  { %24 = dma.hbm_to_vmem [thread:$0]  %s518_s0, 256, %s426_s18, [#allocation3], %s396_s27, %s396_s27, %s397_s28  }
  0x24   :  { %s398_s14 = smov [#allocation7]   ;;  %s399_s16 = smov [#allocation8]  }
  0x25   :  { %s43_s15 = sshll.u32 %s398_s14, 4  ;;  %s52_s17 = sshll.u32 %s399_s16, 4  ;;  %s44_s15 = int_to_ptr.vmem [resolvable:$true] %s43_s15  ;;  %s463_s17 = int_to_ptr.vmem [resolvable:$true] %s52_s17 }
  0x26   :  { %s320_s21 = scalar_lea.hbm %s520_s2, 16 }
  0x27   :  { %p321_p2 = scmp.ne.s32.totalorder %s520_s2, %s320_s21  ;;  %p324_p3 = scmp.lt.u32.totalorder %s320_s21, %s520_s2 }
  0x29   :  { %p326_p4 = pnand %p324_p3, %p321_p2 }
  0x2b   :  { %329 = shalt.err (!%p326_p4)
}
  0x2c   :  { %s330_s0 = scalar_lea.vmem %s44_s15, 16  ;;  %s334_s18 = scalar_lea.vmem %s44_s15, 32 }
  0x2d   :  { %p331_p5 = scmp.ne.s32.totalorder %s44_s15, %s330_s0  ;;  %p335_p6 = scmp.lt.s32.totalorder %s44_s15, %s44_s15 }
  0x2e   :  { %p336_p7 = scmp.lt.s32.totalorder %s334_s18, %s330_s0 }
  0x30   :  { %p337_p8 = por %p336_p7, %p335_p6 }
  0x32   :  { %p338_p9 = pnand %p337_p8, %p331_p5 }
  0x34   :  { %341 = shalt.err (!%p338_p9)
}
  0x35   :  { %46 = dma.hbm_to_vmem [thread:$0]  %s520_s2, 16, %s44_s15, [#allocation6]  }
  0x36   :  { %s342_s6 = scalar_lea.hbm %s521_s3, 256 }
  0x37   :  { %p343_p10 = scmp.ne.s32.totalorder %s521_s3, %s342_s6  ;;  %p346_p11 = scmp.lt.u32.totalorder %s342_s6, %s521_s3 }
  0x39   :  { %p348_p12 = pnand %p346_p11, %p343_p10 }
  0x3b   :  { %351 = shalt.err (!%p348_p12)
}
  0x3c   :  { %s352_s11 = scalar_lea.vmem %s463_s17, 256  ;;  %p357_p0 = scmp.lt.s32.totalorder %s463_s17, %s463_s17 }
  0x3d   :  { %p353_p13 = scmp.ne.s32.totalorder %s463_s17, %s352_s11  ;;  %p358_p1 = scmp.lt.s32.totalorder %s352_s11, %s352_s11 }
  0x3f   :  { %p359_p2 = por %p358_p1, %p357_p0 }
  0x41   :  { %p360_p3 = pnand %p359_p2, %p353_p13 }
  0x43   :  { %363 = shalt.err (!%p360_p3)
}
  0x44   :  { %58 = dma.hbm_to_vmem [thread:$0]  %s521_s3, 256, %s463_s17, [#allocation9], %s396_s27, %s396_s27, %s397_s28  }
  0x45   :  { %386 = dma.done.wait [#allocation3], 256  }
  0x46   :  { %387 = vsyncadd [#allocation3], 4294967040 }
  0x47   :  { %388 = dma.done.wait [#allocation6], 1040  }
  0x48   :  { %389 = vsyncadd [#allocation6], 4294966256 }
  0x49   :  { %390 = dma.done.wait [#allocation9], 256  }
  0x4a   :  { %391 = vsyncadd [#allocation9], 4294967040  ;;  %v73_v0 = vld [vmem:[#allocation5] sm:$0xff]  ;;  %v74_v1 = vld [vmem:[#allocation5 + $0x8] sm:$0xff]  ;;  %vm81_vm0 = vcmask 523264   ;;  %vm167_vm1 = vcmask 261120  }
  0x4b   :  { %v75_v2 = vld [vmem:[#allocation5 + $0x10] sm:$0xff]  ;;  %v253_v3 = vpack.c.bf16 %v74_v1, %v73_v0  ;;  %v76_v4 = vld [vmem:[#allocation5 + $0x18] sm:$0xff]  ;;  %v77_v6 = vld [vmem:[#allocation5 + $0x20] sm:$0xff]  ;;  %s400_s3 = smov [#allocation10]  }
  0x4c   :  { %v257_v5 = vpack.c.bf16 %v76_v4, %v75_v2  ;;  %v78_v7 = vld [vmem:[#allocation5 + $0x28] sm:$0xff]  ;;  %v71_v8 = vld [vmem:[#allocation2] sm:$0xff]  ;;  %v80_v11 = vld [vmem:[#allocation5 + $0x38] sm:$0xff]  ;;  %s207_s1 = sshll.u32 %s400_s3, 4  ;;  %s208_s1 = int_to_ptr.vmem [resolvable:$true] %s207_s1 }
  0x4d   :  { %254 = vmatprep.subr.bf16.mxu0 %v253_v3  ;;  %250 = vmatprep.mubr.msk.f32.mxu0 %vm81_vm0, %v71_v8  ;;  %v261_v9 = vpack.c.bf16 %v78_v7, %v77_v6  ;;  %v79_v10 = vld [vmem:[#allocation5 + $0x30] sm:$0xff]  ;;  %v72_v13 = vld [vmem:[#allocation2 + $0x8] sm:$0xff]  ;;  %v223_v16 = vld [vmem:[#allocation7] ss:$0 sm:$0xff]  ;;  %s364_s13 = scalar_lea.vmem %s208_s1, 256  ;;  %p369_p5 = scmp.lt.s32.totalorder %s208_s1, %s208_s1 }
  0x4e   :  { %256 = vmatpush3.bf16.msra.mxu0 %v253_v3  ;;  %v265_v12 = vpack.c.bf16 %v80_v11, %v79_v10  ;;  %v196_v18 = vld [vmem:[#allocation8 + $0x8] sm:$0xff]  ;;  %v195_v21 = vld [vmem:[#allocation8] sm:$0xff]  ;;  %p365_p4 = scmp.ne.s32.totalorder %s208_s1, %s364_s13  ;;  %p370_p6 = scmp.lt.s32.totalorder %s364_s13, %s364_s13 }
  0x4f   :  { %258 = vmatprep.subr.bf16.mxu0 %v257_v5 }
  0x50   :  { %p371_p7 = por %p370_p6, %p369_p5 }
  0x52   :  { %260 = vmatpush3.bf16.msra.mxu0 %v257_v5  ;;  %p372_p8 = pnand %p371_p7, %p365_p4 }
  0x53   :  { %262 = vmatprep.subr.bf16.mxu0 %v261_v9 }
  0x56   :  { %264 = vmatpush3.bf16.msra.mxu0 %v261_v9 }
  0x57   :  { %266 = vmatprep.subr.bf16.mxu0 %v265_v12 }
  0x5a   :  { %268 = vmatpush3.bf16.msra.mxu0 %v265_v12 }
  0x5d   :  { %251 = vmatmul.mubr.msk.f32.vlgmr.msra.gmra.mrb[0].mxu0 %vm81_vm0, %v72_v13 }
 0x130   :  { %v252_v14 = vpop.f32.mrb[0].mxu0 }
 0x131   :  { %169 = vst.msk [vmem:[#allocation10 + $0x8] sm:$0xff] %vm167_vm1, %v252_v14  ;;  %v154_v15 = vpop.f32.mrb[1].mxu0 }
 0x132   :  { %168 = vst.msk [vmem:[#allocation10] sm:$0xff] %vm167_vm1, %v154_v15 }
 0x138   :  { %v185_v17 = vld [vmem:[#allocation10 + $0x8] sm:$0xff] }
 0x139   :  { %v184_v19 = vld [vmem:[#allocation10] sm:$0xff]  ;;  %v194_v20 = vadd.f32 %v223_v16, %v185_v17 }
 0x13a   :  { %v193_v22 = vadd.f32 %v223_v16, %v184_v19 }
 0x13b   :  { %v198_v23 = vadd.f32 %v196_v18, %v194_v20 }
 0x13c   :  { %v197_v24 = vadd.f32 %v195_v21, %v193_v22 }
 0x13d   :  { %201 = vst.msk [vmem:[#allocation10 + $0x8] sm:$0xff] %vm167_vm1, %v198_v23 }
 0x13e   :  { %200 = vst.msk [vmem:[#allocation10] sm:$0xff] %vm167_vm1, %v197_v24 }
 0x13f   :  { %375 = shalt.err (!%p372_p8)
}
 0x140   :  { %s376_s16 = scalar_lea.hbm %s522_s4, 256 }
 0x141   :  { %p377_p9 = scmp.ne.s32.totalorder %s522_s4, %s376_s16  ;;  %p380_p10 = scmp.lt.u32.totalorder %s376_s16, %s522_s4 }
 0x143   :  { %p382_p11 = pnand %p380_p10, %p377_p9 }
 0x145   :  { %385 = shalt.err (!%p382_p11)
}
 0x146   :  { %213 = dma.vmem_to_hbm [thread:$0]  %s208_s1, 256, %s522_s4, [#allocation4], %s396_s27, %s396_s27, %s397_s28  }
 0x147   :  { %392 = dma.done.wait [#allocation4], 256  }
 0x148   :  { %393 = vsyncadd [#allocation4], 4294967040 }
 0x149   :  { %217 = vsyncpa [#allocation3], 1 }
 0x14a   :  { %218 = vsyncpa [#allocation6], 1 }
 0x14b   :  { %219 = vsyncpa [#allocation9], 1 }
 0x14c   :  { %220 = vsyncpa [#allocation4], 1 }

// kernel: _lambda_.17
= control target key start
LH: loop header
LB: loop body
LE: loop exit
PB: predicated region body
PF: predicated region fallthrough
CT: control target
= control target key end

     0   :  { %s5835_s0 = inlined_call_operand.<no memory space> [shape: s32[1], index: 0, kind: input, shape index: {}, may-alias: {0,1}]   ;;  %s5836_s1 = inlined_call_operand.<no memory space> [shape: s32[1], index: 1, kind: input, shape index: {}, may-alias: {0,1}]   ;;  %s5837_s2 = inlined_call_operand.hbm [shape: f32[2], index: 2, kind: input, shape index: {}]   ;;  %s5838_s3 = inlined_call_operand.hbm [shape: f32[2,8,64], index: 3, kind: input, shape index: {}, may-alias: {3,4}]   ;;  %s5839_s4 = inlined_call_operand.hbm [shape: f32[2,8,64], index: 4, kind: input, shape index: {}, may-alias: {3,4}]   ;;  %s5840_s5 = inlined_call_operand.hbm [shape: f32[2,8,96], index: 5, kind: input, shape index: {}]   ;;  %s5841_s6 = inlined_call_operand.hbm [shape: f32[1,8], index: 6, kind: input, shape index: {}]   ;;  %s5842_s7 = inlined_call_operand.hbm [shape: f32[2,8,32], index: 7, kind: output, shape index: {}]  }
   0x1   :  { %5861 = sst [smem:[#allocation39_spill]] %s5837_s2 }
   0x2   :  { %5862 = sst [smem:[#allocation40_spill]] %s5839_s4 }
   0x3   :  { %5863 = sst [smem:[#allocation41_spill]] %s5840_s5 }
   0x4   :  { %5864 = sst [smem:[#allocation42_spill]] %s5842_s7 }
   0x5   :  { %12 = sst [smem:[#allocation9]] %s5835_s0 }
   0x6   :  { %13 = sst [smem:[#allocation10]] %s5836_s1 }
   0x7   :  { %14 = vsyncpa [#allocation14], 0 }
   0x8   :  { %15 = vsyncpa [#allocation12], 0 }
   0x9   :  { %17 = vsyncpa [#allocation12 + $0x1], 0 }
   0xa   :  { %18 = vsyncpa [#allocation17], 0 }
   0xb   :  { %20 = vsyncpa [#allocation17 + $0x1], 0 }
   0xc   :  { %21 = vsyncpa [#allocation20], 0 }
   0xd   :  { %22 = vsyncpa [#allocation13], 0 }
   0xe   :  { %24 = vsyncpa [#allocation13 + $0x1], 0  ;;  %s4834_s28 = smov 0   ;;  %s4836_s29 = smov 0  }
   0xf   :  { %s4838_s30 = smov 0   ;;  %s4840_s8 = smov 0  }
  0x10   :  { %s4842_s0 = smov 0   ;;  %s4844_s9 = smov 0  }
  0x11   :  { %s4846_s1 = smov 0   ;;  %s4848_s10 = smov 0  }
  0x12   :  { %s4850_s11 = smov 0   ;;  %s4852_s12 = smov 0  }
  0x13   :  { %s4854_s13 = smov 0   ;;  %s4856_s14 = smov 0  }
  0x14   :  { %s4858_s15 = smov 0   ;;  %s4860_s16 = smov 0  }
  0x15   :  { %s4862_s17 = smov 0  }
  0x16 LB: > { %5865 = sst [smem:[#allocation28_spill]] %s4675_s28  ;;  %s42_s18 = sadd.s32 1, %s4727_s16  ;;  %s4731_s17 = sphi %s4862_s17, %s30_s17   ;;  %s4727_s16 = sphi %s4860_s16, %s5939_s16   ;;  %s4723_s15 = sphi %s4858_s15, %s5938_s15   ;;  %s4719_s14 = sphi %s4856_s14, %s5937_s14   ;;  %s4715_s13 = sphi %s4854_s13, %s5936_s13   ;;  %s4711_s12 = sphi %s4852_s12, %s5935_s12   ;;  %s4707_s11 = sphi %s4850_s11, %s5925_s11   ;;  %s4703_s10 = sphi %s4848_s10, %s5934_s10   ;;  %s4699_s1 = sphi %s4846_s1, %s5933_s1   ;;  %s4695_s9 = sphi %s4844_s9, %s5932_s9   ;;  %s4691_s0 = sphi %s4842_s0, %s5931_s0   ;;  %s4687_s8 = sphi %s4840_s8, %s5930_s8   ;;  %s4683_s30 = sphi %s4838_s30, %s5921_s30   ;;  %s4679_s29 = sphi %s4836_s29, %s5929_s29   ;;  %s4675_s28 = sphi %s4834_s28, %s5928_s28  }
  0x17   : > { %5866 = sst [smem:[#allocation29_spill]] %s4683_s30  ;;  %p5849_p0 = scmp.eq.s32.totalorder %s4731_s17, 0 }
  0x18   : > { %5867 = sst [smem:[#allocation30_spill]] %s4687_s8  ;;  %p44_p1 = scmp.ge.s32.totalorder %s42_s18, 2 }
  0x19   : > { %5868 = sst [smem:[#allocation31_spill]] %s4691_s0  ;;  %s97_s19 = sld [smem:[#allocation10]] }
  0x1a   : > { %5869 = sst [smem:[#allocation32_spill]] %s4695_s9  ;;  %s104_s20 = sadd.s32 1, %s4707_s11 }
  0x1b   : > { %5870 = sst [smem:[#allocation33_spill]] %s4707_s11  ;;  %p111_p2 = scmp.ne.s32.totalorder %s4707_s11, %s4703_s10 }
  0x1c   : > { %5871 = sst [smem:[#allocation34_spill]] %s4723_s15  ;;  %s5941_s18 = smov (%p44_p1, %s42_s18), 0 }
  0x1d   : > { %5872 = sst [smem:[#allocation35_spill]] %s5941_s18  ;;  %p4918_p3 = por %p111_p2, %p5849_p0 }
  0x1e   : > { %s69_s22 = ssub.s32 %s4727_s16, %s5941_s18  ;;  %s4926_s23 = sld [smem:[#allocation9]] }
  0x1f   : > { %p5848_p6 = scmp.lt.s32.totalorder %s4731_s17, 2  ;;  %s262_s24 = sand.u32 1, %s4731_s17  }
  0x20   : > { %p4931_p7 = scmp.eq.s32.totalorder %s69_s22, 0  ;;  %s264_s26 = sand.u32 1, %s4707_s11  }
  0x21   : > { %s3832_s27 = sshll.u32 %s264_s26, 3  ;;  %s271_s7 = sadd.s32 %s4727_s16, %s97_s19 }
  0x22   : > { %s4940_s15 = scalar_select %p4931_p7, %s4707_s11, %s104_s20  }
  0x23   : > { %s4942_s5 = sshll.u32 %s271_s7, 7  ;;  %s5876_s4 = sld [smem:[#allocation40_spill]] }
  0x24   : > { %5875 = sst [smem:[#allocation36_spill]] %s4940_s15  ;;  %s266_s22 = scalar_lea.vmem [#allocation16], %s3832_s27 }
  0x25   : > { %s275_s9 = sshll.u32 %s266_s22, 4  ;;  %p4954_p8 = pnand %p5848_p6, %p4918_p3  ;;  %s4958_s9 = int_to_ptr.vmem [resolvable:$true] %s275_s9 }
  0x26   : > { %s4960_s7 = scalar_lea.sflag [#allocation17], %s262_s24 }
  0x27   : > { %p4432_p10 = pneg %p4954_p8 }
  0x29   : > { %s4948_s0 = scalar_lea.hbm %s5876_s4, %s4942_s5  ;;  %s4435_s21 = scalar_lea.hbm %s5876_s4, 256 }
  0x2a   : > { %s4430_s8 = scalar_lea.hbm %s4948_s0, 128  ;;  %p4436_p13 = scmp.lt.u32.totalorder %s4948_s0, %s5876_s4 }
  0x2b   : > { %p4431_p9 = scmp.ne.s32.totalorder %s4948_s0, %s4430_s8  ;;  %p4437_p1 = scmp.lt.u32.totalorder %s4435_s21, %s4430_s8 }
  0x2c   : > { %p4439_p3 = scmp.lt.u32.totalorder %s4430_s8, %s4948_s0 }
  0x2d   : > { %p4433_p11 = pnand %p4432_p10, %p4431_p9  ;;  %p4438_p2 = por %p4437_p1, %p4436_p13 }
  0x2f   : > { %p4434_p12 = pneg %p4433_p11  ;;  %p4440_p5 = por %p4439_p3, %p4438_p2 }
  0x31   : > { %p4441_p6 = pnand %p4440_p5, %p4434_p12 }
  0x33   : > { %4444 = shalt.err (!%p4441_p6)
}
  0x34   : > { %s4445_s24 = scalar_lea.vmem %s4958_s9, 128  ;;  %s4733_s22 = smov [#allocation16]  }
  0x35   : > { %p4446_p9 = scmp.ne.s32.totalorder %s4958_s9, %s4445_s24  ;;  %s4450_s18 = sshll.u32 %s4733_s22, 4  ;;  %s4451_s18 = int_to_ptr.vmem [resolvable:$false] %s4450_s18 }
  0x36   : > { %s4452_s20 = scalar_lea.vmem %s4451_s18, 256  ;;  %p4453_p4 = scmp.lt.s32.totalorder %s4958_s9, %s4451_s18 }
  0x37   : > { %p4448_p11 = pnand %p4446_p9, %p4432_p10  ;;  %p4454_p13 = scmp.lt.s32.totalorder %s4452_s20, %s4445_s24 }
  0x39   : > { %p4449_p0 = pneg %p4448_p11  ;;  %p4455_p1 = por %p4454_p13, %p4453_p4 }
  0x3b   : > { %p4456_p2 = pnand %p4455_p1, %p4449_p0 }
  0x3d   : > { %4459 = shalt.err (!%p4456_p2)
}
  0x3e   : > { %4153 = dma.hbm_to_vmem [thread:$0]  (!%p4954_p8), %s4948_s0, 128, %s4958_s9, %s4960_s7  }
  0x3f   : > { %s4989_s8 = sadd.s32 4294967295, %s4731_s17   ;;  %s3825_s19 = sadd.s32 4294967294, %s4731_s17  }
  0x40   : > { %p5854_p0 = scmp.eq.s32.totalorder %s4989_s8, 0  ;;  %s185_s21 = sadd.s32 1, %s4683_s30 }
  0x41   : > { %s4997_s26 = scalar_select %p4931_p7, %s4683_s30, %s185_s21  }
  0x42   : > { %p5879_p4 = scmp.ne.s32.totalorder %s4703_s10, %s4699_s1  ;;  %p195_p6 = scmp.ne.s32.totalorder %s4683_s30, %s4679_s29 }
  0x43   : > { %5878 = sst [smem:[#allocation37_spill]] %s4997_s26  ;;  %p196_p8 = scmp.eq.s32.totalorder %s4989_s8, 1 }
  0x44   : > { %p5004_p5 = por %p5879_p4, %p5854_p0  ;;  %p201_p10 = scmp.ne.s32.totalorder %s4679_s29, %s4675_s28 }
  0x45   : > { %p202_p12 = scmp.eq.s32.totalorder %s3825_s19, 1  ;;  %p3826_p3 = scmp.ge.s32.totalorder %s4731_s17, 1 }
  0x46   : > { %s5880_s27 = scalar_select %p5004_p5, 1, 0 }
  0x47   : > { %p5014_p9 = por %p196_p8, %p195_p6  ;;  %p209_p11 = scmp.lt.s32.totalorder %s4731_s17, 3 }
  0x48   : > { %p5019_p13 = por %p202_p12, %p201_p10  ;;  %s4734_s24 = smov [#allocation19]  }
  0x49   : > { %s5881_s0 = scalar_select %p5014_p9, 1, 0 }
  0x4a   : > { %s5882_s9 = scalar_select %p5019_p13, 1, 0 }
  0x4b   : > { %p5023_p1 = pnand %p3826_p3, %p209_p11  ;;  %s231_s22 = sshll.u32 %s4734_s24, 4  ;;  %s5029_s22 = int_to_ptr.vmem [resolvable:$true] %s231_s22 }
  0x4c   : > { %5883 = sst [smem:[#allocation38_spill]] %s5882_s9  ;;  %s5886_s2 = sld [smem:[#allocation39_spill]] }
  0x4d   : > { %s5884_s1 = scalar_select %p5023_p1, 1, 0 }
  0x4e   : > { %p4140_p2 = pneg %p5023_p1 }
  0x50   : > { %p5033_p4 = pnand %p4140_p2, %p5854_p0 }
  0x52   : > { %s4460_s21 = scalar_lea.hbm %s5886_s2, 16  ;;  %p4462_p8 = pneg %p5033_p4 }
  0x53   : > { %p4461_p6 = scmp.ne.s32.totalorder %s5886_s2, %s4460_s21  ;;  %p4467_p3 = scmp.lt.u32.totalorder %s4460_s21, %s5886_s2 }
  0x55   : > { %p4463_p10 = pnand %p4462_p8, %p4461_p6 }
  0x57   : > { %p4464_p12 = pneg %p4463_p10 }
  0x59   : > { %p4469_p11 = pnand %p4467_p3, %p4464_p12 }
  0x5b   : > { %4472 = shalt.err (!%p4469_p11)
}
  0x5c   : > { %s4735_s20 = smov [#allocation11]   ;;  %s4473_s30 = scalar_lea.hbm %s5841_s6, 16 }
  0x5d   : > { %4143 = dma.hbm_to_smem (!%p5033_p4), %s5886_s2, 16, %s4735_s20, [#allocation14]  }
  0x5e   : > { %p4474_p2 = scmp.ne.s32.totalorder %s5841_s6, %s4473_s30  ;;  %p4480_p12 = scmp.lt.u32.totalorder %s4473_s30, %s5841_s6 }
  0x60   : > { %p4476_p6 = pnand %p4474_p2, %p4462_p8 }
  0x62   : > { %p4477_p10 = pneg %p4476_p6 }
  0x64   : > { %p4482_p3 = pnand %p4480_p12, %p4477_p10 }
  0x66   : > { %4485 = shalt.err (!%p4482_p3)
}
  0x67   : > { %s4486_s26 = scalar_lea.vmem %s5029_s22, 16  ;;  %s4493_s28 = scalar_lea.vmem %s5029_s22, 32 }
  0x68   : > { %p4487_p11 = scmp.ne.s32.totalorder %s5029_s22, %s4486_s26  ;;  %p4494_p2 = scmp.lt.s32.totalorder %s5029_s22, %s5029_s22 }
  0x69   : > { %p4495_p6 = scmp.lt.s32.totalorder %s4493_s28, %s4486_s26 }
  0x6a   : > { %p4489_p0 = pnand %p4487_p11, %p4462_p8 }
  0x6b   : > { %p4496_p9 = por %p4495_p6, %p4494_p2 }
  0x6c   : > { %p4490_p13 = pneg %p4489_p0 }
  0x6e   : > { %p4497_p5 = pnand %p4496_p9, %p4490_p13 }
  0x70   : > { %4500 = shalt.err (!%p4497_p5)
}
  0x71   : > { %4146 = dma.hbm_to_vmem [thread:$0]  (!%p5033_p4), %s5841_s6, 16, %s5029_s22, [#allocation20]  }
  0x72   : > { %s74_s24 = sadd.s32 1, %s4719_s14  ;;  %p81_p0 = scmp.ne.s32.totalorder %s4719_s14, %s4715_s13 }
  0x73   : > { %s5088_s18 = scalar_select %p4931_p7, %s4719_s14, %s74_s24  }
  0x74   : > { %p5887_p5 = scmp.eq.s32.totalorder %s4731_s17, 0  ;;  %p87_p13 = scmp.ne.s32.totalorder %s4715_s13, %s4711_s12 }
  0x75   : > { %s242_s20 = sand.u32 1, %s4719_s14   ;;  %s251_s19 = sadd.s32 %s4727_s16, %s4926_s23 }
  0x76   : > { %p83_p9 = por %p5887_p5, %p81_p0  ;;  %p5888_p8 = scmp.eq.s32.totalorder %s4989_s8, 0 }
  0x77   : > { %s3830_s15 = sshll.u32 %s242_s20, 3  ;;  %s3831_s11 = sshll.u32 %s251_s19, 7 }
  0x78   : > { %p5099_p10 = por %p5888_p8, %p87_p13  ;;  %s5106_s22 = scalar_lea.hbm %s5838_s3, %s3831_s11 }
  0x79   : > { %s246_s28 = scalar_lea.vmem [#allocation15], %s3830_s15  ;;  %p5890_p4 = scmp.lt.s32.totalorder %s4731_s17, 2 }
  0x7a   : > { %s5889_s4 = scalar_select %p5099_p10, 1, 0 }
  0x7b   : > { %s255_s12 = sshll.u32 %s246_s28, 4  ;;  %p5110_p12 = pnand %p5890_p4, %p83_p9  ;;  %s5114_s12 = int_to_ptr.vmem [resolvable:$true] %s255_s12 }
  0x7c   : > { %s243_s30 = scalar_lea.sflag [#allocation12], %s242_s20  ;;  %s4501_s9 = scalar_lea.hbm %s5106_s22, 128 }
  0x7d   : > { %p4502_p3 = scmp.ne.s32.totalorder %s5106_s22, %s4501_s9  ;;  %p4503_p11 = pneg %p5110_p12 }
  0x7e   : > { %s4506_s15 = scalar_lea.hbm %s5838_s3, 256  ;;  %p4507_p0 = scmp.lt.u32.totalorder %s5106_s22, %s5838_s3 }
  0x7f   : > { %p4504_p2 = pnand %p4503_p11, %p4502_p3  ;;  %p4508_p5 = scmp.lt.u32.totalorder %s4506_s15, %s4501_s9 }
  0x80   : > { %p4510_p13 = scmp.lt.u32.totalorder %s4501_s9, %s5106_s22 }
  0x81   : > { %p4505_p6 = pneg %p4504_p2  ;;  %p4509_p9 = por %p4508_p5, %p4507_p0 }
  0x83   : > { %p4511_p8 = por %p4510_p13, %p4509_p9 }
  0x85   : > { %p4512_p4 = pnand %p4511_p8, %p4505_p6 }
  0x87   : > { %4515 = shalt.err (!%p4512_p4)
}
  0x88   : > { %s4516_s20 = scalar_lea.vmem %s5114_s12, 128  ;;  %s4736_s26 = smov [#allocation15]  }
  0x89   : > { %p4517_p3 = scmp.ne.s32.totalorder %s5114_s12, %s4516_s20  ;;  %s4521_s28 = sshll.u32 %s4736_s26, 4  ;;  %s4522_s28 = int_to_ptr.vmem [resolvable:$false] %s4521_s28 }
  0x8a   : > { %s4523_s24 = scalar_lea.vmem %s4522_s28, 256  ;;  %p4524_p1 = scmp.lt.s32.totalorder %s5114_s12, %s4522_s28 }
  0x8b   : > { %p4519_p2 = pnand %p4517_p3, %p4503_p11  ;;  %p4525_p0 = scmp.lt.s32.totalorder %s4523_s24, %s4516_s20 }
  0x8d   : > { %p4520_p10 = pneg %p4519_p2  ;;  %p4526_p5 = por %p4525_p0, %p4524_p1 }
  0x8f   : > { %p4527_p9 = pnand %p4526_p5, %p4520_p10 }
  0x91   : > { %4530 = shalt.err (!%p4527_p9)
}
  0x92   : > { %s5892_s9 = sld [smem:[#allocation32_spill]]  ;;  %s5893_s19 = sld [smem:[#allocation31_spill]] }
  0x93   : > { %s5894_s15 = sld [smem:[#allocation30_spill]]  ;;  %p5895_p10 = scmp.eq.s32.totalorder %s4731_s17, 0 }
  0x94   : > { %4150 = dma.hbm_to_vmem [thread:$0]  (!%p5110_p12), %s5106_s22, 128, %s5114_s12, %s243_s30  }
  0x95   : > { %s5896_s28 = sld [smem:[#allocation41_spill]]  ;;  %p5898_p13 = scmp.eq.s32.totalorder %s4989_s8, 0 }
  0x98   : > { %s134_s11 = sadd.s32 1, %s5892_s9  ;;  %p141_p1 = scmp.ne.s32.totalorder %s5892_s9, %s5893_s19 }
  0x99   : > { %s5147_s21 = scalar_select %p4931_p7, %s5892_s9, %s134_s11  }
  0x9a   : > { %p143_p11 = por %p141_p1, %p5895_p10  ;;  %p147_p6 = scmp.ne.s32.totalorder %s5893_s19, %s5894_s15 }
  0x9b   : > { %s284_s23 = sand.u32 1, %s5892_s9   ;;  %s5897_s24 = smov %s5896_s28 }
  0x9c   : > { %s5158_s2 = scalar_lea.hbm %s5896_s28, %s4942_s5  ;;  %p5162_p12 = por %p147_p6, %p5898_p13 }
  0x9d   : > { %s3834_s25 = sshll.u32 %s284_s23, 3  ;;  %p5900_p7 = scmp.lt.s32.totalorder %s4731_s17, 2 }
  0x9e   : > { %s5899_s22 = scalar_select %p5162_p12, 1, 0 }
  0x9f   : > { %p5168_p8 = pnand %p5900_p7, %p143_p11  ;;  %s286_s30 = scalar_lea.vmem [#allocation18], %s3834_s25 }
  0xa0   : > { %s295_s5 = sshll.u32 %s286_s30, 4  ;;  %s4531_s9 = scalar_lea.hbm %s5158_s2, 128  ;;  %s296_s5 = int_to_ptr.vmem [resolvable:$true] %s295_s5 }
  0xa1   : > { %p4532_p4 = scmp.ne.s32.totalorder %s5158_s2, %s4531_s9  ;;  %p4533_p3 = pneg %p5168_p8 }
  0xa2   : > { %s4536_s11 = scalar_lea.hbm %s5897_s24, 256  ;;  %p4537_p5 = scmp.lt.u32.totalorder %s5158_s2, %s5897_s24 }
  0xa3   : > { %p4534_p2 = pnand %p4533_p3, %p4532_p4  ;;  %p4538_p9 = scmp.lt.u32.totalorder %s4536_s11, %s4531_s9 }
  0xa4   : > { %p4540_p10 = scmp.lt.u32.totalorder %s4531_s9, %s5158_s2 }
  0xa5   : > { %p4535_p0 = pneg %p4534_p2  ;;  %p4539_p1 = por %p4538_p9, %p4537_p5 }
  0xa7   : > { %p4541_p11 = por %p4540_p10, %p4539_p1 }
  0xa9   : > { %p4542_p6 = pnand %p4541_p11, %p4535_p0 }
  0xab   : > { %4545 = shalt.err (!%p4542_p6)
}
  0xac   : > { %s4546_s26 = scalar_lea.vmem %s296_s5, 128  ;;  %s4737_s28 = smov [#allocation18]  }
  0xad   : > { %p4547_p13 = scmp.ne.s32.totalorder %s296_s5, %s4546_s26  ;;  %s4551_s25 = sshll.u32 %s4737_s28, 4  ;;  %s4552_s25 = int_to_ptr.vmem [resolvable:$false] %s4551_s25 }
  0xae   : > { %s4553_s30 = scalar_lea.vmem %s4552_s25, 256  ;;  %p4554_p2 = scmp.lt.s32.totalorder %s296_s5, %s4552_s25 }
  0xaf   : > { %p4549_p7 = pnand %p4547_p13, %p4533_p3  ;;  %p4555_p12 = scmp.lt.s32.totalorder %s4553_s30, %s4546_s26 }
  0xb1   : > { %p4550_p4 = pneg %p4549_p7  ;;  %p4556_p5 = por %p4555_p12, %p4554_p2 }
  0xb3   : > { %p4557_p9 = pnand %p4556_p5, %p4550_p4 }
  0xb5   : > { %4560 = shalt.err (!%p4557_p9)
}
  0xb6   : > { %4156 = dma.hbm_to_vmem [thread:$0]  (!%p5168_p8), %s5158_s2, 128, %s296_s5, %s4960_s7  }
  0xb7   : > { %p5902_p0 = scmp.ne.s32.totalorder %s5884_s1, 0 }
  0xb8   : > { %p5903_p3 = scmp.eq.s32.totalorder (!%p5902_p0), %s4989_s8, 0 }
  0xb9   : > { %304 = sbr.rel (%p5902_p0) target bundleno = 3383 (0xd37), region = 40 }
  0xc0   : > { %4650 = dma.done.wait (%p5903_p3), [#allocation14], 16   ;;  %p5904_p1 = pmov %p5903_p3 }
  0xc1   : > { %s310_s9 = sand.u32 1, %s4715_s13   ;;  %p5905_p12 = scmp.ne.s32.totalorder %s5889_s4, 0 }
  0xc2   : > { %4652 = vsyncadd (%p5904_p1), [#allocation14], 4294967280  ;;  %s5201_s19 = sshll.u32 %s310_s9, 3  ;;  %s311_s15 = scalar_lea.sflag [#allocation12], %s310_s9 }
  0xc3   : > { %s314_s12 = scalar_lea.vmem [#allocation15], %s5201_s19 }
  0xc4   : > { %4654 = dma.done.wait (%p5905_p12), %s311_s15, 128  }
  0xc5   : > { %4656 = vsyncadd (%p5905_p12), %s311_s15, 4294967168  ;;  %s319_s2 = sand.u32 1, %s4989_s8   ;;  %s321_s7 = sand.u32 1, %s4703_s10  }
  0xc6   : > { %s5210_s1 = sshll.u32 %s321_s7, 3  ;;  %s320_s5 = scalar_lea.sflag [#allocation17], %s319_s2 }
  0xc7   : > { %s323_s11 = scalar_lea.vmem [#allocation16], %s5210_s1  ;;  %p5906_p8 = scmp.ne.s32.totalorder %s5880_s27, 0 }
  0xc9   : > { %4658 = dma.done.wait (%p5906_p8), %s320_s5, 128  }
  0xca   : > { %4660 = vsyncadd (%p5906_p8), %s320_s5, 4294967168  ;;  %s5907_s23 = sld [smem:[#allocation31_spill]]  ;;  %p5908_p10 = scmp.ne.s32.totalorder %s5899_s22, 0 }
  0xd0   : > { %s330_s20 = sand.u32 1, %s5907_s23  }
  0xd1   : > { %s5218_s4 = sshll.u32 %s330_s20, 3 }
  0xd2   : > { %s332_s26 = scalar_lea.vmem [#allocation18], %s5218_s4 }
  0xd3   : > { %4662 = dma.done.wait (%p5908_p10), %s320_s5, 128  }
  0xd4   : > { %4664 = vsyncadd (%p5908_p10), %s320_s5, 4294967168  ;;  %p5909_p11 = pmov %p5904_p1 }
  0xd5   : > { %p5910_p6 = pmov %p5904_p1 }
  0xd6   : > { %4666 = dma.done.wait (%p5909_p11), [#allocation20], 16  }
  0xd7   : > { %4668 = vsyncadd (%p5910_p6), [#allocation20], 4294967280 }
  0xd8   : > { %341 = sfence }
  0xd9   : > { %s5860_s27 = sand.u32 1, %s4679_s29   ;;  %s5230_s28 = sld [smem:[#allocation9]] }
  0xda   : > { %s5234_s25 = sshll.u32 %s5860_s27, 3  ;;  %s5236_s30 = sld [smem:[#allocation10]] }
  0xdb   : > { %s373_s22 = scalar_lea.vmem [#allocation21], %s5234_s25 }
  0xe0   : > { %p3843_p13 = scmp.ne.s32.totalorder %s5236_s30, 0 }
  0xe1   : > { %vm384_vm0 = vcmask (!%p3843_p13), 64512   ;;  %vm393_vm1 = vcmask (!%p3843_p13), 7168   ;;  %v4738_v0 = vmov (!%p3843_p13), 0.0   ;;  %v4739_v1 = vmov (!%p3843_p13), -inf  }
  0xe2   : > { %383 = sbr.rel (%p3843_p13) target bundleno = 238 (0xee), region = 64  ;;  %385 = vst.msk [vmem:[#allocation2] sm:$0xff] (!%p3843_p13), %vm384_vm0, %v4738_v0  ;;  %386 = vst.msk [vmem:[#allocation2 + $0x8] sm:$0xff] (!%p3843_p13), %vm384_vm0, %v4738_v0 }
  0xe3   : > { %387 = vst.msk [vmem:[#allocation2 + $0x10] sm:$0xff] (!%p3843_p13), %vm384_vm0, %v4738_v0  ;;  %388 = vst.msk [vmem:[#allocation2 + $0x18] sm:$0xff] (!%p3843_p13), %vm384_vm0, %v4738_v0 }
  0xe4   : > { %389 = vst.msk [vmem:[#allocation3] sm:$0xff] (!%p3843_p13), %vm384_vm0, %v4738_v0  ;;  %390 = vst.msk [vmem:[#allocation3 + $0x8] sm:$0xff] (!%p3843_p13), %vm384_vm0, %v4738_v0 }
  0xe5   : > { %391 = vst.msk [vmem:[#allocation3 + $0x10] sm:$0xff] (!%p3843_p13), %vm384_vm0, %v4738_v0  ;;  %392 = vst.msk [vmem:[#allocation3 + $0x18] sm:$0xff] (!%p3843_p13), %vm384_vm0, %v4738_v0 }
  0xe6   : > { %394 = vst.msk [vmem:[#allocation4] sm:$0xff] (!%p3843_p13), %vm393_vm1, %v4739_v1  ;;  %395 = vst.msk [vmem:[#allocation4 + $0x8] sm:$0xff] (!%p3843_p13), %vm393_vm1, %v4739_v1 }
  0xe7   : > { %396 = vst.msk [vmem:[#allocation4 + $0x10] sm:$0xff] (!%p3843_p13), %vm393_vm1, %v4739_v1  ;;  %397 = vst.msk [vmem:[#allocation4 + $0x18] sm:$0xff] (!%p3843_p13), %vm393_vm1, %v4739_v1 }
  0xe8   : > { %398 = vst.msk [vmem:[#allocation5] sm:$0xff] (!%p3843_p13), %vm393_vm1, %v4739_v1  ;;  %399 = vst.msk [vmem:[#allocation5 + $0x8] sm:$0xff] (!%p3843_p13), %vm393_vm1, %v4739_v1 }
  0xe9   : > { %400 = vst.msk [vmem:[#allocation5 + $0x10] sm:$0xff] %vm393_vm1, %v4739_v1  ;;  %401 = vst.msk [vmem:[#allocation5 + $0x18] sm:$0xff] %vm393_vm1, %v4739_v1 }
  0xea   : > { %402 = vst.msk [vmem:[#allocation6] sm:$0xff] %vm393_vm1, %v4738_v0  ;;  %403 = vst.msk [vmem:[#allocation6 + $0x8] sm:$0xff] %vm393_vm1, %v4738_v0 }
  0xeb   : > { %404 = vst.msk [vmem:[#allocation6 + $0x10] sm:$0xff] %vm393_vm1, %v4738_v0  ;;  %405 = vst.msk [vmem:[#allocation6 + $0x18] sm:$0xff] %vm393_vm1, %v4738_v0 }
  0xec   : > { %406 = vst.msk [vmem:[#allocation7] sm:$0xff] %vm393_vm1, %v4738_v0  ;;  %407 = vst.msk [vmem:[#allocation7 + $0x8] sm:$0xff] %vm393_vm1, %v4738_v0 }
  0xed   : > { %408 = vst.msk [vmem:[#allocation7 + $0x10] sm:$0xff] %vm393_vm1, %v4738_v0  ;;  %409 = vst.msk [vmem:[#allocation7 + $0x18] sm:$0xff] %vm393_vm1, %v4738_v0 }
  0xee PF: > { %p3844_p7 = scmp.ge.s32.totalorder %s5236_s30, %s5230_s28 }
  0xef   : > { %v5260_v2 = vld [vmem:[%s323_s11] sm:$0xff] (!%p3844_p7)  ;;  %s4740_s8 = smov (!%p3844_p7), 96   ;;  %v4741_v3 = vmov (!%p3844_p7), 0.0   ;;  %vm4742_vm2 = vmmov (!%p3844_p7), 0   ;;  %vm420_vm3 = vcmask (!%p3844_p7), 31744   ;;  %v415_v5 = vld [vmem:[%s314_s12] sm:$0xff] (!%p3844_p7) }
  0xf0   : > { %413 = sbr.rel (%p3844_p7) target bundleno = 1610 (0x64a), region = 68  ;;  %418 = vrot.lane.b32.xlu0 (!%p3844_p7), %v5260_v2, %s4740_s8  ;;  %3964 = vmatprep.subr.mxu0 (!%p3844_p7), %v4741_v3  ;;  %v5278_v6 = vld [vmem:[%s332_s26] sm:$0xff] (!%p3844_p7)  ;;  %s4743_s9 = smov (!%p3844_p7), 64   ;;  %vm497_vm4 = vcmask (!%p3844_p7), 64512   ;;  %v4744_v10 = vmov (!%p3844_p7), 0   ;;  %vm519_vm5 = vcmask (!%p3844_p7), 7168  }
  0xf1   : > { %3966 = vmatprep.mubr.msk.f32.mxu0 (!%p3844_p7), %vm4742_vm2, %v4741_v3  ;;  %3969 = vmatprep.subr.mxu1 (!%p3844_p7), %v4741_v3  ;;  %s4745_s15 = smov (!%p3844_p7), 112   ;;  %s4746_s2 = smov (!%p3844_p7), 56   ;;  %v513_v38 = vld [vmem:[#allocation6] sm:$0xff] (!%p3844_p7) }
  0xf2   : > { %3971 = vmatprep.mubr.msk.f32.mxu1 (!%p3844_p7), %vm4742_vm2, %v4741_v3  ;;  %529 = vrot.lane.b32.xlu1 (!%p3844_p7), %v5278_v6, %s4743_s9  ;;  %v5285_v12 = vld [vmem:[#allocation4] sm:$0xff] (!%p3844_p7)  ;;  %s4747_s7 = smov (!%p3844_p7), 92   ;;  %s4748_s5 = smov (!%p3844_p7), 124  }
  0xf3   : > { %4338 = vset.pattern.permute.xlu1 (!%p3844_p7), %v4744_v10  ;;  %4339 = vset.pattern.permute.xlu0 (!%p3844_p7), %v4744_v10  ;;  %s4749_s23 = smov (!%p3844_p7), 88   ;;  %s4750_s20 = smov (!%p3844_p7), 120  }
  0xf4   : > { %s4751_s8 = smov (!%p3844_p7), 84   ;;  %s4752_s9 = smov (!%p3844_p7), 116   ;;  %v690_v1 = vld [vmem:[#allocation5] sm:$0xff] (!%p3844_p7) }
  0xf5   : > { %s4755_s27 = smov (!%p3844_p7), 108  }
 0x162   : > { %v419_v4 = vpop.permute.xlu0 %418 }
 0x163   : > { %3965 = vmatpush3.xpose.msk.msra.mxu0 %vm420_vm3, %v419_v4 }
 0x164   : > { %3979 = vmatprep.subr.mxu0 %v4741_v3  ;;  %v530_v11 = vpop.permute.xlu1 %529 }
 0x165   : > { %3970 = vmatpush3.msra.mxu1 %v530_v11 }
 0x166   : > { %3967 = vmatmul.mubr.msk.f32.vlgmr.msra.gmra.mrb[0].mxu0 %vm420_vm3, %v415_v5  ;;  %3974 = vmatprep.subr.mxu1 %v4741_v3 }
 0x167   : > { %3981 = vmatprep.mubr.msk.f32.mxu0 %vm4742_vm2, %v4741_v3  ;;  %3980 = vmatpush3.msra.mxu0 %v530_v11  ;;  %v1075_v11 = vld [vmem:[#allocation5 + $0x8] sm:$0xff] }
 0x168   : > { %3989 = vmatprep.subr.mxu0 %v4741_v3 }
 0x239   : > { %v492_v7 = vpop.f32.mrb[0].mxu0 }
 0x23a   : > { %v3968_v8 = vpop.f32.mrb[1].mxu0  ;;  %v498_v9 = vsel %vm497_vm4, %v492_v7, -inf }
 0x23b   : > { %499 = vmax.xlane.f32.xlu0 %v498_v9 }
 0x251   : > { %1187 = vrot.lane.b32.xlu0 %v415_v5, %s4745_s15  ;;  %s4753_s15 = smov 80  }
 0x255   : > { %913 = vrot.lane.b32.xlu0 %v5278_v6, %s4746_s2  ;;  %s4754_s2 = smov 76  }
 0x2c8   : > { %v500_v13 = vpop.xlane.xlu0 %499 }
 0x2c9   : > { %v5288_v14 = vmax.f32 %v5285_v12, %v500_v13 }
 0x2cb   : > { %v502_v15 = vsub.f32 %v5285_v12, %v5288_v14  ;;  %607 = vst.msk [vmem:[#allocation4] sm:$0xff] %vm519_vm5, %v5288_v14  ;;  %507 = vperm.xlu1 %4338, %v5288_v14  }
 0x2cc   : > { %v1188_v28 = vpop.permute.xlu0 %1187 }
 0x2cd   : > { %v503_v35 = vmul.f32 1.442695, %v502_v15  ;;  %v1267_v15 = vld [vmem:[#allocation4 + $0x10] sm:$0xff] }
 0x2cf   : > { %614 = vrot.lane.b32.xlu1 %v5260_v2, %s4747_s7  ;;  %s4756_s7 = smov 72  }
 0x2d0   : > { %v5341_v36 = vpop.permute.xlu0 %913 }
 0x2d3   : > { %611 = vrot.lane.b32.xlu1 %v415_v5, %s4748_s5  ;;  %s4757_s5 = smov 104  }
 0x2d7   : > { %803 = vrot.lane.b32.xlu1 %v5260_v2, %s4749_s23  ;;  %s4758_s23 = smov 68  }
 0x2db   : > { %800 = vrot.lane.b32.xlu1 %v415_v5, %s4750_s20  ;;  %s4759_s20 = smov 100  }
 0x2df   : > { %998 = vrot.lane.b32.xlu1 %v5260_v2, %s4751_s8  ;;  %s4761_s8 = smov 40  }
 0x2e3   : > { %995 = vrot.lane.b32.xlu1 %v415_v5, %s4752_s9 }
 0x2e7   : > { %1190 = vrot.lane.b32.xlu1 %v5260_v2, %s4753_s15 }
 0x2eb   : > { %1385 = vrot.lane.b32.xlu1 %v5260_v2, %s4754_s2 }
 0x2ef   : > { %1382 = vrot.lane.b32.xlu1 %v415_v5, %s4755_s27  ;;  %s4760_s27 = smov 48  }
 0x2f3   : > { %1577 = vrot.lane.b32.xlu1 %v5260_v2, %s4756_s7 }
 0x2f7   : > { %1574 = vrot.lane.b32.xlu1 %v415_v5, %s4757_s5 }
 0x2fb   : > { %1772 = vrot.lane.b32.xlu1 %v5260_v2, %s4758_s23 }
 0x2ff   : > { %1769 = vrot.lane.b32.xlu1 %v415_v5, %s4759_s20  ;;  %v880_v5 = vld [vmem:[#allocation4 + $0x8] sm:$0xff] }
 0x34a   : > { %v508_v16 = vpop.permute.xlu1 %507 }
 0x34b   : > { %v510_v17 = vsub.f32 %v492_v7, %v508_v16 }
 0x34d   : > { %v511_v18 = vmul.f32 1.442695, %v510_v17 }
 0x34e   : > { %v615_v19 = vpop.permute.xlu1 %614 }
 0x34f   : > { %4340 = vpow2.f32 %v511_v18 }
 0x350   : > { %4342 = vpow2.f32 %v503_v35 }
 0x352   : > { %v612_v20 = vpop.permute.xlu1 %611 }
 0x356   : > { %v804_v21 = vpop.permute.xlu1 %803 }
 0x359   : > { %v4341_v22 = vpop.eup %4340 }
 0x35a   : > { %3972 = vmatmul.mubr.msk.f32.vlgmr.msra.gmra.mrb[0].mxu1 %vm497_vm4, %v4341_v22  ;;  %v801_v23 = vpop.permute.xlu1 %800  ;;  %v515_v24 = vsel %vm497_vm4, %v4341_v22, 0.0  ;;  %v4343_v37 = vpop.eup %4342 }
 0x35b   : > { %3975 = vmatpush3.xpose.msk.msra.mxu1 %vm420_vm3, %v615_v19  ;;  %516 = vadd.xlane.f32.xlu0 %v515_v24  ;;  %v514_v39 = vmul.f32 %v4343_v37, %v513_v38 }
 0x35c   : > { %3976 = vmatprep.mubr.msk.f32.mxu1 %vm4742_vm2, %v4741_v3  ;;  %3984 = vmatprep.subr.mxu1 %v4741_v3 }
 0x35e   : > { %3977 = vmatmul.mubr.msk.f32.vlgmr.msra.gmra.mrb[2].mxu1 %vm420_vm3, %v612_v20  ;;  %v999_v25 = vpop.permute.xlu1 %998 }
 0x35f   : > { %3985 = vmatpush3.xpose.msk.msra.mxu1 %vm420_vm3, %v804_v21  ;;  %3986 = vmatprep.mubr.msk.f32.mxu1 %vm4742_vm2, %v4741_v3  ;;  %v1462_v21 = vld [vmem:[#allocation5 + $0x10] sm:$0xff] }
 0x360   : > { %3994 = vmatprep.subr.mxu1 %v4741_v3 }
 0x362   : > { %3987 = vmatmul.mubr.msk.f32.vlgmr.msra.gmra.mrb[4].mxu1 %vm420_vm3, %v801_v23  ;;  %v996_v26 = vpop.permute.xlu1 %995 }
 0x363   : > { %3995 = vmatpush3.xpose.msk.msra.mxu1 %vm420_vm3, %v999_v25  ;;  %3996 = vmatprep.mubr.msk.f32.mxu1 %vm4742_vm2, %v4741_v3 }
 0x364   : > { %4004 = vmatprep.subr.mxu1 %v4741_v3 }
 0x366   : > { %3997 = vmatmul.mubr.msk.f32.vlgmr.msra.gmra.mrb[6].mxu1 %vm420_vm3, %v996_v26  ;;  %v1191_v27 = vpop.permute.xlu1 %1190 }
 0x367   : > { %4005 = vmatpush3.xpose.msk.msra.mxu1 %vm420_vm3, %v1191_v27  ;;  %4006 = vmatprep.mubr.msk.f32.mxu1 %vm4742_vm2, %v4741_v3  ;;  %v1654_v27 = vld [vmem:[#allocation4 + $0x18] sm:$0xff] }
 0x368   : > { %4014 = vmatprep.subr.mxu1 %v4741_v3 }
 0x36a   : > { %4007 = vmatmul.mubr.msk.f32.vlgmr.msra.gmra.mrb[8].mxu1 %vm420_vm3, %v1188_v28  ;;  %v1386_v29 = vpop.permute.xlu1 %1385 }
 0x36b   : > { %4015 = vmatpush3.xpose.msk.msra.mxu1 %vm420_vm3, %v1386_v29  ;;  %4016 = vmatprep.mubr.msk.f32.mxu1 %vm4742_vm2, %v4741_v3 }
 0x36c   : > { %4024 = vmatprep.subr.mxu1 %v4741_v3 }
 0x36e   : > { %v1383_v30 = vpop.permute.xlu1 %1382 }
 0x36f   : > { %4017 = vmatmul.mubr.msk.f32.vlgmr.msra.gmra.mrb[10].mxu1 %vm420_vm3, %v1383_v30 }
 0x370   : > { %4026 = vmatprep.mubr.msk.f32.mxu1 %vm4742_vm2, %v4741_v3 }
 0x372   : > { %v1578_v31 = vpop.permute.xlu1 %1577 }
 0x373   : > { %4025 = vmatpush3.xpose.msk.msra.mxu1 %vm420_vm3, %v1578_v31 }
 0x374   : > { %4034 = vmatprep.subr.mxu1 %v4741_v3 }
 0x376   : > { %v1575_v32 = vpop.permute.xlu1 %1574 }
 0x377   : > { %4027 = vmatmul.mubr.msk.f32.vlgmr.msra.gmra.mrb[12].mxu1 %vm420_vm3, %v1575_v32 }
 0x378   : > { %4036 = vmatprep.mubr.msk.f32.mxu1 %vm4742_vm2, %v4741_v3 }
 0x37a   : > { %v1773_v33 = vpop.permute.xlu1 %1772 }
 0x37b   : > { %4035 = vmatpush3.xpose.msk.msra.mxu1 %vm420_vm3, %v1773_v33 }
 0x37e   : > { %v1770_v34 = vpop.permute.xlu1 %1769 }
 0x37f   : > { %4037 = vmatmul.mubr.msk.f32.vlgmr.msra.gmra.mrb[14].mxu1 %vm420_vm3, %v1770_v34 }
 0x3e8   : > { %v517_v40 = vpop.xlane.xlu0 %516 }
 0x3e9   : > { %v518_v41 = vadd.f32 %v517_v40, %v514_v39  ;;  %v521_v40 = vld [vmem:[#allocation2] sm:$0xff] }
 0x3eb   : > { %520 = vst.msk [vmem:[#allocation6] sm:$0xff] %vm519_vm5, %v518_v41 }
 0x42d   : > { %v5344_v42 = vpop.f32.mrb[0].mxu1 }
 0x42e   : > { %v3973_v43 = vpop.f32.mrb[1].mxu1 }
 0x431   : > { %v5346_v44 = vpop.f32.mrb[2].mxu1 }
 0x432   : > { %v3978_v45 = vpop.f32.mrb[3].mxu1  ;;  %v691_v46 = vsel %vm497_vm4, %v5346_v44, -inf }
 0x433   : > { %692 = vmax.xlane.f32.xlu1 %v691_v46 }
 0x435   : > { %v5350_v47 = vpop.f32.mrb[4].mxu1 }
 0x436   : > { %v3988_v48 = vpop.f32.mrb[5].mxu1  ;;  %v881_v49 = vsel %vm497_vm4, %v5350_v47, -inf }
 0x437   : > { %882 = vmax.xlane.f32.xlu1 %v881_v49 }
 0x439   : > { %v5354_v50 = vpop.f32.mrb[6].mxu1 }
 0x43a   : > { %v3998_v51 = vpop.f32.mrb[7].mxu1  ;;  %v1076_v52 = vsel %vm497_vm4, %v5354_v50, -inf }
 0x43b   : > { %1077 = vmax.xlane.f32.xlu1 %v1076_v52 }
 0x43d   : > { %v5358_v53 = vpop.f32.mrb[8].mxu1 }
 0x43e   : > { %v1268_v54 = vsel %vm497_vm4, %v5358_v53, -inf  ;;  %v4008_v55 = vpop.f32.mrb[9].mxu1 }
 0x43f   : > { %1269 = vmax.xlane.f32.xlu0 %v1268_v54 }
 0x442   : > { %v5362_v56 = vpop.f32.mrb[10].mxu1 }
 0x443   : > { %v4018_v57 = vpop.f32.mrb[11].mxu1  ;;  %v1463_v58 = vsel %vm497_vm4, %v5362_v56, -inf }
 0x444   : > { %1464 = vmax.xlane.f32.xlu1 %v1463_v58 }
 0x44a   : > { %v5366_v59 = vpop.f32.mrb[12].mxu1 }
 0x44b   : > { %v4028_v60 = vpop.f32.mrb[13].mxu1  ;;  %v1655_v61 = vsel %vm497_vm4, %v5366_v59, -inf }
 0x44c   : > { %1656 = vmax.xlane.f32.xlu1 %v1655_v61 }
 0x452   : > { %v5370_v62 = vpop.f32.mrb[14].mxu1 }
 0x453   : > { %v4038_v63 = vpop.f32.mrb[15].mxu1  ;;  %v1850_v0 = vsel %vm497_vm4, %v5370_v62, -inf }
 0x454   : > { %1851 = vmax.xlane.f32.xlu1 %v1850_v0 }
 0x465   : > { %524 = vperm.xlu1 %4338, %v4343_v37   ;;  %v5389_v37 = vld [vmem:[#allocation5 + $0x18] sm:$0xff] }
 0x4c0   : > { %v693_v2 = vpop.xlane.xlu1 %692 }
 0x4c1   : > { %v694_v4 = vmax.f32 %v690_v1, %v693_v2 }
 0x4c3   : > { %v695_v7 = vsub.f32 %v690_v1, %v694_v4  ;;  %795 = vst.msk [vmem:[#allocation5] sm:$0xff] %vm519_vm5, %v694_v4  ;;  %700 = vperm.xlu0 %4339, %v694_v4  }
 0x4c4   : > { %v883_v8 = vpop.xlane.xlu1 %882 }
 0x4c5   : > { %v696_v9 = vmul.f32 1.442695, %v695_v7  ;;  %v884_v10 = vmax.f32 %v880_v5, %v883_v8 }
 0x4c7   : > { %4344 = vpow2.f32 %v696_v9  ;;  %v885_v12 = vsub.f32 %v880_v5, %v884_v10  ;;  %991 = vst.msk [vmem:[#allocation4 + $0x8] sm:$0xff] %vm519_vm5, %v884_v10  ;;  %890 = vperm.xlu0 %4339, %v884_v10  }
 0x4c8   : > { %v1078_v13 = vpop.xlane.xlu1 %1077 }
 0x4c9   : > { %v1079_v14 = vmax.f32 %v1075_v11, %v1078_v13  ;;  %v886_v16 = vmul.f32 1.442695, %v885_v12 }
 0x4cb   : > { %v1080_v17 = vsub.f32 %v1075_v11, %v1079_v14  ;;  %1182 = vst.msk [vmem:[#allocation5 + $0x8] sm:$0xff] %vm519_vm5, %v1079_v14  ;;  %1085 = vperm.xlu0 %4339, %v1079_v14   ;;  %4346 = vpow2.f32 %v886_v16 }
 0x4cc   : > { %v1270_v18 = vpop.xlane.xlu0 %1269 }
 0x4cd   : > { %v1271_v19 = vmax.f32 %v1267_v15, %v1270_v18  ;;  %v1081_v20 = vmul.f32 1.442695, %v1080_v17 }
 0x4cf   : > { %1378 = vst.msk [vmem:[#allocation4 + $0x10] sm:$0xff] %vm519_vm5, %v1271_v19  ;;  %1277 = vperm.xlu0 %4339, %v1271_v19   ;;  %4348 = vpow2.f32 %v1081_v20  ;;  %v1272_v25 = vsub.f32 %v1267_v15, %v1271_v19 }
 0x4d1   : > { %v5378_v22 = vpop.eup %4344  ;;  %v1465_v23 = vpop.xlane.xlu1 %1464  ;;  %v1273_v28 = vmul.f32 1.442695, %v1272_v25 }
 0x4d2   : > { %v1466_v24 = vmax.f32 %v1462_v21, %v1465_v23  ;;  %716 = vperm.xlu1 %4338, %v5378_v22  }
 0x4d3   : > { %4350 = vpow2.f32 %v1273_v28 }
 0x4d4   : > { %1569 = vst.msk [vmem:[#allocation5 + $0x10] sm:$0xff] %vm519_vm5, %v1466_v24  ;;  %v1467_v26 = vsub.f32 %v1462_v21, %v1466_v24 }
 0x4d5   : > { %v5382_v29 = vpop.eup %4346 }
 0x4d6   : > { %1472 = vperm.xlu1 %4338, %v1466_v24   ;;  %v1468_v30 = vmul.f32 1.442695, %v1467_v26 }
 0x4d8   : > { %4352 = vpow2.f32 %v1468_v30  ;;  %v706_v30 = vld [vmem:[#allocation7] sm:$0xff] }
 0x4d9   : > { %v1657_v31 = vpop.xlane.xlu1 %1656  ;;  %v5386_v34 = vpop.eup %4348 }
 0x4da   : > { %v1658_v32 = vmax.f32 %v1654_v27, %v1657_v31  ;;  %908 = vperm.xlu1 %4338, %v5382_v29   ;;  %v707_v31 = vmul.f32 %v5378_v22, %v706_v30 }
 0x4dc   : > { %v1659_v33 = vsub.f32 %v1654_v27, %v1658_v32  ;;  %1765 = vst.msk [vmem:[#allocation4 + $0x18] sm:$0xff] %vm519_vm5, %v1658_v32  ;;  %1664 = vperm.xlu0 %4339, %v1658_v32  }
 0x4dd   : > { %v5401_v45 = vpop.eup %4350 }
 0x4de   : > { %v1660_v35 = vmul.f32 1.442695, %v1659_v33  ;;  %1103 = vperm.xlu1 %4338, %v5386_v34   ;;  %v897_v33 = vld [vmem:[#allocation6 + $0x8] sm:$0xff] }
 0x4e0   : > { %4354 = vpow2.f32 %v1660_v35  ;;  %1300 = vrot.lane.b32.xlu0 %v5278_v6, %s4760_s27 }
 0x4e1   : > { %v1852_v38 = vpop.xlane.xlu1 %1851 }
 0x4e2   : > { %v5393_v39 = vmax.f32 %v5389_v37, %v1852_v38  ;;  %v5403_v48 = vpop.eup %4352 }
 0x4e4   : > { %v1854_v41 = vsub.f32 %v5389_v37, %v5393_v39  ;;  %1956 = vst.msk [vmem:[#allocation5 + $0x18] sm:$0xff] %vm519_vm5, %v5393_v39  ;;  %1687 = vrot.lane.b32.xlu0 %v5278_v6, %s4761_s8  ;;  %1859 = vperm.xlu1 %4338, %v5393_v39   ;;  %v898_v37 = vmul.f32 %v5382_v29, %v897_v33  ;;  %v1092_v39 = vld [vmem:[#allocation7 + $0x8] sm:$0xff] }
 0x4e5   : > { %v525_v43 = vpop.permute.xlu1 %524 }
 0x4e6   : > { %v527_v46 = vmul.f32 %v525_v43, %v521_v40  ;;  %v1855_v24 = vmul.f32 1.442695, %v1854_v41  ;;  %v1093_v41 = vmul.f32 %v5386_v34, %v1092_v39 }
 0x4e8   : > { %v605_v49 = vadd.f32 %v5344_v42, %v527_v46  ;;  %1295 = vperm.xlu0 %4339, %v5401_v45   ;;  %1490 = vperm.xlu1 %4338, %v5403_v48   ;;  %v1284_v46 = vld [vmem:[#allocation6 + $0x10] sm:$0xff] }
 0x4e9   : > { %v1285_v22 = vmul.f32 %v5401_v45, %v1284_v46 }
 0x4ea   : > { %v5408_v51 = vpop.eup %4354  ;;  %606 = vst.msk [vmem:[#allocation2] sm:$0xff] %vm497_vm4, %v605_v49 }
 0x4ec   : > { %1682 = vperm.xlu0 %4339, %v5408_v51  }
 0x542   : > { %v701_v6 = vpop.permute.xlu0 %700 }
 0x543   : > { %v703_v52 = vsub.f32 %v5346_v44, %v701_v6 }
 0x545   : > { %v704_v54 = vmul.f32 1.442695, %v703_v52 }
 0x546   : > { %v891_v55 = vpop.permute.xlu0 %890 }
 0x547   : > { %4356 = vpow2.f32 %v704_v54  ;;  %v893_v57 = vsub.f32 %v5350_v47, %v891_v55  ;;  %v1479_v54 = vld [vmem:[#allocation7 + $0x10] sm:$0xff] }
 0x548   : > { %v1480_v29 = vmul.f32 %v5403_v48, %v1479_v54 }
 0x549   : > { %v894_v58 = vmul.f32 1.442695, %v893_v57 }
 0x54a   : > { %v1086_v42 = vpop.permute.xlu0 %1085 }
 0x54b   : > { %4358 = vpow2.f32 %v894_v58  ;;  %v1088_v60 = vsub.f32 %v5354_v50, %v1086_v42  ;;  %v1671_v58 = vld [vmem:[#allocation6 + $0x18] sm:$0xff] }
 0x54c   : > { %v1672_v34 = vmul.f32 %v5408_v51, %v1671_v58  ;;  %v1100_v51 = vld [vmem:[#allocation3 + $0x8] sm:$0xff] }
 0x54d   : > { %v1089_v61 = vmul.f32 1.442695, %v1088_v60 }
 0x54e   : > { %v1278_v63 = vpop.permute.xlu0 %1277 }
 0x54f   : > { %4360 = vpow2.f32 %v1089_v61  ;;  %v1280_v0 = vsub.f32 %v5358_v53, %v1278_v63  ;;  %v1866_v61 = vld [vmem:[#allocation7 + $0x18] sm:$0xff] }
 0x551   : > { %v4357_v1 = vpop.eup %4356  ;;  %v1281_v2 = vmul.f32 1.442695, %v1280_v0  ;;  %v5416_v4 = vpop.permute.xlu1 %716 }
 0x552   : > { %3982 = vmatmul.mubr.msk.f32.vlgmr.msra.gmra.mrb[2].mxu0 %vm497_vm4, %v4357_v1  ;;  %v708_v44 = vsel %vm497_vm4, %v4357_v1, 0.0  ;;  %v713_v1 = vld [vmem:[#allocation3] sm:$0xff] }
 0x553   : > { %4362 = vpow2.f32 %v1281_v2  ;;  %3990 = vmatpush3.msra.mxu0 %v5341_v36  ;;  %709 = vadd.xlane.f32.xlu1 %v708_v44  ;;  %v719_v48 = vmul.f32 %v5416_v4, %v713_v1  ;;  %v905_v2 = vld [vmem:[#allocation2 + $0x8] sm:$0xff]  ;;  %v1292_v4 = vld [vmem:[#allocation2 + $0x10] sm:$0xff] }
 0x554   : > { %3991 = vmatprep.mubr.msk.f32.mxu0 %vm4742_vm2, %v4741_v3  ;;  %3999 = vmatprep.subr.mxu0 %v4741_v3 }
 0x555   : > { %v4359_v47 = vpop.eup %4358  ;;  %v1473_v50 = vpop.permute.xlu1 %1472 }
 0x556   : > { %v1475_v53 = vsub.f32 %v5362_v56, %v1473_v50  ;;  %3992 = vmatmul.mubr.msk.f32.vlgmr.msra.gmra.mrb[4].mxu0 %vm497_vm4, %v4359_v47  ;;  %v899_v5 = vsel %vm497_vm4, %v4359_v47, 0.0 }
 0x557   : > { %4000 = vmatpush3.msra.mxu0 %v5341_v36  ;;  %900 = vadd.xlane.f32.xlu0 %v899_v5 }
 0x558   : > { %v1476_v7 = vmul.f32 1.442695, %v1475_v53  ;;  %4001 = vmatprep.mubr.msk.f32.mxu0 %vm4742_vm2, %v4741_v3  ;;  %4009 = vmatprep.subr.mxu0 %v4741_v3 }
 0x559   : > { %v4361_v8 = vpop.eup %4360  ;;  %v5431_v9 = vpop.permute.xlu1 %908 }
 0x55a   : > { %4364 = vpow2.f32 %v1476_v7  ;;  %4002 = vmatmul.mubr.msk.f32.vlgmr.msra.gmra.mrb[6].mxu0 %vm497_vm4, %v4361_v8  ;;  %v1094_v56 = vsel %vm497_vm4, %v4361_v8, 0.0  ;;  %v911_v53 = vmul.f32 %v5431_v9, %v905_v2 }
 0x55b   : > { %v1665_v10 = vpop.permute.xlu0 %1664  ;;  %1095 = vadd.xlane.f32.xlu1 %v1094_v56  ;;  %4011 = vmatprep.mubr.msk.f32.mxu0 %vm4742_vm2, %v4741_v3 }
 0x55c   : > { %v1667_v36 = vsub.f32 %v5366_v59, %v1665_v10 }
 0x55d   : > { %v4363_v11 = vpop.eup %4362  ;;  %v5439_v14 = vpop.permute.xlu1 %1103 }
 0x55e   : > { %v1668_v12 = vmul.f32 1.442695, %v1667_v36  ;;  %v1286_v13 = vsel %vm497_vm4, %v4363_v11, 0.0  ;;  %v1106_v56 = vmul.f32 %v5439_v14, %v1100_v51  ;;  %v1679_v14 = vld [vmem:[#allocation2 + $0x18] sm:$0xff] }
 0x55f   : > { %v1301_v15 = vpop.permute.xlu0 %1300  ;;  %1287 = vadd.xlane.f32.xlu1 %v1286_v13  ;;  %v1487_v13 = vld [vmem:[#allocation3 + $0x10] sm:$0xff] }
 0x560   : > { %4366 = vpow2.f32 %v1668_v12  ;;  %4010 = vmatpush3.msra.mxu0 %v1301_v15 }
 0x561   : > { %4012 = vmatmul.mubr.msk.f32.vlgmr.msra.gmra.mrb[8].mxu0 %vm497_vm4, %v4363_v11  ;;  %4019 = vmatprep.subr.mxu0 %v4741_v3 }
 0x562   : > { %4020 = vmatpush3.msra.mxu0 %v1301_v15  ;;  %4021 = vmatprep.mubr.msk.f32.mxu0 %vm4742_vm2, %v4741_v3 }
 0x563   : > { %v1860_v16 = vpop.permute.xlu1 %1859  ;;  %4029 = vmatprep.subr.mxu0 %v4741_v3  ;;  %v1688_v18 = vpop.permute.xlu0 %1687 }
 0x564   : > { %v4365_v59 = vpop.eup %4364  ;;  %v1862_v17 = vsub.f32 %v5370_v62, %v1860_v16 }
 0x565   : > { %4022 = vmatmul.mubr.msk.f32.vlgmr.msra.gmra.mrb[10].mxu0 %vm497_vm4, %v4365_v59  ;;  %v1481_v19 = vsel %vm497_vm4, %v4365_v59, 0.0 }
 0x566   : > { %v1863_v20 = vmul.f32 1.442695, %v1862_v17  ;;  %1482 = vadd.xlane.f32.xlu0 %v1481_v19  ;;  %4030 = vmatpush3.msra.mxu0 %v1688_v18 }
 0x567   : > { %4031 = vmatprep.mubr.msk.f32.mxu0 %vm4742_vm2, %v4741_v3  ;;  %4039 = vmatprep.subr.mxu0 %v4741_v3  ;;  %v1296_v27 = vpop.permute.xlu0 %1295  ;;  %v1491_v28 = vpop.permute.xlu1 %1490 }
 0x568   : > { %4368 = vpow2.f32 %v1863_v20  ;;  %v1298_v12 = vmul.f32 %v1296_v27, %v1292_v4  ;;  %v1493_v59 = vmul.f32 %v1491_v28, %v1487_v13 }
 0x569   : > { %4370 = vpow2.f32 %v1855_v24  ;;  %v1874_v24 = vld [vmem:[#allocation3 + $0x18] sm:$0xff] }
 0x56a   : > { %v4367_v21 = vpop.eup %4366 }
 0x56b   : > { %4032 = vmatmul.mubr.msk.f32.vlgmr.msra.gmra.mrb[12].mxu0 %vm497_vm4, %v4367_v21  ;;  %v1673_v23 = vsel %vm497_vm4, %v4367_v21, 0.0  ;;  %v5462_v32 = vpop.permute.xlu0 %1682 }
 0x56c   : > { %4040 = vmatpush3.msra.mxu0 %v1688_v18  ;;  %1674 = vadd.xlane.f32.xlu0 %v1673_v23  ;;  %v1685_v20 = vmul.f32 %v5462_v32, %v1679_v14 }
 0x56d   : > { %4041 = vmatprep.mubr.msk.f32.mxu0 %vm4742_vm2, %v4741_v3 }
 0x572   : > { %v4369_v62 = vpop.eup %4368 }
 0x573   : > { %4042 = vmatmul.mubr.msk.f32.vlgmr.msra.gmra.mrb[14].mxu0 %vm497_vm4, %v4369_v62  ;;  %v1868_v25 = vsel %vm497_vm4, %v4369_v62, 0.0  ;;  %v4371_v26 = vpop.eup %4370 }
 0x574   : > { %1869 = vadd.xlane.f32.xlu1 %v1868_v25  ;;  %v1867_v45 = vmul.f32 %v4371_v26, %v1866_v61 }
 0x582   : > { %1877 = vperm.xlu0 %4339, %v4371_v26  }
 0x5e0   : > { %v710_v3 = vpop.xlane.xlu1 %709 }
 0x5e1   : > { %v711_v35 = vadd.f32 %v710_v3, %v707_v31 }
 0x5e3   : > { %712 = vst.msk [vmem:[#allocation7] sm:$0xff] %vm519_vm5, %v711_v35 }
 0x5e4   : > { %v901_v38 = vpop.xlane.xlu0 %900 }
 0x5e5   : > { %v902_v40 = vadd.f32 %v901_v38, %v898_v37 }
 0x5e7   : > { %903 = vst.msk [vmem:[#allocation6 + $0x8] sm:$0xff] %vm519_vm5, %v902_v40 }
 0x5e8   : > { %v1096_v43 = vpop.xlane.xlu1 %1095 }
 0x5e9   : > { %v1097_v49 = vadd.f32 %v1096_v43, %v1093_v41 }
 0x5eb   : > { %1098 = vst.msk [vmem:[#allocation7 + $0x8] sm:$0xff] %vm519_vm5, %v1097_v49 }
 0x5ec   : > { %v1288_v6 = vpop.xlane.xlu1 %1287 }
 0x5ed   : > { %v1289_v52 = vadd.f32 %v1288_v6, %v1285_v22 }
 0x5ef   : > { %1290 = vst.msk [vmem:[#allocation6 + $0x10] sm:$0xff] %vm519_vm5, %v1289_v52 }
 0x5f3   : > { %v1483_v55 = vpop.xlane.xlu0 %1482 }
 0x5f4   : > { %v1484_v57 = vadd.f32 %v1483_v55, %v1480_v29 }
 0x5f6   : > { %1485 = vst.msk [vmem:[#allocation7 + $0x10] sm:$0xff] %vm519_vm5, %v1484_v57 }
 0x5f9   : > { %v1675_v42 = vpop.xlane.xlu0 %1674 }
 0x5fa   : > { %v1676_v60 = vadd.f32 %v1675_v42, %v1672_v34 }
 0x5fc   : > { %1677 = vst.msk [vmem:[#allocation6 + $0x18] sm:$0xff] %vm519_vm5, %v1676_v60 }
 0x601   : > { %v1870_v63 = vpop.xlane.xlu1 %1869  ;;  %v1878_v25 = vpop.permute.xlu0 %1877 }
 0x602   : > { %v1871_v0 = vadd.f32 %v1870_v63, %v1867_v45  ;;  %v1880_v26 = vmul.f32 %v1878_v25, %v1874_v24 }
 0x604   : > { %1872 = vst.msk [vmem:[#allocation7 + $0x18] sm:$0xff] %vm519_vm5, %v1871_v0 }
 0x625   : > { %v789_v44 = vpop.f32.mrb[2].mxu0 }
 0x626   : > { %v793_v47 = vadd.f32 %v789_v44, %v719_v48  ;;  %v3983_v50 = vpop.f32.mrb[3].mxu0 }
 0x628   : > { %794 = vst.msk [vmem:[#allocation3] sm:$0xff] %vm497_vm4, %v793_v47 }
 0x629   : > { %v985_v5 = vpop.f32.mrb[4].mxu0 }
 0x62a   : > { %v989_v7 = vadd.f32 %v985_v5, %v911_v53  ;;  %v3993_v8 = vpop.f32.mrb[5].mxu0 }
 0x62c   : > { %990 = vst.msk [vmem:[#allocation2 + $0x8] sm:$0xff] %vm497_vm4, %v989_v7 }
 0x62d   : > { %v1176_v10 = vpop.f32.mrb[6].mxu0 }
 0x62e   : > { %v1180_v36 = vadd.f32 %v1176_v10, %v1106_v56  ;;  %v4003_v11 = vpop.f32.mrb[7].mxu0 }
 0x630   : > { %1181 = vst.msk [vmem:[#allocation3 + $0x8] sm:$0xff] %vm497_vm4, %v1180_v36 }
 0x634   : > { %v1372_v15 = vpop.f32.mrb[8].mxu0 }
 0x635   : > { %v1376_v9 = vadd.f32 %v1372_v15, %v1298_v12  ;;  %v4013_v16 = vpop.f32.mrb[9].mxu0 }
 0x637   : > { %1377 = vst.msk [vmem:[#allocation2 + $0x10] sm:$0xff] %vm497_vm4, %v1376_v9 }
 0x638   : > { %v1563_v17 = vpop.f32.mrb[10].mxu0 }
 0x639   : > { %v1567_v18 = vadd.f32 %v1563_v17, %v1493_v59  ;;  %v4023_v19 = vpop.f32.mrb[11].mxu0 }
 0x63b   : > { %1568 = vst.msk [vmem:[#allocation3 + $0x10] sm:$0xff] %vm497_vm4, %v1567_v18 }
 0x63e   : > { %v1759_v21 = vpop.f32.mrb[12].mxu0 }
 0x63f   : > { %v1763_v23 = vadd.f32 %v1759_v21, %v1685_v20  ;;  %v4033_v62 = vpop.f32.mrb[13].mxu0 }
 0x641   : > { %1764 = vst.msk [vmem:[#allocation2 + $0x18] sm:$0xff] %vm497_vm4, %v1763_v23 }
 0x646   : > { %v1950_v27 = vpop.f32.mrb[14].mxu0 }
 0x647   : > { %v1954_v28 = vadd.f32 %v1950_v27, %v1880_v26  ;;  %v4043_v30 = vpop.f32.mrb[15].mxu0 }
 0x649   : > { %1955 = vst.msk [vmem:[#allocation3 + $0x18] sm:$0xff] %vm497_vm4, %v1954_v28 }
 0x64a PF: > { %p3869_p4 = scmp.ne.s32.totalorder %s5236_s30, %s5230_s28 }
 0x64b   : > { %v5491_v31 = vld [vmem:[%s323_s11] sm:$0xff] (!%p3869_p4)  ;;  %s4762_s9 = smov (!%p3869_p4), 96   ;;  %v4763_v32 = vmov (!%p3869_p4), 0.0   ;;  %vm4764_vm6 = vmmov (!%p3869_p4), 0   ;;  %vm1973_vm7 = vcmask (!%p3869_p4), 31744   ;;  %v1968_v33 = vld [vmem:[%s314_s12] sm:$0xff] (!%p3869_p4)  ;;  %v1961_v37 = vlaneseq (!%p3869_p4) }
 0x64c   : > { %1960 = sbr.rel (%p3869_p4) target bundleno = 3355 (0xd1b), region = 72  ;;  %1971 = vrot.lane.b32.xlu0 (!%p3869_p4), %v5491_v31, %s4762_s9  ;;  %4044 = vmatprep.subr.mxu0 (!%p3869_p4), %v4763_v32  ;;  %v5509_v35 = vld [vmem:[%s332_s26] sm:$0xff] (!%p3869_p4)  ;;  %s4765_s1 = smov (!%p3869_p4), 64   ;;  %vm2050_vm9 = vcmask (!%p3869_p4), 64512   ;;  %v4766_v22 = vmov (!%p3869_p4), 0   ;;  %vm2072_vm10 = vcmask (!%p3869_p4), 7168  }
 0x64d   : > { %4046 = vmatprep.mubr.msk.f32.mxu0 (!%p3869_p4), %vm4764_vm6, %v4763_v32  ;;  %4049 = vmatprep.subr.mxu1 (!%p3869_p4), %v4763_v32  ;;  %v1962_v38 = vshrl.u32 (!%p3869_p4), %v1961_v37, 7  ;;  %v1964_v39 = vand.u32 (!%p3869_p4), 127, %v1961_v37  ;;  %s4767_s19 = smov (!%p3869_p4), 112   ;;  %v5519_v52 = vld [vmem:[#allocation4] sm:$0xff] (!%p3869_p4)  ;;  %s4768_s12 = smov (!%p3869_p4), 92   ;;  %vm3655_vm11 = vcmask (!%p3869_p4), 130048  }
 0x64e   : > { %4051 = vmatprep.mubr.msk.f32.mxu1 (!%p3869_p4), %vm4764_vm6, %v4763_v32  ;;  %2082 = vrot.lane.b32.xlu1 (!%p3869_p4), %v5509_v35, %s4765_s1  ;;  %s4769_s11 = smov (!%p3869_p4), 124   ;;  %s4770_s4 = smov (!%p3869_p4), 88   ;;  %v2066_v10 = vld [vmem:[#allocation6] sm:$0xff] (!%p3869_p4)  ;;  %vm3657_vm12 = vcmask (!%p3869_p4), 195584   ;;  %vm3659_vm13 = vcmask (!%p3869_p4), 261120  }
 0x64f   : > { %vm1965_vm8 = vcmp.gt.s32.totalorder (!%p3869_p4), %v1964_v39, %v1962_v38  ;;  %4372 = vset.pattern.permute.xlu1 (!%p3869_p4), %v4766_v22  ;;  %4373 = vset.pattern.permute.xlu0 (!%p3869_p4), %v4766_v22  ;;  %s4771_s26 = smov (!%p3869_p4), 120   ;;  %s4772_s28 = smov (!%p3869_p4), 84   ;;  %v2243_v22 = vld [vmem:[#allocation5] sm:$0xff] (!%p3869_p4) }
 0x650   : > { %v5513_v40 = vsel (!%p3869_p4), %vm1965_vm8, -inf, %v4763_v32  ;;  %s4773_s30 = smov (!%p3869_p4), 116   ;;  %s4774_s15 = smov (!%p3869_p4), 80  }
 0x651   : > { %s4775_s2 = smov (!%p3869_p4), 76   ;;  %s4776_s7 = smov (!%p3869_p4), 108  }
 0x652   : > { %s4777_s5 = smov (!%p3869_p4), 72   ;;  %s4778_s23 = smov (!%p3869_p4), 104  }
 0x653   : > { %s4779_s20 = smov 68   ;;  %s4780_s27 = smov 100  }
 0x654   : > { %s4781_s8 = smov 56   ;;  %s4782_s9 = smov 40  }
 0x655   : > { %s4783_s1 = smov 48  }
 0x6be   : > { %v1972_v3 = vpop.permute.xlu0 %1971 }
 0x6bf   : > { %4045 = vmatpush3.xpose.msk.msra.mxu0 %vm1973_vm7, %v1972_v3 }
 0x6c0   : > { %4059 = vmatprep.subr.mxu0 %v4763_v32  ;;  %v2083_v6 = vpop.permute.xlu1 %2082 }
 0x6c1   : > { %4050 = vmatpush3.msra.mxu1 %v2083_v6 }
 0x6c2   : > { %4047 = vmatmul.mubr.msk.f32.vlgmr.msra.gmra.mrb[0].mxu0 %vm1973_vm7, %v1968_v33  ;;  %4054 = vmatprep.subr.mxu1 %v4763_v32 }
 0x6c3   : > { %4061 = vmatprep.mubr.msk.f32.mxu0 %vm4764_vm6, %v4763_v32  ;;  %4060 = vmatpush3.msra.mxu0 %v2083_v6 }
 0x6c4   : > { %4069 = vmatprep.subr.mxu0 %v4763_v32 }
 0x795   : > { %v2045_v41 = vpop.f32.mrb[0].mxu0 }
 0x796   : > { %v2046_v43 = vadd.f32 %v2045_v41, %v5513_v40  ;;  %v4048_v46 = vpop.f32.mrb[1].mxu0 }
 0x798   : > { %v2051_v49 = vsel %vm2050_vm9, %v2046_v43, -inf }
 0x799   : > { %2052 = vmax.xlane.f32.xlu0 %v2051_v49 }
 0x7af   : > { %2740 = vrot.lane.b32.xlu0 %v1968_v33, %s4767_s19  ;;  %s3510_s19 = sld [smem:[#allocation11]] }
 0x826   : > { %v2053_v54 = vpop.xlane.xlu0 %2052 }
 0x827   : > { %v5522_v29 = vmax.f32 %v5519_v52, %v2053_v54  ;;  %v2433_v54 = vld [vmem:[#allocation4 + $0x8] sm:$0xff] }
 0x829   : > { %v2055_v55 = vsub.f32 %v5519_v52, %v5522_v29  ;;  %2160 = vst.msk [vmem:[#allocation4] sm:$0xff] %vm2072_vm10, %v5522_v29  ;;  %2060 = vperm.xlu1 %4372, %v5522_v29  }
 0x82a   : > { %v2741_v44 = vpop.permute.xlu0 %2740 }
 0x82b   : > { %v2056_v8 = vmul.f32 1.442695, %v2055_v55 }
 0x82d   : > { %2167 = vrot.lane.b32.xlu1 %v5491_v31, %s4768_s12  ;;  %s3894_s12 = sld [smem:[#allocation11 + $0x1]] }
 0x831   : > { %2164 = vrot.lane.b32.xlu1 %v1968_v33, %s4769_s11  ;;  %s4784_s11 = smov 8  }
 0x835   : > { %2356 = vrot.lane.b32.xlu1 %v5491_v31, %s4770_s4  ;;  %s4785_s4 = smov 16  }
 0x839   : > { %2353 = vrot.lane.b32.xlu1 %v1968_v33, %s4771_s26  ;;  %s4786_s26 = smov 24  }
 0x83d   : > { %2551 = vrot.lane.b32.xlu1 %v5491_v31, %s4772_s28 }
 0x841   : > { %2548 = vrot.lane.b32.xlu1 %v1968_v33, %s4773_s30 }
 0x845   : > { %2743 = vrot.lane.b32.xlu1 %v5491_v31, %s4774_s15 }
 0x849   : > { %2938 = vrot.lane.b32.xlu1 %v5491_v31, %s4775_s2 }
 0x84d   : > { %2935 = vrot.lane.b32.xlu1 %v1968_v33, %s4776_s7 }
 0x851   : > { %3130 = vrot.lane.b32.xlu1 %v5491_v31, %s4777_s5 }
 0x855   : > { %3127 = vrot.lane.b32.xlu1 %v1968_v33, %s4778_s23 }
 0x859   : > { %3325 = vrot.lane.b32.xlu1 %v5491_v31, %s4779_s20 }
 0x85d   : > { %3322 = vrot.lane.b32.xlu1 %v1968_v33, %s4780_s27 }
 0x8a8   : > { %v2061_v57 = vpop.permute.xlu1 %2060 }
 0x8a9   : > { %v2063_v58 = vsub.f32 %v2046_v43, %v2061_v57 }
 0x8ab   : > { %v2064_v34 = vmul.f32 1.442695, %v2063_v58  ;;  %v2628_v58 = vld [vmem:[#allocation5 + $0x8] sm:$0xff] }
 0x8ac   : > { %v2168_v42 = vpop.permute.xlu1 %2167 }
 0x8ad   : > { %4374 = vpow2.f32 %v2064_v34 }
 0x8ae   : > { %4376 = vpow2.f32 %v2056_v8 }
 0x8b0   : > { %v2165_v60 = vpop.permute.xlu1 %2164 }
 0x8b4   : > { %v2357_v61 = vpop.permute.xlu1 %2356 }
 0x8b7   : > { %v4375_v45 = vpop.eup %4374 }
 0x8b8   : > { %4052 = vmatmul.mubr.msk.f32.vlgmr.msra.gmra.mrb[0].mxu1 %vm2050_vm9, %v4375_v45  ;;  %v2354_v63 = vpop.permute.xlu1 %2353  ;;  %v2068_v0 = vsel %vm2050_vm9, %v4375_v45, 0.0  ;;  %v4377_v56 = vpop.eup %4376 }
 0x8b9   : > { %4055 = vmatpush3.xpose.msk.msra.mxu1 %vm1973_vm7, %v2168_v42  ;;  %2069 = vadd.xlane.f32.xlu0 %v2068_v0  ;;  %v2067_v36 = vmul.f32 %v4377_v56, %v2066_v10 }
 0x8ba   : > { %4056 = vmatprep.mubr.msk.f32.mxu1 %vm4764_vm6, %v4763_v32  ;;  %4064 = vmatprep.subr.mxu1 %v4763_v32 }
 0x8bc   : > { %4057 = vmatmul.mubr.msk.f32.vlgmr.msra.gmra.mrb[2].mxu1 %vm1973_vm7, %v2165_v60  ;;  %v2552_v1 = vpop.permute.xlu1 %2551 }
 0x8bd   : > { %4065 = vmatpush3.xpose.msk.msra.mxu1 %vm1973_vm7, %v2357_v61  ;;  %4066 = vmatprep.mubr.msk.f32.mxu1 %vm4764_vm6, %v4763_v32  ;;  %v5616_v61 = vld [vmem:[#allocation4 + $0x10] sm:$0xff] }
 0x8be   : > { %4074 = vmatprep.subr.mxu1 %v4763_v32 }
 0x8c0   : > { %4067 = vmatmul.mubr.msk.f32.vlgmr.msra.gmra.mrb[4].mxu1 %vm1973_vm7, %v2354_v63  ;;  %v2549_v48 = vpop.permute.xlu1 %2548 }
 0x8c1   : > { %4075 = vmatpush3.xpose.msk.msra.mxu1 %vm1973_vm7, %v2552_v1  ;;  %4076 = vmatprep.mubr.msk.f32.mxu1 %vm4764_vm6, %v4763_v32 }
 0x8c2   : > { %4084 = vmatprep.subr.mxu1 %v4763_v32 }
 0x8c4   : > { %4077 = vmatmul.mubr.msk.f32.vlgmr.msra.gmra.mrb[6].mxu1 %vm1973_vm7, %v2549_v48  ;;  %v2744_v2 = vpop.permute.xlu1 %2743  ;;  %v5627_v48 = vld [vmem:[#allocation5 + $0x10] sm:$0xff] }
 0x8c5   : > { %4085 = vmatpush3.xpose.msk.msra.mxu1 %vm1973_vm7, %v2744_v2  ;;  %4086 = vmatprep.mubr.msk.f32.mxu1 %vm4764_vm6, %v4763_v32 }
 0x8c6   : > { %4094 = vmatprep.subr.mxu1 %v4763_v32 }
 0x8c8   : > { %v2939_v47 = vpop.permute.xlu1 %2938  ;;  %4087 = vmatmul.mubr.msk.f32.vlgmr.msra.gmra.mrb[8].mxu1 %vm1973_vm7, %v2741_v44 }
 0x8c9   : > { %4095 = vmatpush3.xpose.msk.msra.mxu1 %vm1973_vm7, %v2939_v47  ;;  %4096 = vmatprep.mubr.msk.f32.mxu1 %vm4764_vm6, %v4763_v32 }
 0x8ca   : > { %4104 = vmatprep.subr.mxu1 %v4763_v32 }
 0x8cc   : > { %v2936_v50 = vpop.permute.xlu1 %2935 }
 0x8cd   : > { %4097 = vmatmul.mubr.msk.f32.vlgmr.msra.gmra.mrb[10].mxu1 %vm1973_vm7, %v2936_v50 }
 0x8ce   : > { %4106 = vmatprep.mubr.msk.f32.mxu1 %vm4764_vm6, %v4763_v32 }
 0x8d0   : > { %v3131_v53 = vpop.permute.xlu1 %3130 }
 0x8d1   : > { %4105 = vmatpush3.xpose.msk.msra.mxu1 %vm1973_vm7, %v3131_v53  ;;  %v2074_v53 = vld [vmem:[#allocation2] sm:$0xff] }
 0x8d2   : > { %4114 = vmatprep.subr.mxu1 %v4763_v32 }
 0x8d4   : > { %v3128_v51 = vpop.permute.xlu1 %3127 }
 0x8d5   : > { %4107 = vmatmul.mubr.msk.f32.vlgmr.msra.gmra.mrb[12].mxu1 %vm1973_vm7, %v3128_v51 }
 0x8d6   : > { %4116 = vmatprep.mubr.msk.f32.mxu1 %vm4764_vm6, %v4763_v32 }
 0x8d8   : > { %v3326_v5 = vpop.permute.xlu1 %3325 }
 0x8d9   : > { %4115 = vmatpush3.xpose.msk.msra.mxu1 %vm1973_vm7, %v3326_v5 }
 0x8dc   : > { %v3323_v7 = vpop.permute.xlu1 %3322 }
 0x8dd   : > { %4117 = vmatmul.mubr.msk.f32.vlgmr.msra.gmra.mrb[14].mxu1 %vm1973_vm7, %v3323_v7 }
 0x946   : > { %v2070_v11 = vpop.xlane.xlu0 %2069 }
 0x947   : > { %v2071_v4 = vadd.f32 %v2070_v11, %v2067_v36 }
 0x949   : > { %2073 = vst.msk [vmem:[#allocation6] sm:$0xff] %vm2072_vm10, %v2071_v4 }
 0x98b   : > { %v5576_v12 = vpop.f32.mrb[0].mxu1 }
 0x98c   : > { %v4053_v13 = vpop.f32.mrb[1].mxu1 }
 0x98f   : > { %v2239_v15 = vpop.f32.mrb[2].mxu1 }
 0x990   : > { %v5579_v9 = vadd.f32 %v2239_v15, %v5513_v40  ;;  %v4058_v16 = vpop.f32.mrb[3].mxu1  ;;  %v5656_v15 = vld [vmem:[#allocation5 + $0x18] sm:$0xff] }
 0x992   : > { %v2244_v59 = vsel %vm2050_vm9, %v5579_v9, -inf }
 0x993   : > { %2245 = vmax.xlane.f32.xlu1 %v2244_v59  ;;  %v2428_v17 = vpop.f32.mrb[4].mxu1 }
 0x994   : > { %v5584_v18 = vadd.f32 %v2428_v17, %v5513_v40  ;;  %v4068_v19 = vpop.f32.mrb[5].mxu1 }
 0x996   : > { %v2434_v14 = vsel %vm2050_vm9, %v5584_v18, -inf }
 0x997   : > { %2435 = vmax.xlane.f32.xlu1 %v2434_v14  ;;  %v2623_v20 = vpop.f32.mrb[6].mxu1 }
 0x998   : > { %v5589_v21 = vadd.f32 %v2623_v20, %v5513_v40  ;;  %v4078_v23 = vpop.f32.mrb[7].mxu1 }
 0x99a   : > { %v2629_v62 = vsel %vm2050_vm9, %v5589_v21, -inf }
 0x99b   : > { %2630 = vmax.xlane.f32.xlu0 %v2629_v62  ;;  %v2815_v24 = vpop.f32.mrb[8].mxu1 }
 0x99c   : > { %v5594_v25 = vadd.f32 %v2815_v24, %v5513_v40  ;;  %v4088_v26 = vpop.f32.mrb[9].mxu1 }
 0x99e   : > { %v2821_v27 = vsel %vm2050_vm9, %v5594_v25, -inf }
 0x99f   : > { %2822 = vmax.xlane.f32.xlu0 %v2821_v27 }
 0x9a0   : > { %v3010_v28 = vpop.f32.mrb[10].mxu1 }
 0x9a1   : > { %v5599_v30 = vadd.f32 %v3010_v28, %v5513_v40  ;;  %v4098_v31 = vpop.f32.mrb[11].mxu1 }
 0x9a3   : > { %v3016_v3 = vsel %vm2050_vm9, %v5599_v30, -inf }
 0x9a4   : > { %3017 = vmax.xlane.f32.xlu1 %v3016_v3 }
 0x9a8   : > { %v3202_v33 = vpop.f32.mrb[12].mxu1 }
 0x9a9   : > { %v5604_v37 = vadd.f32 %v3202_v33, %v5513_v40  ;;  %v4108_v38 = vpop.f32.mrb[13].mxu1 }
 0x9ab   : > { %v3208_v39 = vsel %vm2050_vm9, %v5604_v37, -inf }
 0x9ac   : > { %3209 = vmax.xlane.f32.xlu0 %v3208_v39 }
 0x9b0   : > { %v3397_v41 = vpop.f32.mrb[14].mxu1 }
 0x9b1   : > { %v5609_v43 = vadd.f32 %v3397_v41, %v5513_v40  ;;  %v4118_v46 = vpop.f32.mrb[15].mxu1 }
 0x9b3   : > { %v3403_v49 = vsel %vm2050_vm9, %v5609_v43, -inf }
 0x9b4   : > { %3404 = vmax.xlane.f32.xlu0 %v3403_v49 }
 0x9b5   : > { %2077 = vperm.xlu1 %4372, %v4377_v56   ;;  %v5641_v56 = vld [vmem:[#allocation4 + $0x18] sm:$0xff] }
 0x9ca   : > { %2466 = vrot.lane.b32.xlu0 %v5509_v35, %s4781_s8 }
 0xa20   : > { %v2246_v6 = vpop.xlane.xlu1 %2245 }
 0xa21   : > { %v2247_v52 = vmax.f32 %v2243_v22, %v2246_v6 }
 0xa23   : > { %v2248_v29 = vsub.f32 %v2243_v22, %v2247_v52  ;;  %2348 = vst.msk [vmem:[#allocation5] sm:$0xff] %vm2072_vm10, %v2247_v52  ;;  %2253 = vperm.xlu0 %4373, %v2247_v52  }
 0xa24   : > { %v2436_v55 = vpop.xlane.xlu1 %2435 }
 0xa25   : > { %v2249_v40 = vmul.f32 1.442695, %v2248_v29  ;;  %v2437_v57 = vmax.f32 %v2433_v54, %v2436_v55 }
 0xa27   : > { %4378 = vpow2.f32 %v2249_v40  ;;  %2544 = vst.msk [vmem:[#allocation4 + $0x8] sm:$0xff] %vm2072_vm10, %v2437_v57  ;;  %2443 = vperm.xlu0 %4373, %v2437_v57   ;;  %v2438_v34 = vsub.f32 %v2433_v54, %v2437_v57 }
 0xa28   : > { %v2631_v42 = vpop.xlane.xlu0 %2630 }
 0xa29   : > { %v2632_v60 = vmax.f32 %v2628_v58, %v2631_v42  ;;  %v2439_v45 = vmul.f32 1.442695, %v2438_v34 }
 0xa2b   : > { %2735 = vst.msk [vmem:[#allocation5 + $0x8] sm:$0xff] %vm2072_vm10, %v2632_v60  ;;  %2638 = vperm.xlu0 %4373, %v2632_v60   ;;  %4380 = vpow2.f32 %v2439_v45  ;;  %v2633_v2 = vsub.f32 %v2628_v58, %v2632_v60 }
 0xa2c   : > { %v2823_v63 = vpop.xlane.xlu0 %2822 }
 0xa2d   : > { %v5620_v0 = vmax.f32 %v5616_v61, %v2823_v63  ;;  %v2634_v51 = vmul.f32 1.442695, %v2633_v2 }
 0xa2f   : > { %v2825_v1 = vsub.f32 %v5616_v61, %v5620_v0  ;;  %2931 = vst.msk [vmem:[#allocation4 + $0x10] sm:$0xff] %vm2072_vm10, %v5620_v0  ;;  %2830 = vperm.xlu1 %4372, %v5620_v0   ;;  %3240 = vrot.lane.b32.xlu0 %v5509_v35, %s4782_s9  ;;  %4382 = vpow2.f32 %v2634_v51 }
 0xa31   : > { %v5630_v44 = vpop.eup %4378  ;;  %v3018_v47 = vpop.xlane.xlu1 %3017  ;;  %v2826_v60 = vmul.f32 1.442695, %v2825_v1 }
 0xa32   : > { %v5633_v50 = vmax.f32 %v5627_v48, %v3018_v47 }
 0xa33   : > { %2269 = vperm.xlu1 %4372, %v5630_v44  }
 0xa34   : > { %v3020_v5 = vsub.f32 %v5627_v48, %v5633_v50  ;;  %3122 = vst.msk [vmem:[#allocation5 + $0x10] sm:$0xff] %vm2072_vm10, %v5633_v50 }
 0xa35   : > { %v2078_v7 = vpop.permute.xlu1 %2077  ;;  %v5644_v11 = vpop.eup %4380 }
 0xa36   : > { %v2080_v8 = vmul.f32 %v2078_v7, %v2074_v53  ;;  %v3021_v7 = vmul.f32 1.442695, %v3020_v5  ;;  %v2645_v5 = vld [vmem:[#allocation7 + $0x8] sm:$0xff] }
 0xa37   : > { %3025 = vperm.xlu1 %4372, %v5633_v50  }
 0xa38   : > { %v2158_v10 = vadd.f32 %v5576_v12, %v2080_v8 }
 0xa39   : > { %v3210_v36 = vpop.xlane.xlu0 %3209  ;;  %v5658_v16 = vpop.eup %4382 }
 0xa3a   : > { %2159 = vst.msk [vmem:[#allocation2] sm:$0xff] %vm2050_vm9, %v2158_v10  ;;  %v5648_v4 = vmax.f32 %v5641_v56, %v3210_v36  ;;  %v2259_v36 = vld [vmem:[#allocation7] sm:$0xff] }
 0xa3b   : > { %2461 = vperm.xlu1 %4372, %v5644_v11  }
 0xa3c   : > { %v3212_v13 = vsub.f32 %v5641_v56, %v5648_v4  ;;  %3318 = vst.msk [vmem:[#allocation4 + $0x18] sm:$0xff] %vm2072_vm10, %v5648_v4  ;;  %v3514_v56 = vld [vmem:[#allocation6] sm:$0xff] }
 0xa3e   : > { %v3213_v2 = vmul.f32 1.442695, %v3212_v13 }
 0xa3f   : > { %3217 = vperm.xlu1 %4372, %v5648_v4   ;;  %v2260_v4 = vmul.f32 %v5630_v44, %v2259_v36 }
 0xa41   : > { %v3405_v12 = vpop.xlane.xlu0 %3404 }
 0xa42   : > { %v5661_v59 = vmax.f32 %v5656_v15, %v3405_v12 }
 0xa43   : > { %2656 = vperm.xlu1 %4372, %v5658_v16  }
 0xa44   : > { %v3407_v17 = vsub.f32 %v5656_v15, %v5661_v59  ;;  %3509 = vst.msk [vmem:[#allocation5 + $0x18] sm:$0xff] %vm2072_vm10, %v5661_v59  ;;  %v2450_v15 = vld [vmem:[#allocation6 + $0x8] sm:$0xff] }
 0xa45   : > { %v2467_v19 = vpop.permute.xlu0 %2466  ;;  %v2451_v48 = vmul.f32 %v5644_v11, %v2450_v15  ;;  %v3032_v11 = vld [vmem:[#allocation7 + $0x10] sm:$0xff] }
 0xa46   : > { %v3408_v0 = vmul.f32 1.442695, %v3407_v17  ;;  %v2646_v17 = vmul.f32 %v5658_v16, %v2645_v5 }
 0xa47   : > { %3412 = vperm.xlu1 %4372, %v5661_v59  }
 0xa4b   : > { %2853 = vrot.lane.b32.xlu1 %v5509_v35, %s4783_s1 }
 0xaa2   : > { %v2254_v14 = vpop.permute.xlu0 %2253 }
 0xaa3   : > { %v2256_v20 = vsub.f32 %v5579_v9, %v2254_v14  ;;  %v2837_v14 = vld [vmem:[#allocation6 + $0x10] sm:$0xff] }
 0xaa5   : > { %v2257_v23 = vmul.f32 1.442695, %v2256_v20 }
 0xaa6   : > { %v2444_v62 = vpop.permute.xlu0 %2443 }
 0xaa7   : > { %4384 = vpow2.f32 %v2257_v23  ;;  %v2446_v24 = vsub.f32 %v5584_v18, %v2444_v62 }
 0xaa9   : > { %v2447_v26 = vmul.f32 1.442695, %v2446_v24 }
 0xaaa   : > { %v2639_v27 = vpop.permute.xlu0 %2638 }
 0xaab   : > { %4386 = vpow2.f32 %v2447_v26  ;;  %v2641_v28 = vsub.f32 %v5589_v21, %v2639_v27 }
 0xaad   : > { %v2642_v31 = vmul.f32 1.442695, %v2641_v28 }
 0xaae   : > { %v2831_v3 = vpop.permute.xlu1 %2830  ;;  %v3241_v61 = vpop.permute.xlu0 %3240 }
 0xaaf   : > { %4388 = vpow2.f32 %v2642_v31  ;;  %v2833_v33 = vsub.f32 %v5594_v25, %v2831_v3 }
 0xab1   : > { %v4385_v35 = vpop.eup %4384  ;;  %v2834_v38 = vmul.f32 1.442695, %v2833_v33 }
 0xab2   : > { %v5674_v39 = vpop.permute.xlu1 %2269  ;;  %4062 = vmatmul.mubr.msk.f32.vlgmr.msra.gmra.mrb[2].mxu0 %vm2050_vm9, %v4385_v35  ;;  %v2261_v9 = vsel %vm2050_vm9, %v4385_v35, 0.0  ;;  %v3224_v35 = vld [vmem:[#allocation6 + $0x18] sm:$0xff] }
 0xab3   : > { %4390 = vpow2.f32 %v2834_v38  ;;  %4070 = vmatpush3.msra.mxu0 %v2467_v19  ;;  %2262 = vadd.xlane.f32.xlu1 %v2261_v9 }
 0xab4   : > { %4071 = vmatprep.mubr.msk.f32.mxu0 %vm4764_vm6, %v4763_v32  ;;  %4079 = vmatprep.subr.mxu0 %v4763_v32 }
 0xab5   : > { %v4387_v18 = vpop.eup %4386 }
 0xab6   : > { %v3026_v21 = vpop.permute.xlu1 %3025  ;;  %4072 = vmatmul.mubr.msk.f32.vlgmr.msra.gmra.mrb[4].mxu0 %vm2050_vm9, %v4387_v18  ;;  %v2452_v25 = vsel %vm2050_vm9, %v4387_v18, 0.0 }
 0xab7   : > { %v3028_v41 = vsub.f32 %v5599_v30, %v3026_v21  ;;  %4080 = vmatpush3.msra.mxu0 %v2467_v19  ;;  %2453 = vadd.xlane.f32.xlu0 %v2452_v25 }
 0xab8   : > { %4081 = vmatprep.mubr.msk.f32.mxu0 %vm4764_vm6, %v4763_v32  ;;  %4089 = vmatprep.subr.mxu0 %v4763_v32 }
 0xab9   : > { %v4389_v46 = vpop.eup %4388  ;;  %v3029_v49 = vmul.f32 1.442695, %v3028_v41 }
 0xaba   : > { %v5687_v22 = vpop.permute.xlu1 %2461  ;;  %4082 = vmatmul.mubr.msk.f32.vlgmr.msra.gmra.mrb[6].mxu0 %vm2050_vm9, %v4389_v46  ;;  %v2647_v6 = vsel %vm2050_vm9, %v4389_v46, 0.0  ;;  %v3419_v46 = vld [vmem:[#allocation7 + $0x18] sm:$0xff] }
 0xabb   : > { %4392 = vpow2.f32 %v3029_v49  ;;  %2648 = vadd.xlane.f32.xlu0 %v2647_v6  ;;  %4091 = vmatprep.mubr.msk.f32.mxu0 %vm4764_vm6, %v4763_v32 }
 0xabd   : > { %v4391_v30 = vpop.eup %4390 }
 0xabe   : > { %v3218_v52 = vpop.permute.xlu1 %3217  ;;  %v2839_v54 = vsel %vm2050_vm9, %v4391_v30, 0.0 }
 0xabf   : > { %v3220_v29 = vsub.f32 %v5604_v37, %v3218_v52  ;;  %2840 = vadd.xlane.f32.xlu0 %v2839_v54 }
 0xac1   : > { %v3221_v55 = vmul.f32 1.442695, %v3220_v29 }
 0xac2   : > { %v5695_v40 = vpop.permute.xlu1 %2656 }
 0xac3   : > { %4394 = vpow2.f32 %v3221_v55 }
 0xac5   : > { %v4393_v57 = vpop.eup %4392 }
 0xac6   : > { %v3413_v58 = vpop.permute.xlu1 %3412  ;;  %v3034_v34 = vsel %vm2050_vm9, %v4393_v57, 0.0 }
 0xac7   : > { %v3415_v42 = vsub.f32 %v5609_v43, %v3413_v58  ;;  %3035 = vadd.xlane.f32.xlu1 %v3034_v34  ;;  %v2266_v34 = vld [vmem:[#allocation3] sm:$0xff] }
 0xac9   : > { %v3416_v45 = vmul.f32 1.442695, %v3415_v42  ;;  %v2272_v42 = vmul.f32 %v5674_v39, %v2266_v34  ;;  %v2845_v39 = vld [vmem:[#allocation2 + $0x10] sm:$0xff] }
 0xaca   : > { %v2854_v63 = vpop.permute.xlu1 %2853 }
 0xacb   : > { %4396 = vpow2.f32 %v3416_v45  ;;  %4090 = vmatpush3.msra.mxu0 %v2854_v63 }
 0xacc   : > { %4092 = vmatmul.mubr.msk.f32.vlgmr.msra.gmra.mrb[8].mxu0 %vm2050_vm9, %v4391_v30  ;;  %4099 = vmatprep.subr.mxu0 %v4763_v32  ;;  %4398 = vpow2.f32 %v2826_v60  ;;  %v2458_v60 = vld [vmem:[#allocation2 + $0x8] sm:$0xff] }
 0xacd   : > { %v4395_v37 = vpop.eup %4394  ;;  %4100 = vmatpush3.msra.mxu0 %v2854_v63  ;;  %4101 = vmatprep.mubr.msk.f32.mxu0 %vm4764_vm6, %v4763_v32  ;;  %4400 = vpow2.f32 %v3213_v2  ;;  %v2464_v2 = vmul.f32 %v5687_v22, %v2458_v60 }
 0xace   : > { %v3226_v43 = vsel %vm2050_vm9, %v4395_v37, 0.0  ;;  %4109 = vmatprep.subr.mxu0 %v4763_v32  ;;  %4402 = vpow2.f32 %v3408_v0 }
 0xacf   : > { %3227 = vadd.xlane.f32.xlu0 %v3226_v43  ;;  %4404 = vpow2.f32 %v3021_v7  ;;  %v2653_v43 = vld [vmem:[#allocation3 + $0x8] sm:$0xff] }
 0xad0   : > { %4102 = vmatmul.mubr.msk.f32.vlgmr.msra.gmra.mrb[10].mxu0 %vm2050_vm9, %v4393_v57  ;;  %4406 = vrcp.f32 %v3514_v56 }
 0xad1   : > { %4110 = vmatpush3.msra.mxu0 %v3241_v61  ;;  %4111 = vmatprep.mubr.msk.f32.mxu0 %vm4764_vm6, %v4763_v32 }
 0xad2   : > { %4119 = vmatprep.subr.mxu0 %v4763_v32 }
 0xad4   : > { %4112 = vmatmul.mubr.msk.f32.vlgmr.msra.gmra.mrb[12].mxu0 %vm2050_vm9, %v4395_v37 }
 0xad5   : > { %v4397_v1 = vpop.eup %4396  ;;  %4120 = vmatpush3.msra.mxu0 %v3241_v61  ;;  %4121 = vmatprep.mubr.msk.f32.mxu0 %vm4764_vm6, %v4763_v32 }
 0xad6   : > { %v3421_v47 = vsel %vm2050_vm9, %v4397_v1, 0.0  ;;  %v4399_v53 = vpop.eup %4398 }
 0xad7   : > { %3422 = vadd.xlane.f32.xlu0 %v3421_v47  ;;  %v4401_v51 = vpop.eup %4400  ;;  %v2838_v44 = vmul.f32 %v4399_v53, %v2837_v14  ;;  %v2659_v47 = vmul.f32 %v5695_v40, %v2653_v43  ;;  %v3232_v40 = vld [vmem:[#allocation2 + $0x18] sm:$0xff] }
 0xad8   : > { %2848 = vperm.xlu1 %4372, %v4399_v53   ;;  %4122 = vmatmul.mubr.msk.f32.vlgmr.msra.gmra.mrb[14].mxu0 %vm2050_vm9, %v4397_v1  ;;  %v4403_v8 = vpop.eup %4402  ;;  %v3225_v9 = vmul.f32 %v4401_v51, %v3224_v35 }
 0xad9   : > { %v4405_v10 = vpop.eup %4404  ;;  %v3420_v6 = vmul.f32 %v4403_v8, %v3419_v46 }
 0xada   : > { %v4407_v32 = vpop.eup %4406  ;;  %v3033_v28 = vmul.f32 %v4405_v10, %v3032_v11 }
 0xadc   : > { %3235 = vperm.xlu1 %4372, %v4401_v51  }
 0xae0   : > { %3430 = vperm.xlu1 %4372, %v4403_v8  }
 0xaed   : > { %3043 = vperm.xlu0 %4373, %v4405_v10   ;;  %v3040_v10 = vld [vmem:[#allocation3 + $0x10] sm:$0xff] }
 0xaf1   : > { %3518 = vperm.xlu0 %4373, %v4407_v32  }
 0xb40   : > { %v2263_v13 = vpop.xlane.xlu1 %2262 }
 0xb41   : > { %v2264_v12 = vadd.f32 %v2263_v13, %v2260_v4 }
 0xb43   : > { %2265 = vst.msk [vmem:[#allocation7] sm:$0xff] %vm2072_vm10, %v2264_v12 }
 0xb44   : > { %v2454_v50 = vpop.xlane.xlu0 %2453 }
 0xb45   : > { %v2455_v59 = vadd.f32 %v2454_v50, %v2451_v48 }
 0xb47   : > { %2456 = vst.msk [vmem:[#allocation6 + $0x8] sm:$0xff] %vm2072_vm10, %v2455_v59  ;;  %v3427_v59 = vld [vmem:[#allocation3 + $0x18] sm:$0xff] }
 0xb48   : > { %v2649_v19 = vpop.xlane.xlu0 %2648 }
 0xb49   : > { %v2650_v20 = vadd.f32 %v2649_v19, %v2646_v17 }
 0xb4a   : > { %v3523_v23 = vld [vmem:[#allocation7] sm:$0xff] }
 0xb4b   : > { %2651 = vst.msk [vmem:[#allocation7 + $0x8] sm:$0xff] %vm2072_vm10, %v2650_v20  ;;  %4408 = vrcp.f32 %v3523_v23 }
 0xb4c   : > { %v2841_v62 = vpop.xlane.xlu0 %2840 }
 0xb4d   : > { %v2842_v24 = vadd.f32 %v2841_v62, %v2838_v44 }
 0xb4e   : > { %v3553_v26 = vld [vmem:[#allocation6 + $0x8] sm:$0xff] }
 0xb4f   : > { %2843 = vst.msk [vmem:[#allocation6 + $0x10] sm:$0xff] %vm2072_vm10, %v2842_v24  ;;  %4410 = vrcp.f32 %v3553_v26 }
 0xb52   : > { %v3562_v27 = vld [vmem:[#allocation7 + $0x8] sm:$0xff] }
 0xb53   : > { %4412 = vrcp.f32 %v3562_v27  ;;  %v3531_v27 = vstv %s3510_s19 }
 0xb54   : > { %v3036_v31 = vpop.xlane.xlu1 %3035 }
 0xb55   : > { %v4409_v16 = vpop.eup %4408  ;;  %v3037_v3 = vadd.f32 %v3036_v31, %v3033_v28 }
 0xb56   : > { %3527 = vperm.xlu1 %4372, %v4409_v16   ;;  %v3583_v33 = vld [vmem:[#allocation6 + $0x10] sm:$0xff]  ;;  %v3513_v16 = vld [vmem:[#allocation2] sm:$0xff] }
 0xb57   : > { %3038 = vst.msk [vmem:[#allocation7 + $0x10] sm:$0xff] %vm2072_vm10, %v3037_v3  ;;  %4414 = vrcp.f32 %v3583_v33 }
 0xb58   : > { %v2849_v8 = vpop.permute.xlu1 %2848 }
 0xb59   : > { %v4411_v38 = vpop.eup %4410  ;;  %v2851_v56 = vmul.f32 %v2849_v8, %v2845_v39 }
 0xb5a   : > { %3557 = vperm.xlu0 %4373, %v4411_v38  }
 0xb5c   : > { %v3228_v18 = vpop.xlane.xlu0 %3227  ;;  %v3236_v13 = vpop.permute.xlu1 %3235 }
 0xb5d   : > { %v4413_v21 = vpop.eup %4412  ;;  %v3229_v25 = vadd.f32 %v3228_v18, %v3225_v9  ;;  %v3238_v5 = vmul.f32 %v3236_v13, %v3232_v40  ;;  %v3895_v13 = vld [vmem:[#allocation19] ss:$0 sm:$0xff]  ;;  %v3550_v40 = vstv %s3894_s12 }
 0xb5e   : > { %3566 = vperm.xlu0 %4373, %v4413_v21   ;;  %v3592_v41 = vld [vmem:[#allocation7 + $0x10] sm:$0xff] }
 0xb5f   : > { %3230 = vst.msk [vmem:[#allocation6 + $0x18] sm:$0xff] %vm2072_vm10, %v3229_v25  ;;  %4416 = vrcp.f32 %v3592_v41 }
 0xb60   : > { %v3431_v17 = vpop.permute.xlu1 %3430 }
 0xb61   : > { %v4415_v49 = vpop.eup %4414  ;;  %v3433_v23 = vmul.f32 %v3431_v17, %v3427_v59 }
 0xb62   : > { %3587 = vperm.xlu1 %4372, %v4415_v49  }
 0xb64   : > { %v3423_v30 = vpop.xlane.xlu0 %3422 }
 0xb65   : > { %v3424_v52 = vadd.f32 %v3423_v30, %v3420_v6 }
 0xb66   : > { %v3613_v54 = vld [vmem:[#allocation6 + $0x18] sm:$0xff] }
 0xb67   : > { %3425 = vst.msk [vmem:[#allocation7 + $0x18] sm:$0xff] %vm2072_vm10, %v3424_v52  ;;  %4418 = vrcp.f32 %v3613_v54 }
 0xb69   : > { %v4417_v29 = vpop.eup %4416 }
 0xb6a   : > { %3596 = vperm.xlu1 %4372, %v4417_v29  }
 0xb6c   : > { %v3044_v22 = vpop.permute.xlu0 %3043 }
 0xb6d   : > { %v3046_v15 = vmul.f32 %v3044_v22, %v3040_v10 }
 0xb6e   : > { %v3622_v55 = vld [vmem:[#allocation7 + $0x18] sm:$0xff] }
 0xb6f   : > { %4420 = vrcp.f32 %v3622_v55 }
 0xb70   : > { %v3519_v26 = vpop.permute.xlu0 %3518 }
 0xb71   : > { %v4419_v57 = vpop.eup %4418  ;;  %v3521_v3 = vmul.f32 %v3519_v26, %v3513_v16 }
 0xb72   : > { %3617 = vperm.xlu1 %4372, %v4419_v57  }
 0xb79   : > { %v4421_v58 = vpop.eup %4420 }
 0xb7a   : > { %3626 = vperm.xlu0 %4373, %v4421_v58  }
 0xb85   : > { %v2342_v45 = vpop.f32.mrb[2].mxu0 }
 0xb86   : > { %v2346_v63 = vadd.f32 %v2342_v45, %v2272_v42  ;;  %v4063_v37 = vpop.f32.mrb[3].mxu0 }
 0xb88   : > { %2347 = vst.msk [vmem:[#allocation3] sm:$0xff] %vm2050_vm9, %v2346_v63 }
 0xb89   : > { %v2538_v61 = vpop.f32.mrb[4].mxu0 }
 0xb8a   : > { %v2542_v0 = vadd.f32 %v2538_v61, %v2464_v2  ;;  %v4073_v1 = vpop.f32.mrb[5].mxu0 }
 0xb8c   : > { %2543 = vst.msk [vmem:[#allocation2 + $0x8] sm:$0xff] %vm2050_vm9, %v2542_v0 }
 0xb8d   : > { %v2729_v53 = vpop.f32.mrb[6].mxu0 }
 0xb8e   : > { %v2733_v51 = vadd.f32 %v2729_v53, %v2659_v47  ;;  %v4083_v7 = vpop.f32.mrb[7].mxu0 }
 0xb8f   : > { %v3522_v11 = vld [vmem:[#allocation3] sm:$0xff] }
 0xb90   : > { %2734 = vst.msk [vmem:[#allocation3 + $0x8] sm:$0xff] %vm2050_vm9, %v2733_v51 }
 0xb93   : > { %v3552_v46 = vld [vmem:[#allocation2 + $0x8] sm:$0xff] }
 0xb97   : > { %v3561_v18 = vld [vmem:[#allocation3 + $0x8] sm:$0xff] }
 0xb9f   : > { %v2925_v32 = vpop.f32.mrb[8].mxu0 }
 0xba0   : > { %v2929_v36 = vadd.f32 %v2925_v32, %v2851_v56  ;;  %v4093_v4 = vpop.f32.mrb[9].mxu0 }
 0xba2   : > { %2930 = vst.msk [vmem:[#allocation2 + $0x10] sm:$0xff] %vm2050_vm9, %v2929_v36 }
 0xba3   : > { %v3116_v12 = vpop.f32.mrb[10].mxu0 }
 0xba4   : > { %v3120_v48 = vadd.f32 %v3116_v12, %v3046_v15  ;;  %v4103_v50 = vpop.f32.mrb[11].mxu0 }
 0xba6   : > { %3121 = vst.msk [vmem:[#allocation3 + $0x10] sm:$0xff] %vm2050_vm9, %v3120_v48 }
 0xba7   : > { %v3312_v19 = vpop.f32.mrb[12].mxu0 }
 0xba8   : > { %v3316_v14 = vadd.f32 %v3312_v19, %v3238_v5  ;;  %v4113_v20 = vpop.f32.mrb[13].mxu0 }
 0xba9   : > { %v3582_v34 = vld [vmem:[#allocation2 + $0x10] sm:$0xff] }
 0xbaa   : > { %3317 = vst.msk [vmem:[#allocation2 + $0x18] sm:$0xff] %vm2050_vm9, %v3316_v14 }
 0xbab   : > { %v3503_v44 = vpop.f32.mrb[14].mxu0 }
 0xbac   : > { %v3507_v62 = vadd.f32 %v3503_v44, %v3433_v23  ;;  %v4123_v24 = vpop.f32.mrb[15].mxu0 }
 0xbad   : > { %v3591_v57 = vld [vmem:[#allocation3 + $0x10] sm:$0xff] }
 0xbae   : > { %3508 = vst.msk [vmem:[#allocation3 + $0x18] sm:$0xff] %vm2050_vm9, %v3507_v62 }
 0xbb1   : > { %v3612_v1 = vld [vmem:[#allocation2 + $0x18] sm:$0xff] }
 0xbb5   : > { %v3621_v43 = vld [vmem:[#allocation3 + $0x18] sm:$0xff] }
 0xbd5   : > { %v3528_v28 = vpop.permute.xlu1 %3527 }
 0xbd6   : > { %v3530_v31 = vmul.f32 %v3528_v28, %v3522_v11 }
 0xbd8   : > { %v3532_v33 = vmul.f32 %v3531_v27, %v3530_v31 }
 0xbd9   : > { %v3558_v35 = vpop.permute.xlu0 %3557 }
 0xbda   : > { %v3533_v38 = vsub.f32 %v3521_v3, %v3532_v33  ;;  %v3560_v49 = vmul.f32 %v3558_v35, %v3552_v46 }
 0xbdc   : > { %v3534_v9 = vmul.f32 %v3533_v38, %v3533_v38 }
 0xbdd   : > { %v3567_v21 = vpop.permute.xlu0 %3566 }
 0xbde   : > { %v3569_v25 = vmul.f32 %v3567_v21, %v3561_v18  ;;  %v3535_v41 = vsel %vm2050_vm9, %v3534_v9, 0.0 }
 0xbdf   : > { %3536 = vadd.xlane.f32.xlu1 %v3535_v41 }
 0xbe0   : > { %v3570_v6 = vmul.f32 %v3569_v25, %v3531_v27 }
 0xbe1   : > { %v3588_v54 = vpop.permute.xlu1 %3587 }
 0xbe2   : > { %v3571_v30 = vsub.f32 %v3560_v49, %v3570_v6  ;;  %v3590_v42 = vmul.f32 %v3588_v54, %v3582_v34 }
 0xbe4   : > { %v3572_v52 = vmul.f32 %v3571_v30, %v3571_v30 }
 0xbe6   : > { %v3573_v29 = vsel %vm2050_vm9, %v3572_v52, 0.0 }
 0xbe7   : > { %3574 = vadd.xlane.f32.xlu0 %v3573_v29 }
 0xbe9   : > { %v3597_v55 = vpop.permute.xlu1 %3596 }
 0xbea   : > { %v3599_v58 = vmul.f32 %v3597_v55, %v3591_v57 }
 0xbec   : > { %v3600_v60 = vmul.f32 %v3599_v58, %v3531_v27 }
 0xbee   : > { %v3601_v45 = vsub.f32 %v3590_v42, %v3600_v60 }
 0xbf0   : > { %v3602_v63 = vmul.f32 %v3601_v45, %v3601_v45 }
 0xbf1   : > { %v3618_v2 = vpop.permute.xlu1 %3617 }
 0xbf2   : > { %v3603_v37 = vsel %vm2050_vm9, %v3602_v63, 0.0  ;;  %v3620_v47 = vmul.f32 %v3618_v2, %v3612_v1 }
 0xbf3   : > { %3604 = vadd.xlane.f32.xlu1 %v3603_v37 }
 0xbf9   : > { %v3627_v61 = vpop.permute.xlu0 %3626 }
 0xbfa   : > { %v3629_v0 = vmul.f32 %v3627_v61, %v3621_v43 }
 0xbfc   : > { %v3630_v53 = vmul.f32 %v3629_v0, %v3531_v27 }
 0xbfe   : > { %v3631_v51 = vsub.f32 %v3620_v47, %v3630_v53 }
 0xc00   : > { %v3632_v7 = vmul.f32 %v3631_v51, %v3631_v51 }
 0xc02   : > { %v3633_v39 = vsel %vm2050_vm9, %v3632_v7, 0.0 }
 0xc03   : > { %3634 = vadd.xlane.f32.xlu0 %v3633_v39 }
 0xc6c   : > { %v3537_v8 = vpop.xlane.xlu1 %3536 }
 0xc6d   : > { %v3539_v56 = vmul.f32 0.125, %v3537_v8 }
 0xc6f   : > { %v3540_v10 = vadd.f32 1e-05, %v3539_v56 }
 0xc71   : > { %4422 = vrsqrt.f32 %v3540_v10 }
 0xc74   : > { %v3575_v22 = vpop.xlane.xlu0 %3574 }
 0xc75   : > { %v3576_v32 = vmul.f32 0.125, %v3575_v22 }
 0xc77   : > { %v3577_v36 = vadd.f32 1e-05, %v3576_v32 }
 0xc79   : > { %4424 = vrsqrt.f32 %v3577_v36 }
 0xc7b   : > { %v4423_v4 = vpop.eup %4422 }
 0xc7c   : > { %v3542_v15 = vmul.f32 %v4423_v4, %v3533_v38 }
 0xc7e   : > { %v3549_v12 = vmul.f32 %v3895_v13, %v3542_v15 }
 0xc80   : > { %v3605_v48 = vpop.xlane.xlu1 %3604  ;;  %v3551_v50 = vmul.f32 %v3550_v40, %v3549_v12 }
 0xc81   : > { %v3606_v5 = vmul.f32 0.125, %v3605_v48 }
 0xc83   : > { %v4425_v59 = vpop.eup %4424  ;;  %v3607_v17 = vadd.f32 1e-05, %v3606_v5 }
 0xc84   : > { %v3579_v19 = vmul.f32 %v4425_v59, %v3571_v30 }
 0xc85   : > { %4426 = vrsqrt.f32 %v3607_v17 }
 0xc86   : > { %v3580_v14 = vmul.f32 %v3895_v13, %v3579_v19 }
 0xc88   : > { %v3581_v20 = vmul.f32 %v3580_v14, %v3550_v40 }
 0xc8a   : > { %3643 = vrot.lane.b32.xlu1 %v3581_v20, %s4784_s11 }
 0xc8f   : > { %v4427_v23 = vpop.eup %4426 }
 0xc90   : > { %v3635_v44 = vpop.xlane.xlu0 %3634  ;;  %v3609_v62 = vmul.f32 %v4427_v23, %v3601_v45 }
 0xc91   : > { %v3636_v24 = vmul.f32 0.125, %v3635_v44 }
 0xc92   : > { %v3610_v26 = vmul.f32 %v3895_v13, %v3609_v62 }
 0xc93   : > { %v3637_v11 = vadd.f32 1e-05, %v3636_v24 }
 0xc94   : > { %v3611_v27 = vmul.f32 %v3610_v26, %v3550_v40 }
 0xc95   : > { %4428 = vrsqrt.f32 %v3637_v11 }
 0xc96   : > { %3647 = vrot.lane.b32.xlu0 %v3611_v27, %s4785_s4 }
 0xc9f   : > { %v4429_v28 = vpop.eup %4428 }
 0xca0   : > { %v3639_v31 = vmul.f32 %v4429_v28, %v3631_v51 }
 0xca2   : > { %v3640_v16 = vmul.f32 %v3895_v13, %v3639_v31 }
 0xca4   : > { %v3641_v3 = vmul.f32 %v3640_v16, %v3550_v40 }
 0xca6   : > { %3651 = vrot.lane.b32.xlu1 %v3641_v3, %s4786_s26 }
 0xcfc   : > { %v3644_v33 = vpop.permute.xlu1 %3643 }
 0xcfd   : > { %v3654_v38 = vsel %vm2050_vm9, %v3551_v50, %v3644_v33 }
 0xd08   : > { %v3648_v35 = vpop.permute.xlu0 %3647 }
 0xd09   : > { %v3656_v9 = vsel %vm3655_vm11, %v3654_v38, %v3648_v35 }
 0xd18   : > { %v3652_v18 = vpop.permute.xlu1 %3651 }
 0xd19   : > { %v3658_v21 = vsel %vm3657_vm12, %v3656_v9, %v3652_v18 }
 0xd1a   : > { %3660 = vst.msk [vmem:[%s373_s22] sm:$0xff] %vm3659_vm13, %v3658_v21 }
 0xd1b PF: > { %s3669_s28 = sld [smem:[#allocation9]]  ;;  %s5911_s30 = sld [smem:[#allocation34_spill]] }
 0xd1c   : > { %s3677_s15 = sshll.u32 %s373_s22, 4  ;;  %s5912_s20 = sld [smem:[#allocation42_spill]]  ;;  %s5756_s15 = int_to_ptr.vmem [resolvable:$true] %s3677_s15 }
 0xd1d   : > { %s5913_s8 = sand.u32 1, %s4679_s29   ;;  %s4561_s1 = scalar_lea.vmem %s5756_s15, 128 }
 0xd1e   : > { %s3662_s9 = scalar_lea.sflag [#allocation13], %s5913_s8  ;;  %p4562_p2 = scmp.ne.s32.totalorder %s5756_s15, %s4561_s1 }
 0xd1f   : > { %p5914_p5 = scmp.ne.s32.totalorder %s5881_s0, 0  ;;  %s4787_s25 = smov [#allocation21]  }
 0xd20   : > { %s4565_s22 = sshll.u32 %s4787_s25, 4  ;;  %s4566_s22 = int_to_ptr.vmem [resolvable:$false] %s4565_s22 }
 0xd21   : > { %s3673_s2 = sadd.s32 %s5911_s30, %s3669_s28  ;;  %p4563_p9 = pnand %p4562_p2, %p5914_p5 }
 0xd22   : > { %s3897_s7 = sshll.u32 %s3673_s2, 7  ;;  %s4567_s19 = scalar_lea.vmem %s4566_s22, 256 }
 0xd23   : > { %s3675_s27 = scalar_lea.hbm %s5912_s20, %s3897_s7  ;;  %p4564_p0 = pneg %p4563_p9 }
 0xd24   : > { %p4568_p3 = scmp.lt.s32.totalorder %s5756_s15, %s4566_s22  ;;  %p4569_p1 = scmp.lt.s32.totalorder %s4567_s19, %s4561_s1 }
 0xd26   : > { %p4570_p12 = por %p4569_p1, %p4568_p3 }
 0xd28   : > { %p4571_p8 = pnand %p4570_p12, %p4564_p0 }
 0xd2a   : > { %4574 = shalt.err (!%p4571_p8)
}
 0xd2b   : > { %s4575_s12 = scalar_lea.hbm %s3675_s27, 128  ;;  %s4579_s26 = scalar_lea.hbm %s5912_s20, 256 }
 0xd2c   : > { %p4576_p10 = scmp.ne.s32.totalorder %s3675_s27, %s4575_s12  ;;  %p4580_p13 = scmp.lt.u32.totalorder %s3675_s27, %s5912_s20 }
 0xd2d   : > { %p4581_p7 = scmp.lt.u32.totalorder %s4579_s26, %s4575_s12  ;;  %p4583_p2 = scmp.lt.u32.totalorder %s4575_s12, %s3675_s27 }
 0xd2e   : > { %p4577_p11 = pnand %p4576_p10, %p5914_p5 }
 0xd2f   : > { %p4582_p4 = por %p4581_p7, %p4580_p13 }
 0xd30   : > { %p4578_p6 = pneg %p4577_p11 }
 0xd31   : > { %p4584_p9 = por %p4583_p2, %p4582_p4 }
 0xd33   : > { %p4585_p0 = pnand %p4584_p9, %p4578_p6 }
 0xd35   : > { %4588 = shalt.err (!%p4585_p0)
}
 0xd36   : > { %4138 = dma.vmem_to_hbm [thread:$0]  (%p5914_p5), %s5756_s15, 128, %s3675_s27, %s3662_s9  }
 0xd37 PF: > { %s5915_s2 = sld [smem:[#allocation28_spill]]  ;;  %s5916_s7 = sld [smem:[#allocation38_spill]] }
 0xd38   : > { %p5918_p1 = scmp.ge.s32.totalorder %s4731_s17, 2 }
 0xd3d   : > { %s3689_s5 = sand.u32 1, %s5915_s2   ;;  %p5917_p3 = scmp.ne.s32.totalorder %s5916_s7, 0 }
 0xd3e   : > { %s3690_s23 = scalar_lea.sflag [#allocation13], %s3689_s5 }
 0xd3f   : > { %p4158_p12 = pnand %p5918_p1, %p5917_p3 }
 0xd41   : > { %4670 = dma.done.wait (!%p4158_p12), %s3690_s23, 128  }
 0xd42   : > { %4672 = vsyncadd (!%p4158_p12), %s3690_s23, 4294967168  ;;  %s30_s17 = sadd.s32 1, %s4731_s17   ;;  %s5920_s0 = sld [smem:[#allocation29_spill]] }
 0xd43   : > { %p5785_p8 = scmp.ge.s32.totalorder %s30_s17, 4   ;;  %s5921_s30 = sld [smem:[#allocation37_spill]] }
 0xd44   : > { %s5922_s15 = sld [smem:[#allocation31_spill]]  ;;  %s5923_s27 = sld [smem:[#allocation32_spill]] }
 0xd45   : > { %s5924_s25 = sld [smem:[#allocation33_spill]]  ;;  %s5925_s11 = sld [smem:[#allocation36_spill]] }
 0xd46   : > { %s5926_s22 = sld [smem:[#allocation35_spill]]  ;;  %s5928_s28 = smov %s4679_s29 }
 0xd47   : > { %s5932_s9 = smov %s5147_s21  ;;  %s5933_s1 = smov %s4703_s10 }
 0xd48   : > { %s5929_s29 = smov %s5920_s0  ;;  %s5935_s12 = smov %s4715_s13 }
 0xd49   : > { %s5936_s13 = smov %s4719_s14  ;;  %s5937_s14 = smov %s5088_s18 }
 0xd4a   : > { %s5930_s8 = smov %s5922_s15  ;;  %s5931_s0 = smov %s5923_s27 }
 0xd4b   : > { %s5934_s10 = smov %s5924_s25  ;;  %s5938_s15 = smov %s4727_s16 }
 0xd4c   : > { %s5939_s16 = smov %s5926_s22  ;;  %29 = sbr.rel (!%p5785_p8) target bundleno = 22 (0x16), region = 166 }
 0xd53   :  { %3695 = vsyncpa [#allocation12], 1 }
 0xd54   :  { %3697 = vsyncpa [#allocation12 + $0x1], 1 }
 0xd55   :  { %3698 = vsyncpa [#allocation17], 1 }
 0xd56   :  { %3700 = vsyncpa [#allocation17 + $0x1], 1 }
 0xd57   :  { %3701 = vsyncpa [#allocation20], 1 }
 0xd58   :  { %3702 = vsyncpa [#allocation13], 1 }
 0xd59   :  { %3704 = vsyncpa [#allocation13 + $0x1], 1 }
 0xd5a   :  { %3705 = vsyncpa [#allocation14], 1 }
 0xd5b   :  { %3707 = vsyncpa [#allocation14 + $0x1], 1 }

</bundles_post_ra>
